<compile_context>
chip_gen: v5e
topology: v5e:2x2
jax: 0.10.0
libtpu: 0.0.40
codegen_flags: <defaults>
</compile_context>

<pallas_src>
import jax
import jax.numpy as jnp
import numpy as np
from jax.experimental import pallas as pl
from jax.experimental.pallas import tpu as pltpu

# Small, deterministic hyperparameters consistent with the module.
NUM_EMB = 16     # num_embeddings
HIDDEN = 32      # hidden_dim
N_LAYERS = 2     # n_layers
BATCH = 2
SEQ = 8
EPS = 1e-5       # PyTorch LayerNorm default eps

GATE_PAD = 128   # 3*HIDDEN = 96 padded to a full lane group (zero columns)
HEAD_PAD = 128   # NUM_EMB + 1 = 17 padded to a full lane group (zero columns)


def _layernorm(x, gamma, beta):
    mu = jnp.mean(x, axis=-1, keepdims=True)
    var = jnp.mean((x - mu) ** 2, axis=-1, keepdims=True)
    return (x - mu) * jax.lax.rsqrt(var + EPS) * gamma + beta


def grunet_kernel(ids_ref, off_ref, h0_ref, emb_tab_ref,
                  w_off_ref, b_off_ref, g1_ref, bt1_ref,
                  wih_ref, whh_ref, bi_ref, bhn_ref,
                  g2_ref, bt2_ref, w_head_ref,
                  head_ref, h_out_ref):
    H = HIDDEN
    B = BATCH

    # ---- Prologue: embedding gather + offset Linear + LayerNorm, time-major (T*B, H) ----
    # One-hot matmul gather: ids live in SMEM, table (16x32 f32) in VMEM -> exact rows.
    iota = jax.lax.broadcasted_iota(jnp.int32, (1, NUM_EMB), 1)
    onehot = jnp.concatenate(
        [(iota == ids_ref[b * SEQ + t]).astype(jnp.float32)
         for t in range(SEQ) for b in range(B)], axis=0)                     # (T*B, NUM_EMB)
    emb = jnp.dot(onehot, emb_tab_ref[...],
                  preferred_element_type=jnp.float32)                        # (T*B, H)

    # off = Linear(1, H)(offsets): per-row scalar (from SMEM) times w_off, time-major.
    w_off = w_off_ref[...]                                                   # (1, H)
    off_lin = jnp.concatenate(
        [off_ref[b * SEQ + t] * w_off
         for t in range(SEQ) for b in range(B)], axis=0) + b_off_ref[...]    # (T*B, H)

    x_all = _layernorm(emb + off_lin, g1_ref[...], bt1_ref[...])             # (T*B, H)

    # ---- GRU: layers run sequentially over the full sequence ----
    # Valid restructure: layer l at time t depends only on layer l-1's output at t and
    # layer l's own state at t-1, so finishing layer 0 before layer 1 is exact.
    h_final = []
    for l in range(N_LAYERS):
        # Input-side gates for ALL timesteps in one MXU push (r/z biases pre-fused;
        # bhh_n stays inside r * (h @ Whh_n + bhh_n) to match PyTorch GRU exactly).
        gi_all = jnp.dot(x_all, wih_ref[l],
                         preferred_element_type=jnp.float32) + bi_ref[l]     # (T*B, 128)
        whh_l = whh_ref[l]                                                   # (H, 128)
        bhn_l = bhn_ref[l]                                                   # (1, H)
        h = h0_ref[l]                                                        # (B, H)
        outs = []
        for t in range(SEQ):                         # static unroll (SEQ is compile-time)
            gi = gi_all[t * B:(t + 1) * B, :]                                # (B, 128)
            gh = jnp.dot(h, whh_l, preferred_element_type=jnp.float32)       # (B, 128)
            rz = jax.nn.sigmoid(gi[:, 0:2 * H] + gh[:, 0:2 * H])             # fused r|z
            r = rz[:, 0:H]
            z = rz[:, H:2 * H]
            n = jnp.tanh(gi[:, 2 * H:3 * H] + r * (gh[:, 2 * H:3 * H] + bhn_l))
            h = n + z * (h - n)                      # == (1-z)*n + z*h
            outs.append(h)
        x_all = jnp.concatenate(outs, axis=0)        # (T*B, H): next layer's input
        h_final.append(h)

    # ---- extract (ReLU + LayerNorm) + fused class/offset heads, batched over T*B ----
    feats = _layernorm(jnp.maximum(x_all, 0.0), g2_ref[...], bt2_ref[...])
    head_ref[...] = jnp.dot(feats, w_head_ref[...],
                            preferred_element_type=jnp.float32)              # (T*B, 128)

    for l in range(N_LAYERS):
        h_out_ref[l] = h_final[l]


def init_params(key):
    """Canonical (PyTorch-equivalent, transposed to (in, out)) parameters."""
    ks = jax.random.split(key, 9)
    s = 0.1
    p = {}
    p['emb_table'] = jax.random.normal(ks[0], (NUM_EMB, HIDDEN), jnp.float32) * s
    # nn.Linear(1, H): weight stored transposed (1, H), bias (1, H)
    p['w_off'] = jax.random.normal(ks[1], (1, HIDDEN), jnp.float32) * s
    p['b_off'] = jax.random.normal(ks[2], (1, HIDDEN), jnp.float32) * s
    # LayerNorm params (default init)
    p['g1'] = jnp.ones((1, HIDDEN), jnp.float32)
    p['bt1'] = jnp.zeros((1, HIDDEN), jnp.float32)
    # GRU: per layer, per gate (r, z, n) weights stored transposed (in, out) = (H, H)
    p['wih'] = jax.random.normal(ks[3], (N_LAYERS, 3, HIDDEN, HIDDEN), jnp.float32) * s
    p['whh'] = jax.random.normal(ks[4], (N_LAYERS, 3, HIDDEN, HIDDEN), jnp.float32) * s
    p['bih'] = jax.random.normal(ks[5], (N_LAYERS, 3, HIDDEN), jnp.float32) * s
    p['bhh'] = jax.random.normal(ks[6], (N_LAYERS, 3, HIDDEN), jnp.float32) * s
    # extract LayerNorm
    p['g2'] = jnp.ones((1, HIDDEN), jnp.float32)
    p['bt2'] = jnp.zeros((1, HIDDEN), jnp.float32)
    # fc_class: Linear(H, V, bias=False) stored transposed (H, V)
    p['wc'] = jax.random.normal(ks[7], (HIDDEN, NUM_EMB), jnp.float32) * s
    # fc_offset: Linear(H, 1, bias=False) stored transposed (H, 1)
    p['wo'] = jax.random.normal(ks[8], (HIDDEN, 1), jnp.float32) * s
    return p


def pack_params(p):
    """Fuse/pad canonical params into the kernel's lane-dense layout.  Called ONCE at
    init (hoisted off the per-call path per perf review)."""
    H = HIDDEN
    zpad_w = jnp.zeros((N_LAYERS, H, GATE_PAD - 3 * H), jnp.float32)
    wih_f = jnp.concatenate([p['wih'][:, 0], p['wih'][:, 1], p['wih'][:, 2], zpad_w], axis=-1)
    whh_f = jnp.concatenate([p['whh'][:, 0], p['whh'][:, 1], p['whh'][:, 2], zpad_w], axis=-1)
    zpad_b = jnp.zeros((N_LAYERS, GATE_PAD - 3 * H), jnp.float32)
    # Fused input-side bias: r/z gates absorb the hidden-side bias too; the n gate keeps
    # only bih_n here (bhh_n must stay inside r*(h@Whh_n+bhh_n)).
    b_i = jnp.concatenate([p['bih'][:, 0] + p['bhh'][:, 0],
                           p['bih'][:, 1] + p['bhh'][:, 1],
                           p['bih'][:, 2], zpad_b], axis=-1)[:, None, :]     # (L, 1, 128)
    b_hn = p['bhh'][:, 2][:, None, :]                                        # (L, 1, H)
    # fc_class + fc_offset fused into one 128-lane-padded head weight.
    w_head = jnp.concatenate(
        [p['wc'], p['wo'], jnp.zeros((H, HEAD_PAD - NUM_EMB - 1), jnp.float32)], axis=-1)
    return dict(emb_table=p['emb_table'], w_off=p['w_off'], b_off=p['b_off'],
                g1=p['g1'], bt1=p['bt1'], wih=wih_f, whh=whh_f, b_i=b_i, b_hn=b_hn,
                g2=p['g2'], bt2=p['bt2'], w_head=w_head)


@jax.jit
def grunet_forward(packed, x_ids, offsets, h0):
    B, T = x_ids.shape
    # The kernel specializes SEQ/BATCH/N_LAYERS as compile-time constants.
    assert (B, T) == (BATCH, SEQ), "kernel is specialized to (BATCH, SEQ)"
    assert h0.shape == (N_LAYERS, BATCH, HIDDEN)

    # Flat batch-major scalars for SMEM (reshape is metadata-only; the time-major
    # rearrangement, gather and offset Linear all happen inside the kernel).
    ids_flat = x_ids.reshape(B * T).astype(jnp.int32)
    off_flat = offsets.reshape(B * T).astype(jnp.float32)

    inputs = (ids_flat, off_flat, h0, packed['emb_table'],
              packed['w_off'], packed['b_off'], packed['g1'], packed['bt1'],
              packed['wih'], packed['whh'], packed['b_i'], packed['b_hn'],
              packed['g2'], packed['bt2'], packed['w_head'])

    smem = pltpu.MemorySpace.SMEM
    vmem = pltpu.MemorySpace.VMEM
    in_specs = ([pl.BlockSpec(memory_space=smem) for _ in range(2)] +
                [pl.BlockSpec(memory_space=vmem) for _ in range(len(inputs) - 2)])
    out_shapes = (jax.ShapeDtypeStruct((T * B, HEAD_PAD), jnp.float32),
                  jax.ShapeDtypeStruct((N_LAYERS, B, HIDDEN), jnp.float32))
    out_specs = (pl.BlockSpec(memory_space=vmem), pl.BlockSpec(memory_space=vmem))

    # TODO(synk): at realistic batch (B >= 8) re-tile the recurrence to full sublane
    # groups and add a "parallel" batch grid axis; at B=2 grid overhead outweighs it.
    head, h_out = pl.pallas_call(
        grunet_kernel,
        out_shape=out_shapes,
        in_specs=in_specs,
        out_specs=out_specs,
    )(*inputs)

    head_tm = head[:, :NUM_EMB + 1].reshape(T, B, NUM_EMB + 1)
    class_out = jnp.transpose(head_tm[..., :NUM_EMB], (1, 0, 2))        # (B, T, num_embeddings)
    # fc_offset ReLU applied here (fuses into the slice/transpose; removed from kernel).
    offset_out = jnp.maximum(jnp.transpose(head_tm[..., NUM_EMB:], (1, 0, 2)), 0.0)  # (B, T, 1)
    return class_out, offset_out, h_out


def reference_forward(params, x_ids, offsets, h0):
    """Pure-JAX reference mirroring the PyTorch forward semantics."""
    emb_x = params['emb_table'][x_ids]                                   # (B, T, H)
    off_lin = offsets[..., None] * params['w_off'][0] + params['b_off'][0]
    xn = _layernorm(emb_x + off_lin, params['g1'][0], params['bt1'][0])
    B, T = x_ids.shape
    h = [h0[l] for l in range(N_LAYERS)]
    outs = []
    for t in range(T):
        x_t = xn[:, t, :]
        for l in range(N_LAYERS):
            gi = [x_t @ params['wih'][l, g] + params['bih'][l, g] for g in range(3)]
            gh = [h[l] @ params['whh'][l, g] + params['bhh'][l, g] for g in range(3)]
            r = jax.nn.sigmoid(gi[0] + gh[0])
            z = jax.nn.sigmoid(gi[1] + gh[1])
            n = jnp.tanh(gi[2] + r * gh[2])
            h[l] = (1.0 - z) * n + z * h[l]
            x_t = h[l]
        outs.append(x_t)
    rnn_out = jnp.stack(outs, axis=1)                                    # (B, T, H)
    feats = _layernorm(jnp.maximum(rnn_out, 0.0), params['g2'][0], params['bt2'][0])
    class_out = feats @ params['wc']
    offset_out = jnp.maximum(feats @ params['wo'], 0.0)
    h_out = jnp.stack(h, axis=0)
    return class_out, offset_out, h_out


if __name__ == "__main__":
    key = jax.random.PRNGKey(0)
    kp, kx, ko = jax.random.split(key, 3)
    params = init_params(kp)
    packed = pack_params(params)          # one-time packing, off the per-call path

    x_ids = jax.random.randint(kx, (BATCH, SEQ), 0, NUM_EMB, dtype=jnp.int32)
    offsets = jax.random.uniform(ko, (BATCH, SEQ), jnp.float32)
    h0 = jnp.zeros((N_LAYERS, BATCH, HIDDEN), jnp.float32)   # init_hidden (h=None path)

    class_out, offset_out, h_out = jax.block_until_ready(
        grunet_forward(packed, x_ids, offsets, h0))

    rc, ro, rh = reference_forward(params, x_ids, offsets, h0)
    # Loose-ish tolerance: TPU f32 matmuls (XLA default and MXU) may use bf16 passes,
    # so kernel-vs-reference differences of O(1e-3..1e-2) are expected and benign.
    np.testing.assert_allclose(np.asarray(class_out), np.asarray(rc), atol=2e-2, rtol=2e-2)
    np.testing.assert_allclose(np.asarray(offset_out), np.asarray(ro), atol=2e-2, rtol=2e-2)
    np.testing.assert_allclose(np.asarray(h_out), np.asarray(rh), atol=2e-2, rtol=2e-2)

    print("KERNEL_OK")
</pallas_src>

<mosaic_0001>
module attributes {stable_mosaic.version = 11 : i64} {
  func.func @grunet_kernel(%arg0: memref<16xi32, #tpu.memory_space<smem>>, %arg1: memref<16xf32, #tpu.memory_space<smem>>, %arg2: memref<2x2x32xf32, #tpu.memory_space<vmem>>, %arg3: memref<16x32xf32, #tpu.memory_space<vmem>>, %arg4: memref<1x32xf32, #tpu.memory_space<vmem>>, %arg5: memref<1x32xf32, #tpu.memory_space<vmem>>, %arg6: memref<1x32xf32, #tpu.memory_space<vmem>>, %arg7: memref<1x32xf32, #tpu.memory_space<vmem>>, %arg8: memref<2x32x128xf32, #tpu.memory_space<vmem>>, %arg9: memref<2x32x128xf32, #tpu.memory_space<vmem>>, %arg10: memref<2x1x128xf32, #tpu.memory_space<vmem>>, %arg11: memref<2x1x32xf32, #tpu.memory_space<vmem>>, %arg12: memref<1x32xf32, #tpu.memory_space<vmem>>, %arg13: memref<1x32xf32, #tpu.memory_space<vmem>>, %arg14: memref<32x128xf32, #tpu.memory_space<vmem>>, %arg15: memref<16x128xf32, #tpu.memory_space<vmem>>, %arg16: memref<2x2x32xf32, #tpu.memory_space<vmem>>) attributes {dimension_semantics = [], scalar_prefetch = 0 : i64, scratch_operands = 0 : i64, tpu.core_type = #tpu.core_type<tc>} {
    %0 = tpu.iota {dimensions = array<i32: 1>} : vector<1x16xi32>
    %c0 = arith.constant 0 : index
    %1 = memref.load %arg0[%c0] : memref<16xi32, #tpu.memory_space<smem>>
    %2 = vector.broadcast %1 : i32 to vector<1x16xi32>
    %3 = arith.cmpi eq, %0, %2 : vector<1x16xi32>
    %4 = arith.extui %3 : vector<1x16xi1> to vector<1x16xi32>
    %5 = arith.sitofp %4 : vector<1x16xi32> to vector<1x16xf32>
    %c8 = arith.constant 8 : index
    %6 = memref.load %arg0[%c8] : memref<16xi32, #tpu.memory_space<smem>>
    %7 = vector.broadcast %6 : i32 to vector<1x16xi32>
    %8 = arith.cmpi eq, %0, %7 : vector<1x16xi32>
    %9 = arith.extui %8 : vector<1x16xi1> to vector<1x16xi32>
    %10 = arith.sitofp %9 : vector<1x16xi32> to vector<1x16xf32>
    %c1 = arith.constant 1 : index
    %11 = memref.load %arg0[%c1] : memref<16xi32, #tpu.memory_space<smem>>
    %12 = vector.broadcast %11 : i32 to vector<1x16xi32>
    %13 = arith.cmpi eq, %0, %12 : vector<1x16xi32>
    %14 = arith.extui %13 : vector<1x16xi1> to vector<1x16xi32>
    %15 = arith.sitofp %14 : vector<1x16xi32> to vector<1x16xf32>
    %c9 = arith.constant 9 : index
    %16 = memref.load %arg0[%c9] : memref<16xi32, #tpu.memory_space<smem>>
    %17 = vector.broadcast %16 : i32 to vector<1x16xi32>
    %18 = arith.cmpi eq, %0, %17 : vector<1x16xi32>
    %19 = arith.extui %18 : vector<1x16xi1> to vector<1x16xi32>
    %20 = arith.sitofp %19 : vector<1x16xi32> to vector<1x16xf32>
    %c2 = arith.constant 2 : index
    %21 = memref.load %arg0[%c2] : memref<16xi32, #tpu.memory_space<smem>>
    %22 = vector.broadcast %21 : i32 to vector<1x16xi32>
    %23 = arith.cmpi eq, %0, %22 : vector<1x16xi32>
    %24 = arith.extui %23 : vector<1x16xi1> to vector<1x16xi32>
    %25 = arith.sitofp %24 : vector<1x16xi32> to vector<1x16xf32>
    %c10 = arith.constant 10 : index
    %26 = memref.load %arg0[%c10] : memref<16xi32, #tpu.memory_space<smem>>
    %27 = vector.broadcast %26 : i32 to vector<1x16xi32>
    %28 = arith.cmpi eq, %0, %27 : vector<1x16xi32>
    %29 = arith.extui %28 : vector<1x16xi1> to vector<1x16xi32>
    %30 = arith.sitofp %29 : vector<1x16xi32> to vector<1x16xf32>
    %c3 = arith.constant 3 : index
    %31 = memref.load %arg0[%c3] : memref<16xi32, #tpu.memory_space<smem>>
    %32 = vector.broadcast %31 : i32 to vector<1x16xi32>
    %33 = arith.cmpi eq, %0, %32 : vector<1x16xi32>
    %34 = arith.extui %33 : vector<1x16xi1> to vector<1x16xi32>
    %35 = arith.sitofp %34 : vector<1x16xi32> to vector<1x16xf32>
    %c11 = arith.constant 11 : index
    %36 = memref.load %arg0[%c11] : memref<16xi32, #tpu.memory_space<smem>>
    %37 = vector.broadcast %36 : i32 to vector<1x16xi32>
    %38 = arith.cmpi eq, %0, %37 : vector<1x16xi32>
    %39 = arith.extui %38 : vector<1x16xi1> to vector<1x16xi32>
    %40 = arith.sitofp %39 : vector<1x16xi32> to vector<1x16xf32>
    %c4 = arith.constant 4 : index
    %41 = memref.load %arg0[%c4] : memref<16xi32, #tpu.memory_space<smem>>
    %42 = vector.broadcast %41 : i32 to vector<1x16xi32>
    %43 = arith.cmpi eq, %0, %42 : vector<1x16xi32>
    %44 = arith.extui %43 : vector<1x16xi1> to vector<1x16xi32>
    %45 = arith.sitofp %44 : vector<1x16xi32> to vector<1x16xf32>
    %c12 = arith.constant 12 : index
    %46 = memref.load %arg0[%c12] : memref<16xi32, #tpu.memory_space<smem>>
    %47 = vector.broadcast %46 : i32 to vector<1x16xi32>
    %48 = arith.cmpi eq, %0, %47 : vector<1x16xi32>
    %49 = arith.extui %48 : vector<1x16xi1> to vector<1x16xi32>
    %50 = arith.sitofp %49 : vector<1x16xi32> to vector<1x16xf32>
    %c5 = arith.constant 5 : index
    %51 = memref.load %arg0[%c5] : memref<16xi32, #tpu.memory_space<smem>>
    %52 = vector.broadcast %51 : i32 to vector<1x16xi32>
    %53 = arith.cmpi eq, %0, %52 : vector<1x16xi32>
    %54 = arith.extui %53 : vector<1x16xi1> to vector<1x16xi32>
    %55 = arith.sitofp %54 : vector<1x16xi32> to vector<1x16xf32>
    %c13 = arith.constant 13 : index
    %56 = memref.load %arg0[%c13] : memref<16xi32, #tpu.memory_space<smem>>
    %57 = vector.broadcast %56 : i32 to vector<1x16xi32>
    %58 = arith.cmpi eq, %0, %57 : vector<1x16xi32>
    %59 = arith.extui %58 : vector<1x16xi1> to vector<1x16xi32>
    %60 = arith.sitofp %59 : vector<1x16xi32> to vector<1x16xf32>
    %c6 = arith.constant 6 : index
    %61 = memref.load %arg0[%c6] : memref<16xi32, #tpu.memory_space<smem>>
    %62 = vector.broadcast %61 : i32 to vector<1x16xi32>
    %63 = arith.cmpi eq, %0, %62 : vector<1x16xi32>
    %64 = arith.extui %63 : vector<1x16xi1> to vector<1x16xi32>
    %65 = arith.sitofp %64 : vector<1x16xi32> to vector<1x16xf32>
    %c14 = arith.constant 14 : index
    %66 = memref.load %arg0[%c14] : memref<16xi32, #tpu.memory_space<smem>>
    %67 = vector.broadcast %66 : i32 to vector<1x16xi32>
    %68 = arith.cmpi eq, %0, %67 : vector<1x16xi32>
    %69 = arith.extui %68 : vector<1x16xi1> to vector<1x16xi32>
    %70 = arith.sitofp %69 : vector<1x16xi32> to vector<1x16xf32>
    %c7 = arith.constant 7 : index
    %71 = memref.load %arg0[%c7] : memref<16xi32, #tpu.memory_space<smem>>
    %72 = vector.broadcast %71 : i32 to vector<1x16xi32>
    %73 = arith.cmpi eq, %0, %72 : vector<1x16xi32>
    %74 = arith.extui %73 : vector<1x16xi1> to vector<1x16xi32>
    %75 = arith.sitofp %74 : vector<1x16xi32> to vector<1x16xf32>
    %c15 = arith.constant 15 : index
    %76 = memref.load %arg0[%c15] : memref<16xi32, #tpu.memory_space<smem>>
    %77 = vector.broadcast %76 : i32 to vector<1x16xi32>
    %78 = arith.cmpi eq, %0, %77 : vector<1x16xi32>
    %79 = arith.extui %78 : vector<1x16xi1> to vector<1x16xi32>
    %80 = arith.sitofp %79 : vector<1x16xi32> to vector<1x16xf32>
    %81 = tpu.concatenate %5, %10, %15, %20, %25, %30, %35, %40, %45, %50, %55, %60, %65, %70, %75, %80 in 0 : vector<1x16xf32>, vector<1x16xf32>, vector<1x16xf32>, vector<1x16xf32>, vector<1x16xf32>, vector<1x16xf32>, vector<1x16xf32>, vector<1x16xf32>, vector<1x16xf32>, vector<1x16xf32>, vector<1x16xf32>, vector<1x16xf32>, vector<1x16xf32>, vector<1x16xf32>, vector<1x16xf32>, vector<1x16xf32> -> vector<16x16xf32>
    %c0_0 = arith.constant 0 : index
    %c0_1 = arith.constant 0 : index
    %82 = vector.load %arg3[%c0_0, %c0_1] : memref<16x32xf32, #tpu.memory_space<vmem>>, vector<16x32xf32>
    %cst = arith.constant dense<0.000000e+00> : vector<16x32xf32>
    %83 = tpu.matmul %81, %82, %cst {dimension_numbers = #tpu.dot_dimension_numbers<[1], [0], [0], [1], [0, 0, 1, 1], [], []>} : vector<16x16xf32>, vector<16x32xf32>, vector<16x32xf32> -> vector<16x32xf32>
    %c0_2 = arith.constant 0 : index
    %c0_3 = arith.constant 0 : index
    %84 = vector.load %arg4[%c0_2, %c0_3] : memref<1x32xf32, #tpu.memory_space<vmem>>, vector<1x32xf32>
    %c0_4 = arith.constant 0 : index
    %85 = memref.load %arg1[%c0_4] : memref<16xf32, #tpu.memory_space<smem>>
    %86 = vector.broadcast %85 : f32 to vector<1x32xf32>
    %87 = arith.mulf %86, %84 : vector<1x32xf32>
    %c8_5 = arith.constant 8 : index
    %88 = memref.load %arg1[%c8_5] : memref<16xf32, #tpu.memory_space<smem>>
    %89 = vector.broadcast %88 : f32 to vector<1x32xf32>
    %90 = arith.mulf %89, %84 : vector<1x32xf32>
    %c1_6 = arith.constant 1 : index
    %91 = memref.load %arg1[%c1_6] : memref<16xf32, #tpu.memory_space<smem>>
    %92 = vector.broadcast %91 : f32 to vector<1x32xf32>
    %93 = arith.mulf %92, %84 : vector<1x32xf32>
    %c9_7 = arith.constant 9 : index
    %94 = memref.load %arg1[%c9_7] : memref<16xf32, #tpu.memory_space<smem>>
    %95 = vector.broadcast %94 : f32 to vector<1x32xf32>
    %96 = arith.mulf %95, %84 : vector<1x32xf32>
    %c2_8 = arith.constant 2 : index
    %97 = memref.load %arg1[%c2_8] : memref<16xf32, #tpu.memory_space<smem>>
    %98 = vector.broadcast %97 : f32 to vector<1x32xf32>
    %99 = arith.mulf %98, %84 : vector<1x32xf32>
    %c10_9 = arith.constant 10 : index
    %100 = memref.load %arg1[%c10_9] : memref<16xf32, #tpu.memory_space<smem>>
    %101 = vector.broadcast %100 : f32 to vector<1x32xf32>
    %102 = arith.mulf %101, %84 : vector<1x32xf32>
    %c3_10 = arith.constant 3 : index
    %103 = memref.load %arg1[%c3_10] : memref<16xf32, #tpu.memory_space<smem>>
    %104 = vector.broadcast %103 : f32 to vector<1x32xf32>
    %105 = arith.mulf %104, %84 : vector<1x32xf32>
    %c11_11 = arith.constant 11 : index
    %106 = memref.load %arg1[%c11_11] : memref<16xf32, #tpu.memory_space<smem>>
    %107 = vector.broadcast %106 : f32 to vector<1x32xf32>
    %108 = arith.mulf %107, %84 : vector<1x32xf32>
    %c4_12 = arith.constant 4 : index
    %109 = memref.load %arg1[%c4_12] : memref<16xf32, #tpu.memory_space<smem>>
    %110 = vector.broadcast %109 : f32 to vector<1x32xf32>
    %111 = arith.mulf %110, %84 : vector<1x32xf32>
    %c12_13 = arith.constant 12 : index
    %112 = memref.load %arg1[%c12_13] : memref<16xf32, #tpu.memory_space<smem>>
    %113 = vector.broadcast %112 : f32 to vector<1x32xf32>
    %114 = arith.mulf %113, %84 : vector<1x32xf32>
    %c5_14 = arith.constant 5 : index
    %115 = memref.load %arg1[%c5_14] : memref<16xf32, #tpu.memory_space<smem>>
    %116 = vector.broadcast %115 : f32 to vector<1x32xf32>
    %117 = arith.mulf %116, %84 : vector<1x32xf32>
    %c13_15 = arith.constant 13 : index
    %118 = memref.load %arg1[%c13_15] : memref<16xf32, #tpu.memory_space<smem>>
    %119 = vector.broadcast %118 : f32 to vector<1x32xf32>
    %120 = arith.mulf %119, %84 : vector<1x32xf32>
    %c6_16 = arith.constant 6 : index
    %121 = memref.load %arg1[%c6_16] : memref<16xf32, #tpu.memory_space<smem>>
    %122 = vector.broadcast %121 : f32 to vector<1x32xf32>
    %123 = arith.mulf %122, %84 : vector<1x32xf32>
    %c14_17 = arith.constant 14 : index
    %124 = memref.load %arg1[%c14_17] : memref<16xf32, #tpu.memory_space<smem>>
    %125 = vector.broadcast %124 : f32 to vector<1x32xf32>
    %126 = arith.mulf %125, %84 : vector<1x32xf32>
    %c7_18 = arith.constant 7 : index
    %127 = memref.load %arg1[%c7_18] : memref<16xf32, #tpu.memory_space<smem>>
    %128 = vector.broadcast %127 : f32 to vector<1x32xf32>
    %129 = arith.mulf %128, %84 : vector<1x32xf32>
    %c15_19 = arith.constant 15 : index
    %130 = memref.load %arg1[%c15_19] : memref<16xf32, #tpu.memory_space<smem>>
    %131 = vector.broadcast %130 : f32 to vector<1x32xf32>
    %132 = arith.mulf %131, %84 : vector<1x32xf32>
    %133 = tpu.concatenate %87, %90, %93, %96, %99, %102, %105, %108, %111, %114, %117, %120, %123, %126, %129, %132 in 0 : vector<1x32xf32>, vector<1x32xf32>, vector<1x32xf32>, vector<1x32xf32>, vector<1x32xf32>, vector<1x32xf32>, vector<1x32xf32>, vector<1x32xf32>, vector<1x32xf32>, vector<1x32xf32>, vector<1x32xf32>, vector<1x32xf32>, vector<1x32xf32>, vector<1x32xf32>, vector<1x32xf32>, vector<1x32xf32> -> vector<16x32xf32>
    %c0_20 = arith.constant 0 : index
    %c0_21 = arith.constant 0 : index
    %134 = vector.load %arg5[%c0_20, %c0_21] : memref<1x32xf32, #tpu.memory_space<vmem>>, vector<1x32xf32>
    %135 = vector.broadcast %134 : vector<1x32xf32> to vector<16x32xf32>
    %136 = arith.addf %133, %135 : vector<16x32xf32>
    %137 = arith.addf %83, %136 : vector<16x32xf32>
    %c0_22 = arith.constant 0 : index
    %c0_23 = arith.constant 0 : index
    %138 = vector.load %arg6[%c0_22, %c0_23] : memref<1x32xf32, #tpu.memory_space<vmem>>, vector<1x32xf32>
    %c0_24 = arith.constant 0 : index
    %c0_25 = arith.constant 0 : index
    %139 = vector.load %arg7[%c0_24, %c0_25] : memref<1x32xf32, #tpu.memory_space<vmem>>, vector<1x32xf32>
    %cst_26 = arith.constant dense<0.000000e+00> : vector<16xf32>
    %140 = vector.multi_reduction <add>, %137, %cst_26 [1] : vector<16x32xf32> to vector<16xf32>
    %141 = vector.shape_cast %140 : vector<16xf32> to vector<16x1xf32>
    %cst_27 = arith.constant 3.200000e+01 : f32
    %142 = vector.broadcast %cst_27 : f32 to vector<16x1xf32>
    %143 = arith.divf %141, %142 : vector<16x1xf32>
    %144 = vector.broadcast %143 : vector<16x1xf32> to vector<16x32xf32>
    %145 = arith.subf %137, %144 : vector<16x32xf32>
    %146 = arith.mulf %145, %145 : vector<16x32xf32>
    %cst_28 = arith.constant dense<0.000000e+00> : vector<16xf32>
    %147 = vector.multi_reduction <add>, %146, %cst_28 [1] : vector<16x32xf32> to vector<16xf32>
    %148 = vector.shape_cast %147 : vector<16xf32> to vector<16x1xf32>
    %cst_29 = arith.constant 3.200000e+01 : f32
    %149 = vector.broadcast %cst_29 : f32 to vector<16x1xf32>
    %150 = arith.divf %148, %149 : vector<16x1xf32>
    %151 = vector.broadcast %143 : vector<16x1xf32> to vector<16x32xf32>
    %152 = arith.subf %137, %151 : vector<16x32xf32>
    %cst_30 = arith.constant 9.99999974E-6 : f32
    %153 = vector.broadcast %cst_30 : f32 to vector<16x1xf32>
    %154 = arith.addf %150, %153 : vector<16x1xf32>
    %155 = math.rsqrt %154 : vector<16x1xf32>
    %156 = vector.broadcast %155 : vector<16x1xf32> to vector<16x32xf32>
    %157 = arith.mulf %152, %156 : vector<16x32xf32>
    %158 = vector.broadcast %138 : vector<1x32xf32> to vector<16x32xf32>
    %159 = arith.mulf %157, %158 : vector<16x32xf32>
    %160 = vector.broadcast %139 : vector<1x32xf32> to vector<16x32xf32>
    %161 = arith.addf %159, %160 : vector<16x32xf32>
    %c0_31 = arith.constant 0 : index
    %c0_32 = arith.constant 0 : index
    %c0_33 = arith.constant 0 : index
    %162 = vector.load %arg8[%c0_31, %c0_32, %c0_33] : memref<2x32x128xf32, #tpu.memory_space<vmem>>, vector<1x32x128xf32>
    %163 = vector.shape_cast %162 : vector<1x32x128xf32> to vector<32x128xf32>
    %cst_34 = arith.constant dense<0.000000e+00> : vector<16x128xf32>
    %164 = tpu.matmul %161, %163, %cst_34 {dimension_numbers = #tpu.dot_dimension_numbers<[1], [0], [0], [1], [0, 0, 1, 1], [], []>} : vector<16x32xf32>, vector<32x128xf32>, vector<16x128xf32> -> vector<16x128xf32>
    %c0_35 = arith.constant 0 : index
    %c0_36 = arith.constant 0 : index
    %c0_37 = arith.constant 0 : index
    %165 = vector.load %arg10[%c0_35, %c0_36, %c0_37] : memref<2x1x128xf32, #tpu.memory_space<vmem>>, vector<1x1x128xf32>
    %166 = vector.shape_cast %165 : vector<1x1x128xf32> to vector<1x128xf32>
    %167 = vector.broadcast %166 : vector<1x128xf32> to vector<16x128xf32>
    %168 = arith.addf %164, %167 : vector<16x128xf32>
    %c0_38 = arith.constant 0 : index
    %c0_39 = arith.constant 0 : index
    %c0_40 = arith.constant 0 : index
    %169 = vector.load %arg9[%c0_38, %c0_39, %c0_40] : memref<2x32x128xf32, #tpu.memory_space<vmem>>, vector<1x32x128xf32>
    %170 = vector.shape_cast %169 : vector<1x32x128xf32> to vector<32x128xf32>
    %c0_41 = arith.constant 0 : index
    %c0_42 = arith.constant 0 : index
    %c0_43 = arith.constant 0 : index
    %171 = vector.load %arg11[%c0_41, %c0_42, %c0_43] : memref<2x1x32xf32, #tpu.memory_space<vmem>>, vector<1x1x32xf32>
    %172 = vector.shape_cast %171 : vector<1x1x32xf32> to vector<1x32xf32>
    %c0_44 = arith.constant 0 : index
    %c0_45 = arith.constant 0 : index
    %c0_46 = arith.constant 0 : index
    %173 = vector.load %arg2[%c0_44, %c0_45, %c0_46] : memref<2x2x32xf32, #tpu.memory_space<vmem>>, vector<1x2x32xf32>
    %174 = vector.shape_cast %173 : vector<1x2x32xf32> to vector<2x32xf32>
    %175 = vector.extract_strided_slice %168 {offsets = [0, 0], sizes = [2, 128], strides = [1, 1]} : vector<16x128xf32> to vector<2x128xf32>
    %cst_47 = arith.constant dense<0.000000e+00> : vector<2x128xf32>
    %176 = tpu.matmul %174, %170, %cst_47 {dimension_numbers = #tpu.dot_dimension_numbers<[1], [0], [0], [1], [0, 0, 1, 1], [], []>} : vector<2x32xf32>, vector<32x128xf32>, vector<2x128xf32> -> vector<2x128xf32>
    %177 = vector.extract_strided_slice %175 {offsets = [0, 0], sizes = [2, 64], strides = [1, 1]} : vector<2x128xf32> to vector<2x64xf32>
    %178 = vector.extract_strided_slice %176 {offsets = [0, 0], sizes = [2, 64], strides = [1, 1]} : vector<2x128xf32> to vector<2x64xf32>
    %179 = arith.addf %177, %178 : vector<2x64xf32>
    %180 = arith.negf %179 : vector<2x64xf32>
    %181 = math.exp %180 : vector<2x64xf32>
    %cst_48 = arith.constant 1.000000e+00 : f32
    %182 = vector.broadcast %cst_48 : f32 to vector<2x64xf32>
    %183 = arith.addf %182, %181 : vector<2x64xf32>
    %184 = arith.divf %182, %183 : vector<2x64xf32>
    %185 = vector.extract_strided_slice %184 {offsets = [0, 0], sizes = [2, 32], strides = [1, 1]} : vector<2x64xf32> to vector<2x32xf32>
    %186 = vector.extract_strided_slice %184 {offsets = [0, 32], sizes = [2, 32], strides = [1, 1]} : vector<2x64xf32> to vector<2x32xf32>
    %187 = vector.extract_strided_slice %175 {offsets = [0, 64], sizes = [2, 32], strides = [1, 1]} : vector<2x128xf32> to vector<2x32xf32>
    %188 = vector.extract_strided_slice %176 {offsets = [0, 64], sizes = [2, 32], strides = [1, 1]} : vector<2x128xf32> to vector<2x32xf32>
    %189 = vector.broadcast %172 : vector<1x32xf32> to vector<2x32xf32>
    %190 = arith.addf %188, %189 : vector<2x32xf32>
    %191 = arith.mulf %185, %190 : vector<2x32xf32>
    %192 = arith.addf %187, %191 : vector<2x32xf32>
    %193 = math.tanh %192 : vector<2x32xf32>
    %194 = arith.subf %174, %193 : vector<2x32xf32>
    %195 = arith.mulf %186, %194 : vector<2x32xf32>
    %196 = arith.addf %193, %195 : vector<2x32xf32>
    %197 = vector.extract_strided_slice %168 {offsets = [2, 0], sizes = [2, 128], strides = [1, 1]} : vector<16x128xf32> to vector<2x128xf32>
    %cst_49 = arith.constant dense<0.000000e+00> : vector<2x128xf32>
    %198 = tpu.matmul %196, %170, %cst_49 {dimension_numbers = #tpu.dot_dimension_numbers<[1], [0], [0], [1], [0, 0, 1, 1], [], []>} : vector<2x32xf32>, vector<32x128xf32>, vector<2x128xf32> -> vector<2x128xf32>
    %199 = vector.extract_strided_slice %197 {offsets = [0, 0], sizes = [2, 64], strides = [1, 1]} : vector<2x128xf32> to vector<2x64xf32>
    %200 = vector.extract_strided_slice %198 {offsets = [0, 0], sizes = [2, 64], strides = [1, 1]} : vector<2x128xf32> to vector<2x64xf32>
    %201 = arith.addf %199, %200 : vector<2x64xf32>
    %202 = arith.negf %201 : vector<2x64xf32>
    %203 = math.exp %202 : vector<2x64xf32>
    %cst_50 = arith.constant 1.000000e+00 : f32
    %204 = vector.broadcast %cst_50 : f32 to vector<2x64xf32>
    %205 = arith.addf %204, %203 : vector<2x64xf32>
    %206 = arith.divf %204, %205 : vector<2x64xf32>
    %207 = vector.extract_strided_slice %206 {offsets = [0, 0], sizes = [2, 32], strides = [1, 1]} : vector<2x64xf32> to vector<2x32xf32>
    %208 = vector.extract_strided_slice %206 {offsets = [0, 32], sizes = [2, 32], strides = [1, 1]} : vector<2x64xf32> to vector<2x32xf32>
    %209 = vector.extract_strided_slice %197 {offsets = [0, 64], sizes = [2, 32], strides = [1, 1]} : vector<2x128xf32> to vector<2x32xf32>
    %210 = vector.extract_strided_slice %198 {offsets = [0, 64], sizes = [2, 32], strides = [1, 1]} : vector<2x128xf32> to vector<2x32xf32>
    %211 = vector.broadcast %172 : vector<1x32xf32> to vector<2x32xf32>
    %212 = arith.addf %210, %211 : vector<2x32xf32>
    %213 = arith.mulf %207, %212 : vector<2x32xf32>
    %214 = arith.addf %209, %213 : vector<2x32xf32>
    %215 = math.tanh %214 : vector<2x32xf32>
    %216 = arith.subf %196, %215 : vector<2x32xf32>
    %217 = arith.mulf %208, %216 : vector<2x32xf32>
    %218 = arith.addf %215, %217 : vector<2x32xf32>
    %219 = vector.extract_strided_slice %168 {offsets = [4, 0], sizes = [2, 128], strides = [1, 1]} : vector<16x128xf32> to vector<2x128xf32>
    %cst_51 = arith.constant dense<0.000000e+00> : vector<2x128xf32>
    %220 = tpu.matmul %218, %170, %cst_51 {dimension_numbers = #tpu.dot_dimension_numbers<[1], [0], [0], [1], [0, 0, 1, 1], [], []>} : vector<2x32xf32>, vector<32x128xf32>, vector<2x128xf32> -> vector<2x128xf32>
    %221 = vector.extract_strided_slice %219 {offsets = [0, 0], sizes = [2, 64], strides = [1, 1]} : vector<2x128xf32> to vector<2x64xf32>
    %222 = vector.extract_strided_slice %220 {offsets = [0, 0], sizes = [2, 64], strides = [1, 1]} : vector<2x128xf32> to vector<2x64xf32>
    %223 = arith.addf %221, %222 : vector<2x64xf32>
    %224 = arith.negf %223 : vector<2x64xf32>
    %225 = math.exp %224 : vector<2x64xf32>
    %cst_52 = arith.constant 1.000000e+00 : f32
    %226 = vector.broadcast %cst_52 : f32 to vector<2x64xf32>
    %227 = arith.addf %226, %225 : vector<2x64xf32>
    %228 = arith.divf %226, %227 : vector<2x64xf32>
    %229 = vector.extract_strided_slice %228 {offsets = [0, 0], sizes = [2, 32], strides = [1, 1]} : vector<2x64xf32> to vector<2x32xf32>
    %230 = vector.extract_strided_slice %228 {offsets = [0, 32], sizes = [2, 32], strides = [1, 1]} : vector<2x64xf32> to vector<2x32xf32>
    %231 = vector.extract_strided_slice %219 {offsets = [0, 64], sizes = [2, 32], strides = [1, 1]} : vector<2x128xf32> to vector<2x32xf32>
    %232 = vector.extract_strided_slice %220 {offsets = [0, 64], sizes = [2, 32], strides = [1, 1]} : vector<2x128xf32> to vector<2x32xf32>
    %233 = vector.broadcast %172 : vector<1x32xf32> to vector<2x32xf32>
    %234 = arith.addf %232, %233 : vector<2x32xf32>
    %235 = arith.mulf %229, %234 : vector<2x32xf32>
    %236 = arith.addf %231, %235 : vector<2x32xf32>
    %237 = math.tanh %236 : vector<2x32xf32>
    %238 = arith.subf %218, %237 : vector<2x32xf32>
    %239 = arith.mulf %230, %238 : vector<2x32xf32>
    %240 = arith.addf %237, %239 : vector<2x32xf32>
    %241 = vector.extract_strided_slice %168 {offsets = [6, 0], sizes = [2, 128], strides = [1, 1]} : vector<16x128xf32> to vector<2x128xf32>
    %cst_53 = arith.constant dense<0.000000e+00> : vector<2x128xf32>
    %242 = tpu.matmul %240, %170, %cst_53 {dimension_numbers = #tpu.dot_dimension_numbers<[1], [0], [0], [1], [0, 0, 1, 1], [], []>} : vector<2x32xf32>, vector<32x128xf32>, vector<2x128xf32> -> vector<2x128xf32>
    %243 = vector.extract_strided_slice %241 {offsets = [0, 0], sizes = [2, 64], strides = [1, 1]} : vector<2x128xf32> to vector<2x64xf32>
    %244 = vector.extract_strided_slice %242 {offsets = [0, 0], sizes = [2, 64], strides = [1, 1]} : vector<2x128xf32> to vector<2x64xf32>
    %245 = arith.addf %243, %244 : vector<2x64xf32>
    %246 = arith.negf %245 : vector<2x64xf32>
    %247 = math.exp %246 : vector<2x64xf32>
    %cst_54 = arith.constant 1.000000e+00 : f32
    %248 = vector.broadcast %cst_54 : f32 to vector<2x64xf32>
    %249 = arith.addf %248, %247 : vector<2x64xf32>
    %250 = arith.divf %248, %249 : vector<2x64xf32>
    %251 = vector.extract_strided_slice %250 {offsets = [0, 0], sizes = [2, 32], strides = [1, 1]} : vector<2x64xf32> to vector<2x32xf32>
    %252 = vector.extract_strided_slice %250 {offsets = [0, 32], sizes = [2, 32], strides = [1, 1]} : vector<2x64xf32> to vector<2x32xf32>
    %253 = vector.extract_strided_slice %241 {offsets = [0, 64], sizes = [2, 32], strides = [1, 1]} : vector<2x128xf32> to vector<2x32xf32>
    %254 = vector.extract_strided_slice %242 {offsets = [0, 64], sizes = [2, 32], strides = [1, 1]} : vector<2x128xf32> to vector<2x32xf32>
    %255 = vector.broadcast %172 : vector<1x32xf32> to vector<2x32xf32>
    %256 = arith.addf %254, %255 : vector<2x32xf32>
    %257 = arith.mulf %251, %256 : vector<2x32xf32>
    %258 = arith.addf %253, %257 : vector<2x32xf32>
    %259 = math.tanh %258 : vector<2x32xf32>
    %260 = arith.subf %240, %259 : vector<2x32xf32>
    %261 = arith.mulf %252, %260 : vector<2x32xf32>
    %262 = arith.addf %259, %261 : vector<2x32xf32>
    %263 = vector.extract_strided_slice %168 {offsets = [8, 0], sizes = [2, 128], strides = [1, 1]} : vector<16x128xf32> to vector<2x128xf32>
    %cst_55 = arith.constant dense<0.000000e+00> : vector<2x128xf32>
    %264 = tpu.matmul %262, %170, %cst_55 {dimension_numbers = #tpu.dot_dimension_numbers<[1], [0], [0], [1], [0, 0, 1, 1], [], []>} : vector<2x32xf32>, vector<32x128xf32>, vector<2x128xf32> -> vector<2x128xf32>
    %265 = vector.extract_strided_slice %263 {offsets = [0, 0], sizes = [2, 64], strides = [1, 1]} : vector<2x128xf32> to vector<2x64xf32>
    %266 = vector.extract_strided_slice %264 {offsets = [0, 0], sizes = [2, 64], strides = [1, 1]} : vector<2x128xf32> to vector<2x64xf32>
    %267 = arith.addf %265, %266 : vector<2x64xf32>
    %268 = arith.negf %267 : vector<2x64xf32>
    %269 = math.exp %268 : vector<2x64xf32>
    %cst_56 = arith.constant 1.000000e+00 : f32
    %270 = vector.broadcast %cst_56 : f32 to vector<2x64xf32>
    %271 = arith.addf %270, %269 : vector<2x64xf32>
    %272 = arith.divf %270, %271 : vector<2x64xf32>
    %273 = vector.extract_strided_slice %272 {offsets = [0, 0], sizes = [2, 32], strides = [1, 1]} : vector<2x64xf32> to vector<2x32xf32>
    %274 = vector.extract_strided_slice %272 {offsets = [0, 32], sizes = [2, 32], strides = [1, 1]} : vector<2x64xf32> to vector<2x32xf32>
    %275 = vector.extract_strided_slice %263 {offsets = [0, 64], sizes = [2, 32], strides = [1, 1]} : vector<2x128xf32> to vector<2x32xf32>
    %276 = vector.extract_strided_slice %264 {offsets = [0, 64], sizes = [2, 32], strides = [1, 1]} : vector<2x128xf32> to vector<2x32xf32>
    %277 = vector.broadcast %172 : vector<1x32xf32> to vector<2x32xf32>
    %278 = arith.addf %276, %277 : vector<2x32xf32>
    %279 = arith.mulf %273, %278 : vector<2x32xf32>
    %280 = arith.addf %275, %279 : vector<2x32xf32>
    %281 = math.tanh %280 : vector<2x32xf32>
    %282 = arith.subf %262, %281 : vector<2x32xf32>
    %283 = arith.mulf %274, %282 : vector<2x32xf32>
    %284 = arith.addf %281, %283 : vector<2x32xf32>
    %285 = vector.extract_strided_slice %168 {offsets = [10, 0], sizes = [2, 128], strides = [1, 1]} : vector<16x128xf32> to vector<2x128xf32>
    %cst_57 = arith.constant dense<0.000000e+00> : vector<2x128xf32>
    %286 = tpu.matmul %284, %170, %cst_57 {dimension_numbers = #tpu.dot_dimension_numbers<[1], [0], [0], [1], [0, 0, 1, 1], [], []>} : vector<2x32xf32>, vector<32x128xf32>, vector<2x128xf32> -> vector<2x128xf32>
    %287 = vector.extract_strided_slice %285 {offsets = [0, 0], sizes = [2, 64], strides = [1, 1]} : vector<2x128xf32> to vector<2x64xf32>
    %288 = vector.extract_strided_slice %286 {offsets = [0, 0], sizes = [2, 64], strides = [1, 1]} : vector<2x128xf32> to vector<2x64xf32>
    %289 = arith.addf %287, %288 : vector<2x64xf32>
    %290 = arith.negf %289 : vector<2x64xf32>
    %291 = math.exp %290 : vector<2x64xf32>
    %cst_58 = arith.constant 1.000000e+00 : f32
    %292 = vector.broadcast %cst_58 : f32 to vector<2x64xf32>
    %293 = arith.addf %292, %291 : vector<2x64xf32>
    %294 = arith.divf %292, %293 : vector<2x64xf32>
    %295 = vector.extract_strided_slice %294 {offsets = [0, 0], sizes = [2, 32], strides = [1, 1]} : vector<2x64xf32> to vector<2x32xf32>
    %296 = vector.extract_strided_slice %294 {offsets = [0, 32], sizes = [2, 32], strides = [1, 1]} : vector<2x64xf32> to vector<2x32xf32>
    %297 = vector.extract_strided_slice %285 {offsets = [0, 64], sizes = [2, 32], strides = [1, 1]} : vector<2x128xf32> to vector<2x32xf32>
    %298 = vector.extract_strided_slice %286 {offsets = [0, 64], sizes = [2, 32], strides = [1, 1]} : vector<2x128xf32> to vector<2x32xf32>
    %299 = vector.broadcast %172 : vector<1x32xf32> to vector<2x32xf32>
    %300 = arith.addf %298, %299 : vector<2x32xf32>
    %301 = arith.mulf %295, %300 : vector<2x32xf32>
    %302 = arith.addf %297, %301 : vector<2x32xf32>
    %303 = math.tanh %302 : vector<2x32xf32>
    %304 = arith.subf %284, %303 : vector<2x32xf32>
    %305 = arith.mulf %296, %304 : vector<2x32xf32>
    %306 = arith.addf %303, %305 : vector<2x32xf32>
    %307 = vector.extract_strided_slice %168 {offsets = [12, 0], sizes = [2, 128], strides = [1, 1]} : vector<16x128xf32> to vector<2x128xf32>
    %cst_59 = arith.constant dense<0.000000e+00> : vector<2x128xf32>
    %308 = tpu.matmul %306, %170, %cst_59 {dimension_numbers = #tpu.dot_dimension_numbers<[1], [0], [0], [1], [0, 0, 1, 1], [], []>} : vector<2x32xf32>, vector<32x128xf32>, vector<2x128xf32> -> vector<2x128xf32>
    %309 = vector.extract_strided_slice %307 {offsets = [0, 0], sizes = [2, 64], strides = [1, 1]} : vector<2x128xf32> to vector<2x64xf32>
    %310 = vector.extract_strided_slice %308 {offsets = [0, 0], sizes = [2, 64], strides = [1, 1]} : vector<2x128xf32> to vector<2x64xf32>
    %311 = arith.addf %309, %310 : vector<2x64xf32>
    %312 = arith.negf %311 : vector<2x64xf32>
    %313 = math.exp %312 : vector<2x64xf32>
    %cst_60 = arith.constant 1.000000e+00 : f32
    %314 = vector.broadcast %cst_60 : f32 to vector<2x64xf32>
    %315 = arith.addf %314, %313 : vector<2x64xf32>
    %316 = arith.divf %314, %315 : vector<2x64xf32>
    %317 = vector.extract_strided_slice %316 {offsets = [0, 0], sizes = [2, 32], strides = [1, 1]} : vector<2x64xf32> to vector<2x32xf32>
    %318 = vector.extract_strided_slice %316 {offsets = [0, 32], sizes = [2, 32], strides = [1, 1]} : vector<2x64xf32> to vector<2x32xf32>
    %319 = vector.extract_strided_slice %307 {offsets = [0, 64], sizes = [2, 32], strides = [1, 1]} : vector<2x128xf32> to vector<2x32xf32>
    %320 = vector.extract_strided_slice %308 {offsets = [0, 64], sizes = [2, 32], strides = [1, 1]} : vector<2x128xf32> to vector<2x32xf32>
    %321 = vector.broadcast %172 : vector<1x32xf32> to vector<2x32xf32>
    %322 = arith.addf %320, %321 : vector<2x32xf32>
    %323 = arith.mulf %317, %322 : vector<2x32xf32>
    %324 = arith.addf %319, %323 : vector<2x32xf32>
    %325 = math.tanh %324 : vector<2x32xf32>
    %326 = arith.subf %306, %325 : vector<2x32xf32>
    %327 = arith.mulf %318, %326 : vector<2x32xf32>
    %328 = arith.addf %325, %327 : vector<2x32xf32>
    %329 = vector.extract_strided_slice %168 {offsets = [14, 0], sizes = [2, 128], strides = [1, 1]} : vector<16x128xf32> to vector<2x128xf32>
    %cst_61 = arith.constant dense<0.000000e+00> : vector<2x128xf32>
    %330 = tpu.matmul %328, %170, %cst_61 {dimension_numbers = #tpu.dot_dimension_numbers<[1], [0], [0], [1], [0, 0, 1, 1], [], []>} : vector<2x32xf32>, vector<32x128xf32>, vector<2x128xf32> -> vector<2x128xf32>
    %331 = vector.extract_strided_slice %329 {offsets = [0, 0], sizes = [2, 64], strides = [1, 1]} : vector<2x128xf32> to vector<2x64xf32>
    %332 = vector.extract_strided_slice %330 {offsets = [0, 0], sizes = [2, 64], strides = [1, 1]} : vector<2x128xf32> to vector<2x64xf32>
    %333 = arith.addf %331, %332 : vector<2x64xf32>
    %334 = arith.negf %333 : vector<2x64xf32>
    %335 = math.exp %334 : vector<2x64xf32>
    %cst_62 = arith.constant 1.000000e+00 : f32
    %336 = vector.broadcast %cst_62 : f32 to vector<2x64xf32>
    %337 = arith.addf %336, %335 : vector<2x64xf32>
    %338 = arith.divf %336, %337 : vector<2x64xf32>
    %339 = vector.extract_strided_slice %338 {offsets = [0, 0], sizes = [2, 32], strides = [1, 1]} : vector<2x64xf32> to vector<2x32xf32>
    %340 = vector.extract_strided_slice %338 {offsets = [0, 32], sizes = [2, 32], strides = [1, 1]} : vector<2x64xf32> to vector<2x32xf32>
    %341 = vector.extract_strided_slice %329 {offsets = [0, 64], sizes = [2, 32], strides = [1, 1]} : vector<2x128xf32> to vector<2x32xf32>
    %342 = vector.extract_strided_slice %330 {offsets = [0, 64], sizes = [2, 32], strides = [1, 1]} : vector<2x128xf32> to vector<2x32xf32>
    %343 = vector.broadcast %172 : vector<1x32xf32> to vector<2x32xf32>
    %344 = arith.addf %342, %343 : vector<2x32xf32>
    %345 = arith.mulf %339, %344 : vector<2x32xf32>
    %346 = arith.addf %341, %345 : vector<2x32xf32>
    %347 = math.tanh %346 : vector<2x32xf32>
    %348 = arith.subf %328, %347 : vector<2x32xf32>
    %349 = arith.mulf %340, %348 : vector<2x32xf32>
    %350 = arith.addf %347, %349 : vector<2x32xf32>
    %351 = tpu.concatenate %196, %218, %240, %262, %284, %306, %328, %350 in 0 : vector<2x32xf32>, vector<2x32xf32>, vector<2x32xf32>, vector<2x32xf32>, vector<2x32xf32>, vector<2x32xf32>, vector<2x32xf32>, vector<2x32xf32> -> vector<16x32xf32>
    %c1_63 = arith.constant 1 : index
    %c0_64 = arith.constant 0 : index
    %c0_65 = arith.constant 0 : index
    %352 = vector.load %arg8[%c1_63, %c0_64, %c0_65] : memref<2x32x128xf32, #tpu.memory_space<vmem>>, vector<1x32x128xf32>
    %353 = vector.shape_cast %352 : vector<1x32x128xf32> to vector<32x128xf32>
    %cst_66 = arith.constant dense<0.000000e+00> : vector<16x128xf32>
    %354 = tpu.matmul %351, %353, %cst_66 {dimension_numbers = #tpu.dot_dimension_numbers<[1], [0], [0], [1], [0, 0, 1, 1], [], []>} : vector<16x32xf32>, vector<32x128xf32>, vector<16x128xf32> -> vector<16x128xf32>
    %c1_67 = arith.constant 1 : index
    %c0_68 = arith.constant 0 : index
    %c0_69 = arith.constant 0 : index
    %355 = vector.load %arg10[%c1_67, %c0_68, %c0_69] : memref<2x1x128xf32, #tpu.memory_space<vmem>>, vector<1x1x128xf32>
    %356 = vector.shape_cast %355 : vector<1x1x128xf32> to vector<1x128xf32>
    %357 = vector.broadcast %356 : vector<1x128xf32> to vector<16x128xf32>
    %358 = arith.addf %354, %357 : vector<16x128xf32>
    %c1_70 = arith.constant 1 : index
    %c0_71 = arith.constant 0 : index
    %c0_72 = arith.constant 0 : index
    %359 = vector.load %arg9[%c1_70, %c0_71, %c0_72] : memref<2x32x128xf32, #tpu.memory_space<vmem>>, vector<1x32x128xf32>
    %360 = vector.shape_cast %359 : vector<1x32x128xf32> to vector<32x128xf32>
    %c1_73 = arith.constant 1 : index
    %c0_74 = arith.constant 0 : index
    %c0_75 = arith.constant 0 : index
    %361 = vector.load %arg11[%c1_73, %c0_74, %c0_75] : memref<2x1x32xf32, #tpu.memory_space<vmem>>, vector<1x1x32xf32>
    %362 = vector.shape_cast %361 : vector<1x1x32xf32> to vector<1x32xf32>
    %c1_76 = arith.constant 1 : index
    %c0_77 = arith.constant 0 : index
    %c0_78 = arith.constant 0 : index
    %363 = vector.load %arg2[%c1_76, %c0_77, %c0_78] : memref<2x2x32xf32, #tpu.memory_space<vmem>>, vector<1x2x32xf32>
    %364 = vector.shape_cast %363 : vector<1x2x32xf32> to vector<2x32xf32>
    %365 = vector.extract_strided_slice %358 {offsets = [0, 0], sizes = [2, 128], strides = [1, 1]} : vector<16x128xf32> to vector<2x128xf32>
    %cst_79 = arith.constant dense<0.000000e+00> : vector<2x128xf32>
    %366 = tpu.matmul %364, %360, %cst_79 {dimension_numbers = #tpu.dot_dimension_numbers<[1], [0], [0], [1], [0, 0, 1, 1], [], []>} : vector<2x32xf32>, vector<32x128xf32>, vector<2x128xf32> -> vector<2x128xf32>
    %367 = vector.extract_strided_slice %365 {offsets = [0, 0], sizes = [2, 64], strides = [1, 1]} : vector<2x128xf32> to vector<2x64xf32>
    %368 = vector.extract_strided_slice %366 {offsets = [0, 0], sizes = [2, 64], strides = [1, 1]} : vector<2x128xf32> to vector<2x64xf32>
    %369 = arith.addf %367, %368 : vector<2x64xf32>
    %370 = arith.negf %369 : vector<2x64xf32>
    %371 = math.exp %370 : vector<2x64xf32>
    %cst_80 = arith.constant 1.000000e+00 : f32
    %372 = vector.broadcast %cst_80 : f32 to vector<2x64xf32>
    %373 = arith.addf %372, %371 : vector<2x64xf32>
    %374 = arith.divf %372, %373 : vector<2x64xf32>
    %375 = vector.extract_strided_slice %374 {offsets = [0, 0], sizes = [2, 32], strides = [1, 1]} : vector<2x64xf32> to vector<2x32xf32>
    %376 = vector.extract_strided_slice %374 {offsets = [0, 32], sizes = [2, 32], strides = [1, 1]} : vector<2x64xf32> to vector<2x32xf32>
    %377 = vector.extract_strided_slice %365 {offsets = [0, 64], sizes = [2, 32], strides = [1, 1]} : vector<2x128xf32> to vector<2x32xf32>
    %378 = vector.extract_strided_slice %366 {offsets = [0, 64], sizes = [2, 32], strides = [1, 1]} : vector<2x128xf32> to vector<2x32xf32>
    %379 = vector.broadcast %362 : vector<1x32xf32> to vector<2x32xf32>
    %380 = arith.addf %378, %379 : vector<2x32xf32>
    %381 = arith.mulf %375, %380 : vector<2x32xf32>
    %382 = arith.addf %377, %381 : vector<2x32xf32>
    %383 = math.tanh %382 : vector<2x32xf32>
    %384 = arith.subf %364, %383 : vector<2x32xf32>
    %385 = arith.mulf %376, %384 : vector<2x32xf32>
    %386 = arith.addf %383, %385 : vector<2x32xf32>
    %387 = vector.extract_strided_slice %358 {offsets = [2, 0], sizes = [2, 128], strides = [1, 1]} : vector<16x128xf32> to vector<2x128xf32>
    %cst_81 = arith.constant dense<0.000000e+00> : vector<2x128xf32>
    %388 = tpu.matmul %386, %360, %cst_81 {dimension_numbers = #tpu.dot_dimension_numbers<[1], [0], [0], [1], [0, 0, 1, 1], [], []>} : vector<2x32xf32>, vector<32x128xf32>, vector<2x128xf32> -> vector<2x128xf32>
    %389 = vector.extract_strided_slice %387 {offsets = [0, 0], sizes = [2, 64], strides = [1, 1]} : vector<2x128xf32> to vector<2x64xf32>
    %390 = vector.extract_strided_slice %388 {offsets = [0, 0], sizes = [2, 64], strides = [1, 1]} : vector<2x128xf32> to vector<2x64xf32>
    %391 = arith.addf %389, %390 : vector<2x64xf32>
    %392 = arith.negf %391 : vector<2x64xf32>
    %393 = math.exp %392 : vector<2x64xf32>
    %cst_82 = arith.constant 1.000000e+00 : f32
    %394 = vector.broadcast %cst_82 : f32 to vector<2x64xf32>
    %395 = arith.addf %394, %393 : vector<2x64xf32>
    %396 = arith.divf %394, %395 : vector<2x64xf32>
    %397 = vector.extract_strided_slice %396 {offsets = [0, 0], sizes = [2, 32], strides = [1, 1]} : vector<2x64xf32> to vector<2x32xf32>
    %398 = vector.extract_strided_slice %396 {offsets = [0, 32], sizes = [2, 32], strides = [1, 1]} : vector<2x64xf32> to vector<2x32xf32>
    %399 = vector.extract_strided_slice %387 {offsets = [0, 64], sizes = [2, 32], strides = [1, 1]} : vector<2x128xf32> to vector<2x32xf32>
    %400 = vector.extract_strided_slice %388 {offsets = [0, 64], sizes = [2, 32], strides = [1, 1]} : vector<2x128xf32> to vector<2x32xf32>
    %401 = vector.broadcast %362 : vector<1x32xf32> to vector<2x32xf32>
    %402 = arith.addf %400, %401 : vector<2x32xf32>
    %403 = arith.mulf %397, %402 : vector<2x32xf32>
    %404 = arith.addf %399, %403 : vector<2x32xf32>
    %405 = math.tanh %404 : vector<2x32xf32>
    %406 = arith.subf %386, %405 : vector<2x32xf32>
    %407 = arith.mulf %398, %406 : vector<2x32xf32>
    %408 = arith.addf %405, %407 : vector<2x32xf32>
    %409 = vector.extract_strided_slice %358 {offsets = [4, 0], sizes = [2, 128], strides = [1, 1]} : vector<16x128xf32> to vector<2x128xf32>
    %cst_83 = arith.constant dense<0.000000e+00> : vector<2x128xf32>
    %410 = tpu.matmul %408, %360, %cst_83 {dimension_numbers = #tpu.dot_dimension_numbers<[1], [0], [0], [1], [0, 0, 1, 1], [], []>} : vector<2x32xf32>, vector<32x128xf32>, vector<2x128xf32> -> vector<2x128xf32>
    %411 = vector.extract_strided_slice %409 {offsets = [0, 0], sizes = [2, 64], strides = [1, 1]} : vector<2x128xf32> to vector<2x64xf32>
    %412 = vector.extract_strided_slice %410 {offsets = [0, 0], sizes = [2, 64], strides = [1, 1]} : vector<2x128xf32> to vector<2x64xf32>
    %413 = arith.addf %411, %412 : vector<2x64xf32>
    %414 = arith.negf %413 : vector<2x64xf32>
    %415 = math.exp %414 : vector<2x64xf32>
    %cst_84 = arith.constant 1.000000e+00 : f32
    %416 = vector.broadcast %cst_84 : f32 to vector<2x64xf32>
    %417 = arith.addf %416, %415 : vector<2x64xf32>
    %418 = arith.divf %416, %417 : vector<2x64xf32>
    %419 = vector.extract_strided_slice %418 {offsets = [0, 0], sizes = [2, 32], strides = [1, 1]} : vector<2x64xf32> to vector<2x32xf32>
    %420 = vector.extract_strided_slice %418 {offsets = [0, 32], sizes = [2, 32], strides = [1, 1]} : vector<2x64xf32> to vector<2x32xf32>
    %421 = vector.extract_strided_slice %409 {offsets = [0, 64], sizes = [2, 32], strides = [1, 1]} : vector<2x128xf32> to vector<2x32xf32>
    %422 = vector.extract_strided_slice %410 {offsets = [0, 64], sizes = [2, 32], strides = [1, 1]} : vector<2x128xf32> to vector<2x32xf32>
    %423 = vector.broadcast %362 : vector<1x32xf32> to vector<2x32xf32>
    %424 = arith.addf %422, %423 : vector<2x32xf32>
    %425 = arith.mulf %419, %424 : vector<2x32xf32>
    %426 = arith.addf %421, %425 : vector<2x32xf32>
    %427 = math.tanh %426 : vector<2x32xf32>
    %428 = arith.subf %408, %427 : vector<2x32xf32>
    %429 = arith.mulf %420, %428 : vector<2x32xf32>
    %430 = arith.addf %427, %429 : vector<2x32xf32>
    %431 = vector.extract_strided_slice %358 {offsets = [6, 0], sizes = [2, 128], strides = [1, 1]} : vector<16x128xf32> to vector<2x128xf32>
    %cst_85 = arith.constant dense<0.000000e+00> : vector<2x128xf32>
    %432 = tpu.matmul %430, %360, %cst_85 {dimension_numbers = #tpu.dot_dimension_numbers<[1], [0], [0], [1], [0, 0, 1, 1], [], []>} : vector<2x32xf32>, vector<32x128xf32>, vector<2x128xf32> -> vector<2x128xf32>
    %433 = vector.extract_strided_slice %431 {offsets = [0, 0], sizes = [2, 64], strides = [1, 1]} : vector<2x128xf32> to vector<2x64xf32>
    %434 = vector.extract_strided_slice %432 {offsets = [0, 0], sizes = [2, 64], strides = [1, 1]} : vector<2x128xf32> to vector<2x64xf32>
    %435 = arith.addf %433, %434 : vector<2x64xf32>
    %436 = arith.negf %435 : vector<2x64xf32>
    %437 = math.exp %436 : vector<2x64xf32>
    %cst_86 = arith.constant 1.000000e+00 : f32
    %438 = vector.broadcast %cst_86 : f32 to vector<2x64xf32>
    %439 = arith.addf %438, %437 : vector<2x64xf32>
    %440 = arith.divf %438, %439 : vector<2x64xf32>
    %441 = vector.extract_strided_slice %440 {offsets = [0, 0], sizes = [2, 32], strides = [1, 1]} : vector<2x64xf32> to vector<2x32xf32>
    %442 = vector.extract_strided_slice %440 {offsets = [0, 32], sizes = [2, 32], strides = [1, 1]} : vector<2x64xf32> to vector<2x32xf32>
    %443 = vector.extract_strided_slice %431 {offsets = [0, 64], sizes = [2, 32], strides = [1, 1]} : vector<2x128xf32> to vector<2x32xf32>
    %444 = vector.extract_strided_slice %432 {offsets = [0, 64], sizes = [2, 32], strides = [1, 1]} : vector<2x128xf32> to vector<2x32xf32>
    %445 = vector.broadcast %362 : vector<1x32xf32> to vector<2x32xf32>
    %446 = arith.addf %444, %445 : vector<2x32xf32>
    %447 = arith.mulf %441, %446 : vector<2x32xf32>
    %448 = arith.addf %443, %447 : vector<2x32xf32>
    %449 = math.tanh %448 : vector<2x32xf32>
    %450 = arith.subf %430, %449 : vector<2x32xf32>
    %451 = arith.mulf %442, %450 : vector<2x32xf32>
    %452 = arith.addf %449, %451 : vector<2x32xf32>
    %453 = vector.extract_strided_slice %358 {offsets = [8, 0], sizes = [2, 128], strides = [1, 1]} : vector<16x128xf32> to vector<2x128xf32>
    %cst_87 = arith.constant dense<0.000000e+00> : vector<2x128xf32>
    %454 = tpu.matmul %452, %360, %cst_87 {dimension_numbers = #tpu.dot_dimension_numbers<[1], [0], [0], [1], [0, 0, 1, 1], [], []>} : vector<2x32xf32>, vector<32x128xf32>, vector<2x128xf32> -> vector<2x128xf32>
    %455 = vector.extract_strided_slice %453 {offsets = [0, 0], sizes = [2, 64], strides = [1, 1]} : vector<2x128xf32> to vector<2x64xf32>
    %456 = vector.extract_strided_slice %454 {offsets = [0, 0], sizes = [2, 64], strides = [1, 1]} : vector<2x128xf32> to vector<2x64xf32>
    %457 = arith.addf %455, %456 : vector<2x64xf32>
    %458 = arith.negf %457 : vector<2x64xf32>
    %459 = math.exp %458 : vector<2x64xf32>
    %cst_88 = arith.constant 1.000000e+00 : f32
    %460 = vector.broadcast %cst_88 : f32 to vector<2x64xf32>
    %461 = arith.addf %460, %459 : vector<2x64xf32>
    %462 = arith.divf %460, %461 : vector<2x64xf32>
    %463 = vector.extract_strided_slice %462 {offsets = [0, 0], sizes = [2, 32], strides = [1, 1]} : vector<2x64xf32> to vector<2x32xf32>
    %464 = vector.extract_strided_slice %462 {offsets = [0, 32], sizes = [2, 32], strides = [1, 1]} : vector<2x64xf32> to vector<2x32xf32>
    %465 = vector.extract_strided_slice %453 {offsets = [0, 64], sizes = [2, 32], strides = [1, 1]} : vector<2x128xf32> to vector<2x32xf32>
    %466 = vector.extract_strided_slice %454 {offsets = [0, 64], sizes = [2, 32], strides = [1, 1]} : vector<2x128xf32> to vector<2x32xf32>
    %467 = vector.broadcast %362 : vector<1x32xf32> to vector<2x32xf32>
    %468 = arith.addf %466, %467 : vector<2x32xf32>
    %469 = arith.mulf %463, %468 : vector<2x32xf32>
    %470 = arith.addf %465, %469 : vector<2x32xf32>
    %471 = math.tanh %470 : vector<2x32xf32>
    %472 = arith.subf %452, %471 : vector<2x32xf32>
    %473 = arith.mulf %464, %472 : vector<2x32xf32>
    %474 = arith.addf %471, %473 : vector<2x32xf32>
    %475 = vector.extract_strided_slice %358 {offsets = [10, 0], sizes = [2, 128], strides = [1, 1]} : vector<16x128xf32> to vector<2x128xf32>
    %cst_89 = arith.constant dense<0.000000e+00> : vector<2x128xf32>
    %476 = tpu.matmul %474, %360, %cst_89 {dimension_numbers = #tpu.dot_dimension_numbers<[1], [0], [0], [1], [0, 0, 1, 1], [], []>} : vector<2x32xf32>, vector<32x128xf32>, vector<2x128xf32> -> vector<2x128xf32>
    %477 = vector.extract_strided_slice %475 {offsets = [0, 0], sizes = [2, 64], strides = [1, 1]} : vector<2x128xf32> to vector<2x64xf32>
    %478 = vector.extract_strided_slice %476 {offsets = [0, 0], sizes = [2, 64], strides = [1, 1]} : vector<2x128xf32> to vector<2x64xf32>
    %479 = arith.addf %477, %478 : vector<2x64xf32>
    %480 = arith.negf %479 : vector<2x64xf32>
    %481 = math.exp %480 : vector<2x64xf32>
    %cst_90 = arith.constant 1.000000e+00 : f32
    %482 = vector.broadcast %cst_90 : f32 to vector<2x64xf32>
    %483 = arith.addf %482, %481 : vector<2x64xf32>
    %484 = arith.divf %482, %483 : vector<2x64xf32>
    %485 = vector.extract_strided_slice %484 {offsets = [0, 0], sizes = [2, 32], strides = [1, 1]} : vector<2x64xf32> to vector<2x32xf32>
    %486 = vector.extract_strided_slice %484 {offsets = [0, 32], sizes = [2, 32], strides = [1, 1]} : vector<2x64xf32> to vector<2x32xf32>
    %487 = vector.extract_strided_slice %475 {offsets = [0, 64], sizes = [2, 32], strides = [1, 1]} : vector<2x128xf32> to vector<2x32xf32>
    %488 = vector.extract_strided_slice %476 {offsets = [0, 64], sizes = [2, 32], strides = [1, 1]} : vector<2x128xf32> to vector<2x32xf32>
    %489 = vector.broadcast %362 : vector<1x32xf32> to vector<2x32xf32>
    %490 = arith.addf %488, %489 : vector<2x32xf32>
    %491 = arith.mulf %485, %490 : vector<2x32xf32>
    %492 = arith.addf %487, %491 : vector<2x32xf32>
    %493 = math.tanh %492 : vector<2x32xf32>
    %494 = arith.subf %474, %493 : vector<2x32xf32>
    %495 = arith.mulf %486, %494 : vector<2x32xf32>
    %496 = arith.addf %493, %495 : vector<2x32xf32>
    %497 = vector.extract_strided_slice %358 {offsets = [12, 0], sizes = [2, 128], strides = [1, 1]} : vector<16x128xf32> to vector<2x128xf32>
    %cst_91 = arith.constant dense<0.000000e+00> : vector<2x128xf32>
    %498 = tpu.matmul %496, %360, %cst_91 {dimension_numbers = #tpu.dot_dimension_numbers<[1], [0], [0], [1], [0, 0, 1, 1], [], []>} : vector<2x32xf32>, vector<32x128xf32>, vector<2x128xf32> -> vector<2x128xf32>
    %499 = vector.extract_strided_slice %497 {offsets = [0, 0], sizes = [2, 64], strides = [1, 1]} : vector<2x128xf32> to vector<2x64xf32>
    %500 = vector.extract_strided_slice %498 {offsets = [0, 0], sizes = [2, 64], strides = [1, 1]} : vector<2x128xf32> to vector<2x64xf32>
    %501 = arith.addf %499, %500 : vector<2x64xf32>
    %502 = arith.negf %501 : vector<2x64xf32>
    %503 = math.exp %502 : vector<2x64xf32>
    %cst_92 = arith.constant 1.000000e+00 : f32
    %504 = vector.broadcast %cst_92 : f32 to vector<2x64xf32>
    %505 = arith.addf %504, %503 : vector<2x64xf32>
    %506 = arith.divf %504, %505 : vector<2x64xf32>
    %507 = vector.extract_strided_slice %506 {offsets = [0, 0], sizes = [2, 32], strides = [1, 1]} : vector<2x64xf32> to vector<2x32xf32>
    %508 = vector.extract_strided_slice %506 {offsets = [0, 32], sizes = [2, 32], strides = [1, 1]} : vector<2x64xf32> to vector<2x32xf32>
    %509 = vector.extract_strided_slice %497 {offsets = [0, 64], sizes = [2, 32], strides = [1, 1]} : vector<2x128xf32> to vector<2x32xf32>
    %510 = vector.extract_strided_slice %498 {offsets = [0, 64], sizes = [2, 32], strides = [1, 1]} : vector<2x128xf32> to vector<2x32xf32>
    %511 = vector.broadcast %362 : vector<1x32xf32> to vector<2x32xf32>
    %512 = arith.addf %510, %511 : vector<2x32xf32>
    %513 = arith.mulf %507, %512 : vector<2x32xf32>
    %514 = arith.addf %509, %513 : vector<2x32xf32>
    %515 = math.tanh %514 : vector<2x32xf32>
    %516 = arith.subf %496, %515 : vector<2x32xf32>
    %517 = arith.mulf %508, %516 : vector<2x32xf32>
    %518 = arith.addf %515, %517 : vector<2x32xf32>
    %519 = vector.extract_strided_slice %358 {offsets = [14, 0], sizes = [2, 128], strides = [1, 1]} : vector<16x128xf32> to vector<2x128xf32>
    %cst_93 = arith.constant dense<0.000000e+00> : vector<2x128xf32>
    %520 = tpu.matmul %518, %360, %cst_93 {dimension_numbers = #tpu.dot_dimension_numbers<[1], [0], [0], [1], [0, 0, 1, 1], [], []>} : vector<2x32xf32>, vector<32x128xf32>, vector<2x128xf32> -> vector<2x128xf32>
    %521 = vector.extract_strided_slice %519 {offsets = [0, 0], sizes = [2, 64], strides = [1, 1]} : vector<2x128xf32> to vector<2x64xf32>
    %522 = vector.extract_strided_slice %520 {offsets = [0, 0], sizes = [2, 64], strides = [1, 1]} : vector<2x128xf32> to vector<2x64xf32>
    %523 = arith.addf %521, %522 : vector<2x64xf32>
    %524 = arith.negf %523 : vector<2x64xf32>
    %525 = math.exp %524 : vector<2x64xf32>
    %cst_94 = arith.constant 1.000000e+00 : f32
    %526 = vector.broadcast %cst_94 : f32 to vector<2x64xf32>
    %527 = arith.addf %526, %525 : vector<2x64xf32>
    %528 = arith.divf %526, %527 : vector<2x64xf32>
    %529 = vector.extract_strided_slice %528 {offsets = [0, 0], sizes = [2, 32], strides = [1, 1]} : vector<2x64xf32> to vector<2x32xf32>
    %530 = vector.extract_strided_slice %528 {offsets = [0, 32], sizes = [2, 32], strides = [1, 1]} : vector<2x64xf32> to vector<2x32xf32>
    %531 = vector.extract_strided_slice %519 {offsets = [0, 64], sizes = [2, 32], strides = [1, 1]} : vector<2x128xf32> to vector<2x32xf32>
    %532 = vector.extract_strided_slice %520 {offsets = [0, 64], sizes = [2, 32], strides = [1, 1]} : vector<2x128xf32> to vector<2x32xf32>
    %533 = vector.broadcast %362 : vector<1x32xf32> to vector<2x32xf32>
    %534 = arith.addf %532, %533 : vector<2x32xf32>
    %535 = arith.mulf %529, %534 : vector<2x32xf32>
    %536 = arith.addf %531, %535 : vector<2x32xf32>
    %537 = math.tanh %536 : vector<2x32xf32>
    %538 = arith.subf %518, %537 : vector<2x32xf32>
    %539 = arith.mulf %530, %538 : vector<2x32xf32>
    %540 = arith.addf %537, %539 : vector<2x32xf32>
    %541 = tpu.concatenate %386, %408, %430, %452, %474, %496, %518, %540 in 0 : vector<2x32xf32>, vector<2x32xf32>, vector<2x32xf32>, vector<2x32xf32>, vector<2x32xf32>, vector<2x32xf32>, vector<2x32xf32>, vector<2x32xf32> -> vector<16x32xf32>
    %cst_95 = arith.constant 0.000000e+00 : f32
    %542 = vector.broadcast %cst_95 : f32 to vector<16x32xf32>
    %543 = arith.maximumf %541, %542 : vector<16x32xf32>
    %c0_96 = arith.constant 0 : index
    %c0_97 = arith.constant 0 : index
    %544 = vector.load %arg12[%c0_96, %c0_97] : memref<1x32xf32, #tpu.memory_space<vmem>>, vector<1x32xf32>
    %c0_98 = arith.constant 0 : index
    %c0_99 = arith.constant 0 : index
    %545 = vector.load %arg13[%c0_98, %c0_99] : memref<1x32xf32, #tpu.memory_space<vmem>>, vector<1x32xf32>
    %cst_100 = arith.constant dense<0.000000e+00> : vector<16xf32>
    %546 = vector.multi_reduction <add>, %543, %cst_100 [1] : vector<16x32xf32> to vector<16xf32>
    %547 = vector.shape_cast %546 : vector<16xf32> to vector<16x1xf32>
    %cst_101 = arith.constant 3.200000e+01 : f32
    %548 = vector.broadcast %cst_101 : f32 to vector<16x1xf32>
    %549 = arith.divf %547, %548 : vector<16x1xf32>
    %550 = vector.broadcast %549 : vector<16x1xf32> to vector<16x32xf32>
    %551 = arith.subf %543, %550 : vector<16x32xf32>
    %552 = arith.mulf %551, %551 : vector<16x32xf32>
    %cst_102 = arith.constant dense<0.000000e+00> : vector<16xf32>
    %553 = vector.multi_reduction <add>, %552, %cst_102 [1] : vector<16x32xf32> to vector<16xf32>
    %554 = vector.shape_cast %553 : vector<16xf32> to vector<16x1xf32>
    %cst_103 = arith.constant 3.200000e+01 : f32
    %555 = vector.broadcast %cst_103 : f32 to vector<16x1xf32>
    %556 = arith.divf %554, %555 : vector<16x1xf32>
    %557 = vector.broadcast %549 : vector<16x1xf32> to vector<16x32xf32>
    %558 = arith.subf %543, %557 : vector<16x32xf32>
    %cst_104 = arith.constant 9.99999974E-6 : f32
    %559 = vector.broadcast %cst_104 : f32 to vector<16x1xf32>
    %560 = arith.addf %556, %559 : vector<16x1xf32>
    %561 = math.rsqrt %560 : vector<16x1xf32>
    %562 = vector.broadcast %561 : vector<16x1xf32> to vector<16x32xf32>
    %563 = arith.mulf %558, %562 : vector<16x32xf32>
    %564 = vector.broadcast %544 : vector<1x32xf32> to vector<16x32xf32>
    %565 = arith.mulf %563, %564 : vector<16x32xf32>
    %566 = vector.broadcast %545 : vector<1x32xf32> to vector<16x32xf32>
    %567 = arith.addf %565, %566 : vector<16x32xf32>
    %c0_105 = arith.constant 0 : index
    %c0_106 = arith.constant 0 : index
    %568 = vector.load %arg14[%c0_105, %c0_106] : memref<32x128xf32, #tpu.memory_space<vmem>>, vector<32x128xf32>
    %cst_107 = arith.constant dense<0.000000e+00> : vector<16x128xf32>
    %569 = tpu.matmul %567, %568, %cst_107 {dimension_numbers = #tpu.dot_dimension_numbers<[1], [0], [0], [1], [0, 0, 1, 1], [], []>} : vector<16x32xf32>, vector<32x128xf32>, vector<16x128xf32> -> vector<16x128xf32>
    %c0_108 = arith.constant 0 : index
    %c0_109 = arith.constant 0 : index
    %570 = vector.load %arg15[%c0_108, %c0_109] : memref<16x128xf32, #tpu.memory_space<vmem>>, vector<16x128xf32>
    tpu.vector_store %arg15[%c0_108, %c0_109], %569 {strides = array<i32>} : memref<16x128xf32, #tpu.memory_space<vmem>>, vector<16x128xf32>,
    %c0_110 = arith.constant 0 : index
    %c0_111 = arith.constant 0 : index
    %c0_112 = arith.constant 0 : index
    %571 = vector.load %arg16[%c0_110, %c0_111, %c0_112] : memref<2x2x32xf32, #tpu.memory_space<vmem>>, vector<1x2x32xf32>
    %572 = vector.shape_cast %571 : vector<1x2x32xf32> to vector<2x32xf32>
    %573 = vector.shape_cast %350 : vector<2x32xf32> to vector<1x2x32xf32>
    tpu.vector_store %arg16[%c0_110, %c0_111, %c0_112], %573 {strides = array<i32>} : memref<2x2x32xf32, #tpu.memory_space<vmem>>, vector<1x2x32xf32>,
    %c1_113 = arith.constant 1 : index
    %c0_114 = arith.constant 0 : index
    %c0_115 = arith.constant 0 : index
    %574 = vector.load %arg16[%c1_113, %c0_114, %c0_115] : memref<2x2x32xf32, #tpu.memory_space<vmem>>, vector<1x2x32xf32>
    %575 = vector.shape_cast %574 : vector<1x2x32xf32> to vector<2x32xf32>
    %576 = vector.shape_cast %540 : vector<2x32xf32> to vector<1x2x32xf32>
    tpu.vector_store %arg16[%c1_113, %c0_114, %c0_115], %576 {strides = array<i32>} : memref<2x2x32xf32, #tpu.memory_space<vmem>>, vector<1x2x32xf32>,
    return
  }
}

</mosaic_0001>

<bundles_post_ra>
// kernel: grunet_forward.1
= control target key start
LH: loop header
LB: loop body
LE: loop exit
PB: predicated region body
PF: predicated region fallthrough
CT: control target
= control target key end

     0   :  { %s3147_s0 = inlined_call_operand.vmem [shape: s32[16], index: 0, kind: input, shape index: {}]   ;;  %s3148_s1 = inlined_call_operand.vmem [shape: f32[16], index: 1, kind: input, shape index: {}]   ;;  %s3149_s2 = inlined_call_operand.vmem [shape: f32[2,2,32], index: 2, kind: input, shape index: {}]   ;;  %s3150_s3 = inlined_call_operand.hbm [shape: f32[16,32], index: 3, kind: input, shape index: {}]   ;;  %s3151_s4 = inlined_call_operand.hbm [shape: f32[1,32], index: 4, kind: input, shape index: {}]   ;;  %s3152_s5 = inlined_call_operand.vmem [shape: f32[1,32], index: 5, kind: input, shape index: {}]   ;;  %s3153_s6 = inlined_call_operand.hbm [shape: f32[1,32], index: 6, kind: input, shape index: {}]   ;;  %s3154_s7 = inlined_call_operand.hbm [shape: f32[1,32], index: 7, kind: input, shape index: {}]   ;;  %s3155_s8 = inlined_call_operand.hbm [shape: f32[2,32,128], index: 8, kind: input, shape index: {}]   ;;  %s3156_s9 = inlined_call_operand.hbm [shape: f32[2,32,128], index: 9, kind: input, shape index: {}]   ;;  %s3157_s10 = inlined_call_operand.vmem [shape: f32[2,1,128], index: 10, kind: input, shape index: {}]   ;;  %s3158_s11 = inlined_call_operand.vmem [shape: f32[2,1,32], index: 11, kind: input, shape index: {}]   ;;  %s3159_s12 = inlined_call_operand.hbm [shape: f32[1,32], index: 12, kind: input, shape index: {}]   ;;  %s3160_s13 = inlined_call_operand.hbm [shape: f32[1,32], index: 13, kind: input, shape index: {}]   ;;  %s3161_s14 = inlined_call_operand.hbm [shape: f32[32,128], index: 14, kind: input, shape index: {}]   ;;  %s3162_s15 = inlined_call_operand.vmem [shape: f32[16,128], index: 15, kind: output, shape index: {0}]   ;;  %s3163_s16 = inlined_call_operand.hbm [shape: f32[2,2,32], index: 16, kind: output, shape index: {1}]  }
   0x1   :  { %3164 = sst [smem:[#allocation30_spill]] %s3147_s0 }
   0x2   :  { %22 = vsyncpa [#allocation5], 0 }
   0x3   :  { %23 = vsyncpa [#allocation7], 0 }
   0x4   :  { %24 = vsyncpa [#allocation3], 0 }
   0x5   :  { %25 = vsyncpa [#allocation10], 0 }
   0x6   :  { %26 = vsyncpa [#allocation13], 0 }
   0x7   :  { %27 = vsyncpa [#allocation16], 0 }
   0x8   :  { %28 = vsyncpa [#allocation19], 0  ;;  %s68_s23 = sshll.u32 %s3151_s4, 4  ;;  %s69_s23 = int_to_ptr.hbm [resolvable:$true] %s68_s23 }
   0x9   :  { %29 = vsyncpa [#allocation4], 0  ;;  %s2503_s24 = smov [#allocation9]   ;;  %s92_s28 = sshll.u32 %s3154_s7, 4  ;;  %s93_s28 = int_to_ptr.hbm [resolvable:$true] %s92_s28 }
   0xa   :  { %s70_s25 = sshll.u32 %s2503_s24, 4  ;;  %s2504_s29 = smov [#allocation12]   ;;  %s71_s25 = int_to_ptr.vmem [resolvable:$true] %s70_s25 }
   0xb   :  { %73 = dma.hbm_to_vmem [thread:$0]  %s69_s23, 16, %s71_s25, [#allocation10]  }
   0xc   :  { %s94_s30 = sshll.u32 %s2504_s29, 4  ;;  %s115_s18 = sshll.u32 %s3156_s9, 4  ;;  %s95_s30 = int_to_ptr.vmem [resolvable:$true] %s94_s30  ;;  %s116_s18 = int_to_ptr.hbm [resolvable:$true] %s115_s18 }
   0xd   :  { %97 = dma.hbm_to_vmem [thread:$0]  %s93_s28, 16, %s95_s30, [#allocation13]  }
   0xe   :  { %s2505_s4 = smov [#allocation15]   ;;  %s144_s22 = sshll.u32 %s3160_s13, 4  ;;  %s145_s22 = int_to_ptr.hbm [resolvable:$true] %s144_s22 }
   0xf   :  { %s117_s19 = sshll.u32 %s2505_s4, 4  ;;  %s2506_s24 = smov 128   ;;  %s118_s19 = int_to_ptr.vmem [resolvable:$true] %s117_s19 }
  0x10   :  { %s2507_s7 = smov 8   ;;  %s2508_s23 = smov [#allocation18]  }
  0x11   :  { %123 = dma.hbm_to_vmem [thread:$0]  %s116_s18, 1024, %s118_s19, [#allocation16], %s2506_s24, %s2506_s24, %s2507_s7  }
  0x12   :  { %s146_s25 = sshll.u32 %s2508_s23, 4  ;;  %s3165_s9 = sld [smem:[#allocation30_spill]]  ;;  %s147_s25 = int_to_ptr.vmem [resolvable:$true] %s146_s25 }
  0x13   :  { %149 = dma.hbm_to_vmem [thread:$0]  %s145_s22, 16, %s147_s25, [#allocation19]  }
  0x14   :  { %s44_s13 = sshll.u32 %s3148_s1, 4  ;;  %s2509_s0 = smov [#allocation2]   ;;  %s45_s13 = int_to_ptr.vmem [resolvable:$true] %s44_s13 }
  0x15   :  { %s2510_s17 = smov [#allocation6]   ;;  %s54_s19 = sshll.u32 %s3150_s3, 4  ;;  %s55_s19 = int_to_ptr.hbm [resolvable:$true] %s54_s19 }
  0x16   :  { %47 = dma.vmem_to_smem %s45_s13, 16, %s2510_s17, [#allocation7]  }
  0x17   :  { %s2511_s20 = smov [#allocation8]   ;;  %s81_s22 = sshll.u32 %s3153_s6, 4  ;;  %s82_s22 = int_to_ptr.hbm [resolvable:$true] %s81_s22 }
  0x18   :  { %s35_s28 = sshll.u32 %s3165_s9, 4  ;;  %s56_s21 = sshll.u32 %s2511_s20, 4  ;;  %s36_s28 = int_to_ptr.vmem [resolvable:$true] %s35_s28  ;;  %s57_s21 = int_to_ptr.vmem [resolvable:$true] %s56_s21 }
  0x19   :  { %38 = dma.vmem_to_smem %s36_s28, 16, %s2509_s0, [#allocation5]  }
  0x1a   :  { %62 = dma.hbm_to_vmem [thread:$0]  %s55_s19, 256, %s57_s21, [#allocation3], %s2506_s24, %s2506_s24, %s2507_s7  }
  0x1b   :  { %s2512_s1 = smov [#allocation11]   ;;  %s102_s28 = sshll.u32 %s3155_s8, 4  ;;  %s103_s28 = int_to_ptr.hbm [resolvable:$true] %s102_s28 }
  0x1c   :  { %s83_s25 = sshll.u32 %s2512_s1, 4  ;;  %s133_s30 = sshll.u32 %s3159_s12, 4  ;;  %s84_s25 = int_to_ptr.vmem [resolvable:$true] %s83_s25  ;;  %s134_s30 = int_to_ptr.hbm [resolvable:$true] %s133_s30 }
  0x1d   :  { %86 = dma.hbm_to_vmem [thread:$0]  %s82_s22, 16, %s84_s25, [#allocation10]  }
  0x1e   :  { %s2513_s13 = smov [#allocation14]   ;;  %s2514_s0 = smov [#allocation17]  }
  0x1f   :  { %s104_s6 = sshll.u32 %s2513_s13, 4  ;;  %s135_s17 = sshll.u32 %s2514_s0, 4  ;;  %s105_s6 = int_to_ptr.vmem [resolvable:$true] %s104_s6  ;;  %s136_s17 = int_to_ptr.vmem [resolvable:$true] %s135_s17 }
  0x20   :  { %110 = dma.hbm_to_vmem [thread:$0]  %s103_s28, 1024, %s105_s6, [#allocation13], %s2506_s24, %s2506_s24, %s2507_s7  }
  0x21   :  { %s154_s8 = sshll.u32 %s3161_s14, 4  ;;  %s2515_s19 = smov [#allocation20]   ;;  %s155_s8 = int_to_ptr.hbm [resolvable:$true] %s154_s8 }
  0x22   :  { %138 = dma.hbm_to_vmem [thread:$0]  %s134_s30, 16, %s136_s17, [#allocation16]  }
  0x23   :  { %s156_s20 = sshll.u32 %s2515_s19, 4  ;;  %s157_s20 = int_to_ptr.vmem [resolvable:$true] %s156_s20 }
  0x24   :  { %162 = dma.hbm_to_vmem [thread:$0]  %s155_s8, 512, %s157_s20, [#allocation19], %s2506_s24, %s2506_s24, %s2507_s7  }
  0x25   :  { %2487 = dma.done.wait [#allocation5], 16  }
  0x26   :  { %2488 = vsyncadd [#allocation5], 4294967280 }
  0x27   :  { %2489 = dma.done.wait [#allocation7], 16  }
  0x28   :  { %2490 = vsyncadd [#allocation7], 4294967280 }
  0x29   :  { %2491 = dma.done.wait [#allocation3], 256  }
  0x2a   :  { %2492 = vsyncadd [#allocation3], 4294967040 }
  0x2b   :  { %2493 = dma.done.wait [#allocation10], 32  }
  0x2c   :  { %2494 = vsyncadd [#allocation10], 4294967264 }
  0x2d   :  { %2495 = dma.done.wait [#allocation13], 1040  }
  0x2e   :  { %2496 = vsyncadd [#allocation13], 4294966256 }
  0x2f   :  { %2497 = dma.done.wait [#allocation16], 1040  }
  0x30   :  { %2498 = vsyncadd [#allocation16], 4294966256 }
  0x31   :  { %2499 = dma.done.wait [#allocation19], 528  }
  0x32   :  { %2500 = vsyncadd [#allocation19], 4294966768 }
  0x33   :  { %207 = sfence }
  0x34   :  { %v312_v0 = vld [vmem:[#allocation8 + $0x8] sm:$0xff]  ;;  %v311_v1 = vld [vmem:[#allocation8] sm:$0xff]  ;;  %v208_v2 = vlaneseq  ;;  %s210_s12 = sld [smem:[#allocation2]]  ;;  %vm290_vm0 = vcmask 1040384   ;;  %vm292_vm1 = vcmask 1041408   ;;  %vm294_vm2 = vcmask 1042432  }
  0x35   :  { %445 = vmatpush.msra.mxu0 %v312_v0  ;;  %s2000_s14 = sld [smem:[#allocation2 + $0x8]]  ;;  %vm296_vm3 = vcmask 1043456   ;;  %vm298_vm4 = vcmask 1044480   ;;  %v2516_v6 = vmov 0.0   ;;  %vm300_vm7 = vcmask 1045504   ;;  %s2518_s17 = smov 64  }
  0x36   :  { %s2002_s24 = sld [smem:[#allocation2 + $0x1]]  ;;  %v2653_v3 = vand.u32 127, %v208_v2  ;;  %vm302_vm9 = vcmask 1046528   ;;  %vm424_vm15 = vcmask 130048   ;;  %v2679_v28 = vld [vmem:[#allocation9] sm:$0x1] }
  0x37   :  { %446 = vmatpush.msra.mxu0 %v311_v1  ;;  %s2004_s7 = sld [smem:[#allocation2 + $0x9]]  ;;  %v2698_v58 = vld [vmem:[%s3152_s5] ss:$0 sm:$0xff]  ;;  %v2517_v0 = vmov 32.0   ;;  %v2703_v1 = vld [vmem:[#allocation15 + $0x18] sm:$0xff]  ;;  %v2705_v2 = vld [vmem:[#allocation15 + $0x10] sm:$0xff] }
  0x38   :  { %s2006_s21 = sld [smem:[#allocation2 + $0x2]]  ;;  %2117 = vrcp.f32 %v2517_v0  ;;  %576 = vmatpush.msra.mxu3 %v2703_v1  ;;  %730 = vmatpush.msra.mxu2 %v2703_v1  ;;  %s2519_s20 = smov 32  }
  0x39   :  { %s2008_s23 = sld [smem:[#allocation2 + $0xa]]  ;;  %884 = vmatpush.msrb.mxu0 %v2703_v1 }
  0x3a   :  { %v211_v4 = vstv %s210_s12  ;;  %s2010_s26 = sld [smem:[#allocation2 + $0x3]]  ;;  %577 = vmatpush.msra.mxu3 %v2705_v2  ;;  %731 = vmatpush.msra.mxu2 %v2705_v2  ;;  %s2520_s12 = smov 96  }
  0x3b   :  { %vm212_vm5 = vcmp.eq.s32.totalorder %v2653_v3, %v211_v4  ;;  %v216_v5 = vstv %s2000_s14  ;;  %s2012_s22 = sld [smem:[#allocation2 + $0xb]]  ;;  %v2109_v4 = vld [vmem:[%s3158_s11] ss:$0 sm:$0xff]  ;;  %885 = vmatpush.msrb.mxu0 %v2705_v2 }
  0x3c   :  { %v1999_v7 = vsel %vm212_vm5, 1.0, %v2516_v6  ;;  %vm217_vm6 = vcmp.eq.s32.totalorder %v2653_v3, %v216_v5  ;;  %v221_v8 = vstv %s2002_s24  ;;  %s2030_s1 = sld [smem:[#allocation6 + $0x8]]  ;;  %vm456_vm5 = vcmask 261120   ;;  %v2712_v5 = vld [vmem:[#allocation15 + $0x8] sm:$0xff]  ;;  %606 = vrot.lane.b32.xlu1 %v2109_v4, %s2518_s17 }
  0x3d   :  { %v2001_v9 = vsel %vm217_vm6, 1.0, %v2516_v6  ;;  %vm222_vm8 = vcmp.eq.s32.totalorder %v2653_v3, %v221_v8  ;;  %v226_v10 = vstv %s2004_s7  ;;  %s2031_s25 = sld [smem:[#allocation6 + $0x1]]  ;;  %v2717_v8 = vld [vmem:[#allocation15] sm:$0xff]  ;;  %578 = vmatpush.msra.mxu3 %v2712_v5  ;;  %732 = vmatpush.msra.mxu2 %v2712_v5 }
  0x3e   :  { %v2003_v11 = vsel %vm222_vm8, 1.0, %v2516_v6  ;;  %vm227_vm10 = vcmp.eq.s32.totalorder %v2653_v3, %v226_v10  ;;  %v231_v12 = vstv %s2006_s21  ;;  %v291_v13 = vsel %vm290_vm0, %v1999_v7, %v2001_v9  ;;  %s314_s27 = sld [smem:[#allocation6]]  ;;  %v2118_v7 = vpop.eup %2117  ;;  %v2725_v9 = vld [vmem:[%s3149_s2] sm:$0x3]  ;;  %886 = vmatpush.msrb.mxu0 %v2712_v5 }
  0x3f   :  { %v2005_v14 = vsel %vm227_vm10, 1.0, %v2516_v6  ;;  %vm232_vm11 = vcmp.eq.s32.totalorder %v2653_v3, %v231_v12  ;;  %v236_v15 = vstv %s2008_s23  ;;  %v293_v16 = vsel %vm292_vm1, %v291_v13, %v2003_v11  ;;  %s2032_s9 = sld [smem:[#allocation6 + $0x9]]  ;;  %579 = vmatpush.msra.mxu3 %v2717_v8  ;;  %733 = vmatpush.msra.mxu2 %v2717_v8 }
  0x40   :  { %v2007_v17 = vsel %vm232_vm11, 1.0, %v2516_v6  ;;  %vm237_vm12 = vcmp.eq.s32.totalorder %v2653_v3, %v236_v15  ;;  %v241_v18 = vstv %s2010_s26  ;;  %v295_v19 = vsel %vm294_vm2, %v293_v16, %v2005_v14  ;;  %s2033_s28 = sld [smem:[#allocation6 + $0x2]]  ;;  %2049 = vmatmul.msk.f32.vlgmr.msra.gmra.mxu3 %vm456_vm5, %v2725_v9  ;;  %887 = vmatpush.msrb.mxu0 %v2717_v8 }
  0x41   :  { %v2009_v20 = vsel %vm237_vm12, 1.0, %v2516_v6  ;;  %vm242_vm13 = vcmp.eq.s32.totalorder %v2653_v3, %v241_v18  ;;  %v246_v21 = vstv %s2012_s22  ;;  %v297_v22 = vsel %vm296_vm3, %v295_v19, %v2007_v17  ;;  %s2034_s3 = sld [smem:[#allocation6 + $0xa]]  ;;  %653 = vmatpush.msrb.mxu3 %v2703_v1  ;;  %1033 = vmatpush.msrb.mxu2 %v2703_v1 }
  0x42   :  { %v2011_v23 = vsel %vm242_vm13, 1.0, %v2516_v6  ;;  %vm247_vm14 = vcmp.eq.s32.totalorder %v2653_v3, %v246_v21  ;;  %v299_v24 = vsel %vm298_vm4, %v297_v22, %v2009_v20  ;;  %v318_v29 = vstv %s2030_s1  ;;  %s2035_s29 = sld [smem:[#allocation6 + $0x3]]  ;;  %v521_v20 = vld [vmem:[#allocation14 + $0x18] sm:$0xff]  ;;  %v520_v21 = vld [vmem:[#allocation14 + $0x10] sm:$0xff]  ;;  %v519_v22 = vld [vmem:[#allocation14 + $0x8] sm:$0xff] }
  0x43   :  { %v2013_v25 = vsel %vm247_vm14, 1.0, %v2516_v6  ;;  %v301_v26 = vsel %vm300_vm7, %v299_v24, %v2011_v23  ;;  %v319_v30 = vmul.f32 %v318_v29, %v2679_v28  ;;  %v321_v31 = vstv %s2031_s25  ;;  %s2036_s30 = sld [smem:[#allocation6 + $0xb]]  ;;  %654 = vmatpush.msrb.mxu3 %v2705_v2  ;;  %1034 = vmatpush.msrb.mxu2 %v2705_v2  ;;  %v518_v23 = vld [vmem:[#allocation14] sm:$0xff] }
  0x44   :  { %v303_v27 = vsel %vm302_vm9, %v301_v26, %v2013_v25  ;;  %v315_v32 = vstv %s314_s27  ;;  %v322_v33 = vmul.f32 %v321_v31, %v2679_v28  ;;  %v464_v10 = vmul.f32 32.0, %v2118_v7  ;;  %544 = vmatpush.msra.mxu1 %v521_v20  ;;  %s2014_s14 = sld [smem:[#allocation2 + $0x4]] }
  0x45   :  { %2045 = vmatmul.msk.f32.vlgmr.msra.gmra.mxu0 %vm424_vm15, %v303_v27  ;;  %v324_v34 = vstv %s2032_s9  ;;  %v316_v35 = vmul.f32 %v315_v32, %v2679_v28  ;;  %v363_v36 = vperm.slane %v319_v30, 0  ;;  %655 = vmatpush.msrb.mxu3 %v2712_v5  ;;  %vm468_vm6 = vweird.f32 %v2118_v7  ;;  %s2016_s24 = sld [smem:[#allocation2 + $0xc]] }
  0x46   :  { %v325_v37 = vmul.f32 %v324_v34, %v2679_v28  ;;  %v327_v38 = vstv %s2033_s28  ;;  %v366_v39 = vperm.slane %v322_v33, 0  ;;  %v465_v11 = vsub.f32 1.0, %v464_v10  ;;  %1035 = vmatpush.msrb.mxu2 %v2712_v5  ;;  %545 = vmatpush.msra.mxu1 %v520_v21  ;;  %s2018_s7 = sld [smem:[#allocation2 + $0x5]] }
  0x47   :  { %v404_v40 = vsel %vm290_vm0, %v316_v35, %v363_v36  ;;  %v328_v41 = vmul.f32 %v327_v38, %v2679_v28  ;;  %v330_v42 = vstv %s2034_s3  ;;  %656 = vmatpush.msrb.mxu3 %v2717_v8  ;;  %s2020_s21 = sld [smem:[#allocation2 + $0xd]] }
  0x48   :  { %v369_v43 = vperm.slane %v325_v37, 0  ;;  %v405_v44 = vsel %vm292_vm1, %v404_v40, %v366_v39  ;;  %v331_v45 = vmul.f32 %v330_v42, %v2679_v28  ;;  %v333_v46 = vstv %s2035_s29  ;;  %1036 = vmatpush.msrb.mxu2 %v2717_v8  ;;  %546 = vmatpush.msra.mxu1 %v519_v22  ;;  %v2759_v37 = vld [vmem:[#allocation11] ss:$0 sm:$0xff]  ;;  %v2761_v40 = vld [vmem:[#allocation12] ss:$0 sm:$0xff]  ;;  %s2022_s23 = sld [smem:[#allocation2 + $0x6]] }
  0x49   :  { %v372_v47 = vperm.slane %v328_v41, 0  ;;  %v334_v49 = vmul.f32 %v333_v46, %v2679_v28  ;;  %v336_v50 = vstv %s2036_s30  ;;  %v466_v12 = vmul.f32 %v2118_v7, %v465_v11  ;;  %807 = vmatpush.msra.mxu3 %v2703_v1  ;;  %s2024_s26 = sld [smem:[#allocation2 + $0xe]] }
  0x4a   :  { %v406_v48 = vsel %vm294_vm2, %v405_v44, %v369_v43  ;;  %v375_v51 = vperm.slane %v331_v45, 0  ;;  %v337_v53 = vmul.f32 %v336_v50, %v2679_v28  ;;  %547 = vmatpush.msra.mxu1 %v518_v23  ;;  %v2769_v43 = vld [vmem:[%s3157_s10] ss:$0 sm:$0xff]  ;;  %s2026_s22 = sld [smem:[#allocation2 + $0x7]] }
  0x4b   :  { %v407_v52 = vsel %vm296_vm3, %v406_v48, %v372_v47  ;;  %v378_v54 = vperm.slane %v334_v49, 0  ;;  %v467_v13 = vadd.f32 %v2118_v7, %v466_v12  ;;  %808 = vmatpush.msra.mxu3 %v2705_v2  ;;  %s2028_s1 = sld [smem:[#allocation2 + $0xf]] }
  0x4c   :  { %v408_v55 = vsel %vm298_vm4, %v407_v52, %v375_v51  ;;  %v381_v56 = vperm.slane %v337_v53, 0  ;;  %956 = vmatpush.msrb.mxu1 %v2703_v1  ;;  %s2038_s25 = sld [smem:[#allocation6 + $0xc]] }
  0x4d   :  { %v409_v57 = vsel %vm300_vm7, %v408_v55, %v378_v54  ;;  %809 = vmatpush.msra.mxu3 %v2712_v5  ;;  %v2745_v14 = vsel %vm468_vm6, %v2118_v7, %v467_v13  ;;  %s2039_s27 = sld [smem:[#allocation6 + $0x5]] }
  0x4e   :  { %v410_v59 = vsel %vm302_vm9, %v409_v57, %v381_v56  ;;  %957 = vmatpush.msrb.mxu1 %v2705_v2  ;;  %s2037_s9 = sld [smem:[#allocation6 + $0x4]] }
  0x4f   :  { %v422_v60 = vadd.f32 %v2698_v58, %v410_v59  ;;  %810 = vmatpush.msra.mxu3 %v2717_v8  ;;  %s2040_s28 = sld [smem:[#allocation6 + $0xd]] }
  0x50   :  { %958 = vmatpush.msrb.mxu1 %v2712_v5  ;;  %s2041_s3 = sld [smem:[#allocation6 + $0x6]] }
  0x51   :  { %s2042_s29 = sld [smem:[#allocation6 + $0xe]] }
  0x52   :  { %959 = vmatpush.msrb.mxu1 %v2717_v8  ;;  %s2043_s30 = sld [smem:[#allocation6 + $0x7]] }
  0x53   :  { %s2044_s13 = sld [smem:[#allocation6 + $0xf]] }
  0xae   :  { %v2750_v24 = vpop.permute.xlu1 %606 }
  0xc2   :  { %v448_v61 = vpop.f32.mrf.mxu0 }
  0xc3   :  { %v449_v62 = vadd.f32 %v448_v61, %v422_v60  ;;  %v581_v25 = vpop.f32.mrf.mxu3 }
  0xc4   :  { %v609_v26 = vadd.f32 %v2750_v24, %v581_v25 }
  0xc5   :  { %v457_v63 = vsel %vm456_vm5, %v449_v62, 0.0 }
  0xc6   :  { %458 = vadd.xlane.f32.xlu0 %v457_v63  ;;  %611 = vrot.lane.b32.xlu1 %v609_v26, %s2518_s17 }
 0x138   :  { %v612_v57 = vpop.permute.xlu1 %611 }
 0x139   :  { %v459_v15 = vpop.xlane.xlu0 %458 }
 0x13a   :  { %v470_v16 = vmul.f32 %v2745_v14, %v459_v15 }
 0x13c   :  { %v472_v17 = vsub.f32 %v449_v62, %v470_v16 }
 0x13e   :  { %v474_v18 = vmul.f32 %v472_v17, %v472_v17 }
 0x140   :  { %v476_v19 = vsel %vm456_vm5, %v474_v18, 0.0 }
 0x141   :  { %477 = vadd.xlane.f32.xlu0 %v476_v19 }
 0x1b4   :  { %v478_v27 = vpop.xlane.xlu0 %477 }
 0x1b5   :  { %v482_v29 = vmul.f32 %v478_v27, %v2745_v14 }
 0x1b7   :  { %v484_v30 = vadd.f32 1e-05, %v482_v29 }
 0x1b9   :  { %2119 = vrsqrt.f32 %v484_v30  ;;  %vm492_vm10 = vweird.f32 %v484_v30 }
 0x1bf   :  { %v2120_v31 = vpop.eup %2119 }
 0x1c0   :  { %v487_v32 = vmul.f32 %v2120_v31, %v484_v30  ;;  %vm493_vm8 = vweird.f32 %v2120_v31 }
 0x1c1   :  { %vm494_vm11 = vmor %vm492_vm10, %vm493_vm8 }
 0x1c2   :  { %v488_v33 = vmul.f32 %v2120_v31, %v487_v32 }
 0x1c4   :  { %v489_v34 = vmul.f32 0.5, %v488_v33 }
 0x1c6   :  { %v490_v35 = vsub.f32 1.5, %v489_v34 }
 0x1c8   :  { %v491_v36 = vmul.f32 %v2120_v31, %v490_v35 }
 0x1ca   :  { %v495_v38 = vsel %vm494_vm11, %v2120_v31, %v491_v36 }
 0x1cb   :  { %v506_v39 = vmul.f32 %v495_v38, %v472_v17 }
 0x1cd   :  { %v511_v41 = vmul.f32 %v2759_v37, %v506_v39 }
 0x1cf   :  { %v516_v42 = vadd.f32 %v2761_v40, %v511_v41 }
 0x1d1   :  { %2047 = vmatmul.msk.f32.vlgmr.msra.gmra.mxu1 %vm456_vm5, %v516_v42 }
 0x24e   :  { %v549_v44 = vpop.f32.mrf.mxu1 }
 0x24f   :  { %v2772_v45 = vadd.f32 %v2769_v43, %v549_v44 }
 0x251   :  { %v584_v46 = vadd.f32 %v581_v25, %v2772_v45 }
 0x253   :  { %v2050_v47 = vmul.f32 -1.442695, %v584_v46 }
 0x255   :  { %2121 = vpow2.f32 %v2050_v47 }
 0x25b   :  { %v2122_v48 = vpop.eup %2121 }
 0x25c   :  { %v588_v49 = vadd.f32 1.0, %v2122_v48 }
 0x25e   :  { %2123 = vrcp.f32 %v588_v49  ;;  %v600_v53 = vand.u32 2147483648, %v588_v49  ;;  %v598_v55 = vand.u32 2147483647, %v588_v49  ;;  %vm594_vm13 = vweird.f32 %v588_v49 }
 0x260   :  { %v601_v59 = vor.u32 1.1754944e-38, %v600_v53  ;;  %vm599_vm6 = vcmp.eq.f32.partialorder %v598_v55, 8.507059e+37 }
 0x264   :  { %v2124_v50 = vpop.eup %2123 }
 0x265   :  { %v590_v51 = vmul.f32 %v2124_v50, %v588_v49  ;;  %vm595_vm12 = vweird.f32 %v2124_v50 }
 0x266   :  { %vm596_vm14 = vmor %vm594_vm13, %vm595_vm12 }
 0x267   :  { %v591_v52 = vsub.f32 1.0, %v590_v51 }
 0x269   :  { %v592_v54 = vmul.f32 %v2124_v50, %v591_v52 }
 0x26b   :  { %v593_v56 = vadd.f32 %v2124_v50, %v592_v54 }
 0x26d   :  { %v597_v60 = vsel %vm596_vm14, %v2124_v50, %v593_v56 }
 0x26e   :  { %v602_v61 = vsel %vm599_vm6, %v601_v59, %v597_v60 }
 0x26f   :  { %v614_v62 = vmul.f32 %v612_v57, %v602_v61 }
 0x271   :  { %616 = vrot.lane.b32.xlu2 %v614_v62, %s2518_s17 }
 0x2cb   :  { %v617_v63 = vpop.permute.xlu2 %616 }
 0x2cc   :  { %v619_v0 = vadd.f32 %v617_v63, %v2772_v45 }
 0x2ce   :  { %2125 = vtanh.f32 %v619_v0 }
 0x2d4   :  { %v2126_v4 = vpop.eup %2125 }
 0x2d5   :  { %622 = vrot.lane.b32.xlu2 %v2126_v4, %s2518_s17 }
 0x32f   :  { %v623_v7 = vpop.permute.xlu2 %622 }
 0x330   :  { %v625_v10 = vsub.f32 %v2725_v9, %v623_v7 }
 0x332   :  { %627 = vrot.lane.b32.xlu0 %v625_v10, %s2519_s20 }
 0x3a4   :  { %v628_v11 = vpop.permute.xlu0 %627 }
 0x3a5   :  { %v630_v12 = vmul.f32 %v628_v11, %v602_v61 }
 0x3a7   :  { %632 = vrot.lane.b32.xlu1 %v630_v12, %s2519_s20 }
 0x419   :  { %v633_v13 = vpop.permute.xlu1 %632 }
 0x41a   :  { %v2781_v15 = vadd.f32 %v2126_v4, %v633_v13 }
 0x41c   :  { %637 = vrot.lane.b32.xlu2 %v2781_v15, %s2518_s17 }
 0x476   :  { %v638_v16 = vpop.permute.xlu2 %637 }
 0x477   :  { %2051 = vmatmul.msk.f32.vlgmr.msrb.gmra.mxu3 %vm456_vm5, %v638_v16 }
 0x478   :  { %1110 = vmatpush.msrb.mxu3 %v2703_v1 }
 0x47a   :  { %1111 = vmatpush.msrb.mxu3 %v2705_v2 }
 0x47c   :  { %1112 = vmatpush.msrb.mxu3 %v2712_v5 }
 0x47e   :  { %1113 = vmatpush.msrb.mxu3 %v2717_v8 }
 0x4fa   :  { %v658_v9 = vpop.f32.mrf.mxu3 }
 0x4fb   :  { %v684_v17 = vadd.f32 %v658_v9, %v2750_v24  ;;  %v662_v19 = vrot.slane %v658_v9, 6 }
 0x4fd   :  { %v686_v18 = vrot.slane %v684_v17, 6  ;;  %v664_v20 = vadd.f32 %v662_v19, %v2772_v45 }
 0x4ff   :  { %687 = vrot.lane.b32.xlu1 %v686_v18, %s2518_s17  ;;  %v2052_v21 = vmul.f32 -1.442695, %v664_v20 }
 0x501   :  { %2127 = vpow2.f32 %v2052_v21 }
 0x507   :  { %v2128_v22 = vpop.eup %2127 }
 0x508   :  { %v668_v23 = vadd.f32 1.0, %v2128_v22 }
 0x50a   :  { %2129 = vrcp.f32 %v668_v23  ;;  %v680_v8 = vand.u32 2147483648, %v668_v23  ;;  %vm674_vm10 = vweird.f32 %v668_v23  ;;  %v678_v27 = vand.u32 2147483647, %v668_v23 }
 0x50c   :  { %v681_v30 = vor.u32 1.1754944e-38, %v680_v8  ;;  %vm679_vm12 = vcmp.eq.f32.partialorder %v678_v27, 8.507059e+37  ;;  %v261_v8 = vstv %s2018_s7  ;;  %v266_v27 = vstv %s2020_s21 }
 0x510   :  { %v2130_v1 = vpop.eup %2129 }
 0x511   :  { %v670_v2 = vmul.f32 %v2130_v1, %v668_v23  ;;  %vm675_vm8 = vweird.f32 %v2130_v1 }
 0x512   :  { %vm676_vm11 = vmor %vm674_vm10, %vm675_vm8 }
 0x513   :  { %v671_v25 = vsub.f32 1.0, %v670_v2 }
 0x515   :  { %v672_v5 = vmul.f32 %v2130_v1, %v671_v25 }
 0x517   :  { %v673_v26 = vadd.f32 %v2130_v1, %v672_v5  ;;  %v251_v5 = vstv %s2014_s14  ;;  %s2522_s14 = smov 2  }
 0x518   :  { %vm252_vm10 = vcmp.eq.s32.totalorder %v2653_v3, %v251_v5 }
 0x519   :  { %v677_v29 = vsel %vm676_vm11, %v2130_v1, %v673_v26  ;;  %v256_v26 = vstv %s2016_s24 }
 0x51a   :  { %v682_v32 = vsel %vm679_vm12, %v681_v30, %v677_v29  ;;  %vm257_vm11 = vcmp.eq.s32.totalorder %v2653_v3, %v256_v26  ;;  %vm262_vm12 = vcmp.eq.s32.totalorder %v2653_v3, %v261_v8  ;;  %v2015_v29 = vsel %vm252_vm10, 1.0, %v2516_v6 }
 0x51b   :  { %v2017_v30 = vsel %vm257_vm11, 1.0, %v2516_v6  ;;  %v360_v8 = vstv %s2044_s13 }
 0x571   :  { %v688_v31 = vpop.permute.xlu1 %687 }
 0x572   :  { %v690_v33 = vmul.f32 %v688_v31, %v682_v32  ;;  %v271_v31 = vstv %s2022_s23 }
 0x574   :  { %692 = vrot.lane.b32.xlu2 %v690_v33, %s2518_s17  ;;  %v281_v33 = vstv %s2026_s22 }
 0x5ce   :  { %v693_v34 = vpop.permute.xlu2 %692 }
 0x5cf   :  { %v695_v35 = vadd.f32 %v693_v34, %v2772_v45  ;;  %v286_v34 = vstv %s2028_s1 }
 0x5d0   :  { %vm287_vm10 = vcmp.eq.s32.totalorder %v2653_v3, %v286_v34 }
 0x5d1   :  { %2131 = vtanh.f32 %v695_v35  ;;  %v2019_v35 = vsel %vm262_vm12, 1.0, %v2516_v6 }
 0x5d7   :  { %v2132_v36 = vpop.eup %2131 }
 0x5d8   :  { %v698_v38 = vrot.slane %v2132_v36, 2 }
 0x5da   :  { %v700_v39 = vsub.f32 %v2781_v15, %v698_v38 }
 0x5dc   :  { %v702_v41 = vrot.slane %v700_v39, 6  ;;  %v304_v39 = vsel %vm290_vm0, %v2015_v29, %v2017_v30 }
 0x5de   :  { %703 = vrot.lane.b32.xlu1 %v702_v41, %s2520_s12 }
 0x650   :  { %v704_v42 = vpop.permute.xlu1 %703 }
 0x651   :  { %v706_v44 = vmul.f32 %v704_v42, %v682_v32  ;;  %v276_v32 = vstv %s2024_s26  ;;  %v305_v42 = vsel %vm292_vm1, %v304_v39, %v2019_v35 }
 0x653   :  { %708 = vrot.lane.b32.xlu2 %v706_v44, %s2519_s20 }
 0x6ad   :  { %v709_v46 = vpop.permute.xlu2 %708 }
 0x6ae   :  { %v2798_v47 = vadd.f32 %v2132_v36, %v709_v46 }
 0x6b0   :  { %v713_v48 = vrot.slane %v2798_v47, 2 }
 0x6b2   :  { %714 = vrot.lane.b32.xlu0 %v713_v48, %s2518_s17  ;;  %v2029_v48 = vsel %vm287_vm10, 1.0, %v2516_v6 }
 0x724   :  { %v715_v49 = vpop.permute.xlu0 %714 }
 0x725   :  { %2053 = vmatmul.msk.f32.vlgmr.msra.gmra.mxu2 %vm456_vm5, %v715_v49 }
 0x7a8   :  { %v735_v50 = vpop.f32.mrf.mxu2 }
 0x7a9   :  { %v761_v51 = vadd.f32 %v735_v50, %v2750_v24  ;;  %v739_v53 = vrot.slane %v735_v50, 4 }
 0x7ab   :  { %v763_v52 = vrot.slane %v761_v51, 4  ;;  %v741_v54 = vadd.f32 %v739_v53, %v2772_v45 }
 0x7ad   :  { %764 = vrot.lane.b32.xlu1 %v763_v52, %s2518_s17  ;;  %v2054_v55 = vmul.f32 -1.442695, %v741_v54 }
 0x7af   :  { %2133 = vpow2.f32 %v2054_v55 }
 0x7b5   :  { %v2134_v56 = vpop.eup %2133 }
 0x7b6   :  { %v745_v57 = vadd.f32 1.0, %v2134_v56 }
 0x7b8   :  { %2135 = vrcp.f32 %v745_v57  ;;  %v757_v0 = vand.u32 2147483648, %v745_v57  ;;  %vm751_vm14 = vweird.f32 %v745_v57  ;;  %v755_v4 = vand.u32 2147483647, %v745_v57 }
 0x7ba   :  { %v758_v10 = vor.u32 1.1754944e-38, %v757_v0  ;;  %vm756_vm8 = vcmp.eq.f32.partialorder %v755_v4, 8.507059e+37  ;;  %v348_v4 = vstv %s2040_s28 }
 0x7be   :  { %v2136_v59 = vpop.eup %2135 }
 0x7bf   :  { %v747_v60 = vmul.f32 %v2136_v59, %v745_v57  ;;  %vm752_vm13 = vweird.f32 %v2136_v59 }
 0x7c0   :  { %vm753_vm6 = vmor %vm751_vm14, %vm752_vm13  ;;  %vm267_vm13 = vcmp.eq.s32.totalorder %v2653_v3, %v266_v27  ;;  %vm272_vm14 = vcmp.eq.s32.totalorder %v2653_v3, %v271_v31  ;;  %v361_v31 = vmul.f32 %v360_v8, %v2679_v28 }
 0x7c1   :  { %v748_v61 = vsub.f32 1.0, %v747_v60  ;;  %v2021_v36 = vsel %vm267_vm13, 1.0, %v2516_v6  ;;  %v2023_v38 = vsel %vm272_vm14, 1.0, %v2516_v6  ;;  %v342_v60 = vstv %s2038_s25 }
 0x7c2   :  { %v306_v46 = vsel %vm294_vm2, %v305_v42, %v2021_v36  ;;  %v402_v35 = vperm.slane %v361_v31, 0 }
 0x7c3   :  { %v749_v62 = vmul.f32 %v2136_v59, %v748_v61  ;;  %v307_v49 = vsel %vm296_vm3, %v306_v46, %v2023_v38  ;;  %v345_v61 = vstv %s2039_s27 }
 0x7c4   :  { %v346_v0 = vmul.f32 %v345_v61, %v2679_v28 }
 0x7c5   :  { %v750_v63 = vadd.f32 %v2136_v59, %v749_v62  ;;  %v339_v62 = vstv %s2037_s9 }
 0x7c7   :  { %v754_v7 = vsel %vm753_vm6, %v2136_v59, %v750_v63  ;;  %vm277_vm6 = vcmp.eq.s32.totalorder %v2653_v3, %v276_v32  ;;  %v343_v63 = vmul.f32 %v342_v60, %v2679_v28 }
 0x7c8   :  { %v759_v12 = vsel %vm756_vm8, %v758_v10, %v754_v7  ;;  %vm282_vm8 = vcmp.eq.s32.totalorder %v2653_v3, %v281_v33  ;;  %v2025_v41 = vsel %vm277_vm6, 1.0, %v2516_v6  ;;  %v340_v7 = vmul.f32 %v339_v62, %v2679_v28 }
 0x7c9   :  { %v2027_v44 = vsel %vm282_vm8, 1.0, %v2516_v6  ;;  %v308_v50 = vsel %vm298_vm4, %v307_v49, %v2025_v41  ;;  %v384_v10 = vperm.slane %v343_v63, 0 }
 0x7ca   :  { %v309_v51 = vsel %vm300_vm7, %v308_v50, %v2027_v44 }
 0x7cb   :  { %v310_v3 = vsel %vm302_vm9, %v309_v51, %v2029_v48 }
 0x7cc   :  { %2046 = vmatmul.msk.f32.gmra.mxu0 %vm424_vm15, %v310_v3 }
 0x81f   :  { %v765_v11 = vpop.permute.xlu1 %764 }
 0x820   :  { %v767_v13 = vmul.f32 %v765_v11, %v759_v12  ;;  %v349_v11 = vmul.f32 %v348_v4, %v2679_v28 }
 0x822   :  { %769 = vrot.lane.b32.xlu2 %v767_v13, %s2518_s17 }
 0x849   :  { %v451_v50 = vpop.f32.mrf.mxu0 }
 0x87c   :  { %v770_v16 = vpop.permute.xlu2 %769 }
 0x87d   :  { %v772_v9 = vadd.f32 %v770_v16, %v2772_v45  ;;  %v387_v16 = vperm.slane %v346_v0, 0 }
 0x87f   :  { %2137 = vtanh.f32 %v772_v9  ;;  %v411_v9 = vsel %vm290_vm0, %v340_v7, %v384_v10 }
 0x885   :  { %v2138_v17 = vpop.eup %2137 }
 0x886   :  { %v775_v18 = vrot.slane %v2138_v17, 2 }
 0x888   :  { %v777_v19 = vsub.f32 %v2798_v47, %v775_v18  ;;  %v354_v18 = vstv %s2042_s29 }
 0x88a   :  { %v779_v20 = vrot.slane %v777_v19, 6 }
 0x88c   :  { %780 = vrot.lane.b32.xlu0 %v779_v20, %s2520_s12  ;;  %v390_v20 = vperm.slane %v349_v11, 0 }
 0x8fe   :  { %v781_v21 = vpop.permute.xlu0 %780 }
 0x8ff   :  { %v783_v22 = vmul.f32 %v781_v21, %v759_v12  ;;  %v351_v12 = vstv %s2041_s3  ;;  %v412_v21 = vsel %vm292_vm1, %v411_v9, %v387_v16 }
 0x900   :  { %v413_v5 = vsel %vm294_vm2, %v412_v21, %v390_v20  ;;  %v1169_v21 = vsel %vm292_vm1, %v2781_v15, %v2798_v47 }
 0x901   :  { %785 = vrot.lane.b32.xlu1 %v783_v22, %s2519_s20  ;;  %v355_v22 = vmul.f32 %v354_v18, %v2679_v28 }
 0x903   :  { %v396_v27 = vperm.slane %v355_v22, 0 }
 0x973   :  { %v786_v23 = vpop.permute.xlu1 %785 }
 0x974   :  { %v2811_v1 = vadd.f32 %v2138_v17, %v786_v23  ;;  %v352_v17 = vmul.f32 %v351_v12, %v2679_v28  ;;  %v357_v23 = vstv %s2043_s30 }
 0x975   :  { %v358_v26 = vmul.f32 %v357_v23, %v2679_v28 }
 0x976   :  { %v790_v2 = vrot.slane %v2811_v1, 4  ;;  %v1170_v23 = vsel %vm296_vm3, %v1169_v21, %v2811_v1 }
 0x977   :  { %v399_v32 = vperm.slane %v358_v26, 0  ;;  %v1176_v26 = vld [vmem:[#allocation14 + $0x20] sm:$0xff] }
 0x978   :  { %791 = vrot.lane.b32.xlu2 %v790_v2, %s2518_s17  ;;  %v393_v2 = vperm.slane %v352_v17, 0 }
 0x97a   :  { %v414_v29 = vsel %vm296_vm3, %v413_v5, %v393_v2  ;;  %v1177_v5 = vld [vmem:[#allocation14 + $0x28] sm:$0xff] }
 0x97b   :  { %v415_v33 = vsel %vm298_vm4, %v414_v29, %v396_v27 }
 0x97c   :  { %v416_v38 = vsel %vm300_vm7, %v415_v33, %v399_v32 }
 0x97d   :  { %v417_v42 = vsel %vm302_vm9, %v416_v38, %v402_v35 }
 0x97e   :  { %v423_v28 = vadd.f32 %v2698_v58, %v417_v42 }
 0x980   :  { %v452_v51 = vadd.f32 %v451_v50, %v423_v28 }
 0x982   :  { %v460_v3 = vsel %vm456_vm5, %v452_v51, 0.0 }
 0x9d2   :  { %v792_v25 = vpop.permute.xlu2 %791 }
 0x9d3   :  { %2055 = vmatmul.msk.f32.vlgmr.msra.gmra.mxu3 %vm456_vm5, %v792_v25 }
 0xa56   :  { %v812_v52 = vpop.f32.mrf.mxu3 }
 0xa57   :  { %v838_v53 = vadd.f32 %v812_v52, %v2750_v24  ;;  %v816_v55 = vrot.slane %v812_v52, 2 }
 0xa59   :  { %v840_v54 = vrot.slane %v838_v53, 2  ;;  %v818_v56 = vadd.f32 %v816_v55, %v2772_v45 }
 0xa5b   :  { %841 = vrot.lane.b32.xlu0 %v840_v54, %s2518_s17  ;;  %v2056_v6 = vmul.f32 -1.442695, %v818_v56 }
 0xa5d   :  { %2139 = vpow2.f32 %v2056_v6 }
 0xa63   :  { %v2140_v57 = vpop.eup %2139 }
 0xa64   :  { %v822_v59 = vadd.f32 1.0, %v2140_v57 }
 0xa66   :  { %2141 = vrcp.f32 %v822_v59  ;;  %v834_v36 = vand.u32 2147483648, %v822_v59  ;;  %vm828_vm15 = vweird.f32 %v822_v59  ;;  %v832_v39 = vand.u32 2147483647, %v822_v59 }
 0xa68   :  { %v835_v44 = vor.u32 1.1754944e-38, %v834_v36  ;;  %vm833_vm11 = vcmp.eq.f32.partialorder %v832_v39, 8.507059e+37 }
 0xa6c   :  { %v2142_v13 = vpop.eup %2141 }
 0xa6d   :  { %v824_v19 = vmul.f32 %v2142_v13, %v822_v59  ;;  %vm829_vm0 = vweird.f32 %v2142_v13 }
 0xa6e   :  { %vm830_vm2 = vmor %vm828_vm15, %vm829_vm0 }
 0xa6f   :  { %v825_v25 = vsub.f32 1.0, %v824_v19 }
 0xa71   :  { %v826_v30 = vmul.f32 %v2142_v13, %v825_v25 }
 0xa73   :  { %v827_v34 = vadd.f32 %v2142_v13, %v826_v30 }
 0xa75   :  { %v831_v41 = vsel %vm830_vm2, %v2142_v13, %v827_v34 }
 0xa76   :  { %v836_v48 = vsel %vm833_vm11, %v835_v44, %v831_v41 }
 0xa85   :  { %461 = vadd.xlane.f32.xlu0 %v460_v3 }
 0xacd   :  { %v842_v46 = vpop.permute.xlu0 %841 }
 0xace   :  { %v844_v49 = vmul.f32 %v842_v46, %v836_v48 }
 0xad0   :  { %846 = vrot.lane.b32.xlu1 %v844_v49, %s2518_s17 }
 0xaf8   :  { %v462_v58 = vpop.xlane.xlu0 %461 }
 0xaf9   :  { %v471_v57 = vmul.f32 %v2745_v14, %v462_v58  ;;  %v2895_v58 = vld [vmem:[#allocation15 + $0x38] sm:$0xff] }
 0xafa   :  { %1242 = vmatpush.msra.mxu1 %v2895_v58  ;;  %1319 = vmatpush.msra.mxu2 %v2895_v58 }
 0xafb   :  { %v473_v59 = vsub.f32 %v452_v51, %v471_v57  ;;  %v2897_v57 = vld [vmem:[#allocation15 + $0x30] sm:$0xff]  ;;  %1396 = vmatpush.msra.mxu3 %v2895_v58 }
 0xafc   :  { %1243 = vmatpush.msra.mxu1 %v2897_v57  ;;  %1320 = vmatpush.msra.mxu2 %v2897_v57 }
 0xafd   :  { %v475_v60 = vmul.f32 %v473_v59, %v473_v59  ;;  %1397 = vmatpush.msra.mxu3 %v2897_v57 }
 0xaff   :  { %v479_v61 = vsel %vm456_vm5, %v475_v60, 0.0  ;;  %v2907_v60 = vld [vmem:[#allocation15 + $0x20] sm:$0xff] }
 0xb42   :  { %v847_v52 = vpop.permute.xlu1 %846 }
 0xb43   :  { %v849_v53 = vadd.f32 %v847_v52, %v2772_v45 }
 0xb45   :  { %2143 = vtanh.f32 %v849_v53 }
 0xb4b   :  { %v2144_v54 = vpop.eup %2143 }
 0xb4c   :  { %v852_v55 = vrot.slane %v2144_v54, 2 }
 0xb4e   :  { %v854_v56 = vsub.f32 %v2811_v1, %v852_v55 }
 0xb50   :  { %v856_v6 = vrot.slane %v854_v56, 6 }
 0xb52   :  { %857 = vrot.lane.b32.xlu2 %v856_v6, %s2520_s12 }
 0xb7b   :  { %480 = vadd.xlane.f32.xlu2 %v479_v61  ;;  %v2114_v61 = vld [vmem:[%s3158_s11 + $0x1] ss:$0 sm:$0xff] }
 0xbac   :  { %v858_v62 = vpop.permute.xlu2 %857 }
 0xbad   :  { %v860_v63 = vmul.f32 %v858_v62, %v836_v48 }
 0xbaf   :  { %862 = vrot.lane.b32.xlu1 %v860_v63, %s2519_s20  ;;  %v2929_v63 = vld [vmem:[%s3149_s2 + $0x2] sm:$0x3] }
 0xbee   :  { %v481_v45 = vpop.xlane.xlu2 %480 }
 0xbef   :  { %v483_v0 = vmul.f32 %v481_v45, %v2745_v14 }
 0xbf1   :  { %v485_v4 = vadd.f32 1e-05, %v483_v0 }
 0xbf3   :  { %2145 = vrsqrt.f32 %v485_v4  ;;  %vm502_vm4 = vweird.f32 %v485_v4 }
 0xbf9   :  { %v2146_v7 = vpop.eup %2145 }
 0xbfa   :  { %v497_v10 = vmul.f32 %v2146_v7, %v485_v4  ;;  %vm503_vm9 = vweird.f32 %v2146_v7 }
 0xbfb   :  { %vm504_vm12 = vmor %vm502_vm4, %vm503_vm9 }
 0xbfc   :  { %v498_v11 = vmul.f32 %v2146_v7, %v497_v10 }
 0xbfe   :  { %v499_v12 = vmul.f32 0.5, %v498_v11 }
 0xc00   :  { %v500_v13 = vsub.f32 1.5, %v499_v12 }
 0xc02   :  { %v501_v16 = vmul.f32 %v2146_v7, %v500_v13  ;;  %v2948_v13 = vld [vmem:[%s3157_s10 + $0x1] ss:$0 sm:$0xff]  ;;  %s2521_s10 = smov [#allocation21]  }
 0xc03   :  { %s1976_s4 = sshll.u32 %s2521_s10, 4  ;;  %s1977_s4 = int_to_ptr.vmem [resolvable:$true] %s1976_s4 }
 0xc04   :  { %v505_v9 = vsel %vm504_vm12, %v2146_v7, %v501_v16 }
 0xc05   :  { %v507_v17 = vmul.f32 %v505_v9, %v473_v59  ;;  %v2901_v59 = vld [vmem:[#allocation15 + $0x28] sm:$0xff] }
 0xc06   :  { %1244 = vmatpush.msra.mxu1 %v2901_v59  ;;  %1321 = vmatpush.msra.mxu2 %v2901_v59 }
 0xc07   :  { %v512_v18 = vmul.f32 %v2759_v37, %v507_v17  ;;  %v1179_v37 = vld [vmem:[#allocation14 + $0x38] sm:$0xff]  ;;  %1398 = vmatpush.msra.mxu3 %v2901_v59 }
 0xc08   :  { %1207 = vmatpush.msra.mxu0 %v1179_v37  ;;  %1245 = vmatpush.msra.mxu1 %v2907_v60 }
 0xc09   :  { %v517_v19 = vadd.f32 %v2761_v40, %v512_v18  ;;  %v1178_v40 = vld [vmem:[#allocation14 + $0x30] sm:$0xff]  ;;  %1322 = vmatpush.msra.mxu2 %v2907_v60  ;;  %1399 = vmatpush.msra.mxu3 %v2907_v60 }
 0xc0a   :  { %1208 = vmatpush.msra.mxu0 %v1178_v40 }
 0xc0b   :  { %2048 = vmatmul.msk.f32.gmra.mxu1 %vm456_vm5, %v517_v19 }
 0xc0c   :  { %1209 = vmatpush.msra.mxu0 %v1177_v5 }
 0xc0e   :  { %1210 = vmatpush.msra.mxu0 %v1176_v26 }
 0xc21   :  { %v863_v20 = vpop.permute.xlu1 %862 }
 0xc22   :  { %v865_v22 = vadd.f32 %v2144_v54, %v863_v20 }
 0xc24   :  { %v1171_v2 = vsel %vm300_vm7, %v1170_v23, %v865_v22  ;;  %v867_v25 = vrot.slane %v865_v22, 6 }
 0xc25   :  { %1187 = vrot.lane.b32.xlu2 %v1171_v2, %s2518_s17 }
 0xc26   :  { %868 = vrot.lane.b32.xlu1 %v867_v25, %s2518_s17 }
 0xc7f   :  { %v1188_v47 = vpop.permute.xlu2 %1187 }
 0xc88   :  { %v552_v27 = vpop.f32.mrf.mxu1 }
 0xc89   :  { %v2884_v29 = vadd.f32 %v2769_v43, %v552_v27 }
 0xc98   :  { %v869_v15 = vpop.permute.xlu1 %868 }
 0xc99   :  { %2057 = vmatmul.msk.f32.vlgmr.msrb.gmra.mxu0 %vm456_vm5, %v869_v15 }
 0xc9a   :  { %1699 = vmatpush.msrb.mxu0 %v2895_v58 }
 0xc9c   :  { %1700 = vmatpush.msrb.mxu0 %v2897_v57 }
 0xc9e   :  { %1701 = vmatpush.msrb.mxu0 %v2901_v59 }
 0xca0   :  { %1702 = vmatpush.msrb.mxu0 %v2907_v60 }
 0xca1   :  { %2066 = vmatmul.msk.f32.vlgmr.msra.gmra.mxu0 %vm456_vm5, %v1188_v47 }
 0xd16   :  { %v889_v1 = vpop.f32.mrf.mxu0 }
 0xd17   :  { %v912_v8 = vadd.f32 %v889_v1, %v2750_v24  ;;  %v892_v30 = vadd.f32 %v889_v1, %v2884_v29 }
 0xd19   :  { %914 = vrot.lane.b32.xlu1 %v912_v8, %s2518_s17  ;;  %v2058_v31 = vmul.f32 -1.442695, %v892_v30 }
 0xd1b   :  { %2147 = vpow2.f32 %v2058_v31 }
 0xd1e   :  { %v1212_v9 = vpop.f32.mrf.mxu0 }
 0xd1f   :  { %v2952_v17 = vadd.f32 %v2948_v13, %v1212_v9 }
 0xd21   :  { %v2148_v32 = vpop.eup %2147 }
 0xd22   :  { %v896_v33 = vadd.f32 1.0, %v2148_v32 }
 0xd24   :  { %2149 = vrcp.f32 %v896_v33  ;;  %v908_v41 = vand.u32 2147483648, %v896_v33  ;;  %vm902_vm14 = vweird.f32 %v896_v33  ;;  %v906_v42 = vand.u32 2147483647, %v896_v33 }
 0xd26   :  { %v909_v43 = vor.u32 1.1754944e-38, %v908_v41  ;;  %vm907_vm8 = vcmp.eq.f32.partialorder %v906_v42, 8.507059e+37 }
 0xd2a   :  { %v2150_v34 = vpop.eup %2149 }
 0xd2b   :  { %v898_v35 = vmul.f32 %v2150_v34, %v896_v33  ;;  %vm903_vm13 = vweird.f32 %v2150_v34 }
 0xd2c   :  { %vm904_vm6 = vmor %vm902_vm14, %vm903_vm13 }
 0xd2d   :  { %v899_v36 = vsub.f32 1.0, %v898_v35 }
 0xd2f   :  { %v900_v38 = vmul.f32 %v2150_v34, %v899_v36 }
 0xd31   :  { %v901_v39 = vadd.f32 %v2150_v34, %v900_v38 }
 0xd33   :  { %v905_v44 = vsel %vm904_vm6, %v2150_v34, %v901_v39 }
 0xd34   :  { %v910_v48 = vsel %vm907_vm8, %v909_v43, %v905_v44 }
 0xd8b   :  { %v915_v46 = vpop.permute.xlu1 %914 }
 0xd8c   :  { %v917_v28 = vmul.f32 %v915_v46, %v910_v48 }
 0xd8e   :  { %919 = vrot.lane.b32.xlu1 %v917_v28, %s2518_s17 }
 0xe00   :  { %v920_v49 = vpop.permute.xlu1 %919 }
 0xe01   :  { %v922_v50 = vadd.f32 %v920_v49, %v2884_v29 }
 0xe03   :  { %2151 = vtanh.f32 %v922_v50 }
 0xe09   :  { %v2152_v51 = vpop.eup %2151 }
 0xe0a   :  { %v925_v3 = vrot.slane %v2152_v51, 2 }
 0xe0c   :  { %v927_v52 = vsub.f32 %v865_v22, %v925_v3 }
 0xe0e   :  { %v929_v53 = vrot.slane %v927_v52, 6 }
 0xe10   :  { %930 = vrot.lane.b32.xlu1 %v929_v53, %s2520_s12 }
 0xe82   :  { %v931_v54 = vpop.permute.xlu1 %930 }
 0xe83   :  { %v933_v55 = vmul.f32 %v931_v54, %v910_v48 }
 0xe85   :  { %935 = vrot.lane.b32.xlu0 %v933_v55, %s2519_s20 }
 0xef7   :  { %v936_v56 = vpop.permute.xlu0 %935 }
 0xef8   :  { %v2891_v6 = vadd.f32 %v2152_v51, %v936_v56 }
 0xefa   :  { %940 = vrot.lane.b32.xlu1 %v2891_v6, %s2518_s17 }
 0xf02   :  { %1272 = vrot.lane.b32.xlu1 %v2114_v61, %s2518_s17 }
 0xf6c   :  { %v941_v62 = vpop.permute.xlu1 %940 }
 0xf6d   :  { %2059 = vmatmul.msk.f32.vlgmr.msrb.gmra.mxu1 %vm456_vm5, %v941_v62 }
 0xf6e   :  { %1473 = vmatpush.msrb.mxu1 %v2895_v58 }
 0xf70   :  { %1474 = vmatpush.msrb.mxu1 %v2897_v57 }
 0xf72   :  { %1475 = vmatpush.msrb.mxu1 %v2901_v59 }
 0xf74   :  { %1476 = vmatpush.msrb.mxu1 %v2907_v60  ;;  %v2941_v7 = vpop.permute.xlu1 %1272 }
 0xf75   :  { %2070 = vmatmul.msk.f32.vlgmr.msra.gmra.mxu1 %vm456_vm5, %v2929_v63 }
 0xf76   :  { %1776 = vmatpush.msra.mxu1 %v2895_v58 }
 0xf78   :  { %1777 = vmatpush.msra.mxu1 %v2897_v57 }
 0xf7a   :  { %1778 = vmatpush.msra.mxu1 %v2901_v59 }
 0xf7c   :  { %1779 = vmatpush.msra.mxu1 %v2907_v60 }
 0xfea   :  { %v961_v45 = vpop.f32.mrf.mxu1 }
 0xfeb   :  { %v987_v0 = vadd.f32 %v961_v45, %v2750_v24  ;;  %v965_v12 = vrot.slane %v961_v45, 6 }
 0xfed   :  { %v989_v4 = vrot.slane %v987_v0, 6  ;;  %v967_v16 = vadd.f32 %v965_v12, %v2884_v29 }
 0xfef   :  { %990 = vrot.lane.b32.xlu0 %v989_v4, %s2518_s17  ;;  %v2060_v18 = vmul.f32 -1.442695, %v967_v16 }
 0xff1   :  { %2153 = vpow2.f32 %v2060_v18 }
 0xff2   :  { %v1247_v10 = vpop.f32.mrf.mxu1 }
 0xff3   :  { %v1275_v11 = vadd.f32 %v2941_v7, %v1247_v10  ;;  %v1250_v19 = vadd.f32 %v1247_v10, %v2952_v17 }
 0xff5   :  { %1277 = vrot.lane.b32.xlu1 %v1275_v11, %s2518_s17  ;;  %v2071_v20 = vmul.f32 -1.442695, %v1250_v19 }
 0xff7   :  { %v2154_v21 = vpop.eup %2153  ;;  %2155 = vpow2.f32 %v2071_v20 }
 0xff8   :  { %v971_v22 = vadd.f32 1.0, %v2154_v21 }
 0xffa   :  { %2157 = vrcp.f32 %v971_v22  ;;  %v983_v8 = vand.u32 2147483648, %v971_v22  ;;  %vm977_vm0 = vweird.f32 %v971_v22  ;;  %v981_v27 = vand.u32 2147483647, %v971_v22 }
 0xffc   :  { %v984_v32 = vor.u32 1.1754944e-38, %v983_v8  ;;  %vm982_vm2 = vcmp.eq.f32.partialorder %v981_v27, 8.507059e+37 }
 0xffd   :  { %v2156_v23 = vpop.eup %2155 }
 0xffe   :  { %v1254_v2 = vadd.f32 1.0, %v2156_v23 }
0x1000   :  { %v2158_v25 = vpop.eup %2157  ;;  %2159 = vrcp.f32 %v1254_v2  ;;  %v1266_v36 = vand.u32 2147483648, %v1254_v2  ;;  %vm1260_vm4 = vweird.f32 %v1254_v2  ;;  %v1264_v39 = vand.u32 2147483647, %v1254_v2 }
0x1001   :  { %v973_v37 = vmul.f32 %v2158_v25, %v971_v22  ;;  %vm978_vm10 = vweird.f32 %v2158_v25 }
0x1002   :  { %vm979_vm15 = vmor %vm977_vm0, %vm978_vm10  ;;  %v1267_v42 = vor.u32 1.1754944e-38, %v1266_v36  ;;  %vm1265_vm12 = vcmp.eq.f32.partialorder %v1264_v39, 8.507059e+37 }
0x1003   :  { %v974_v5 = vsub.f32 1.0, %v973_v37 }
0x1005   :  { %v975_v15 = vmul.f32 %v2158_v25, %v974_v5 }
0x1006   :  { %v2160_v40 = vpop.eup %2159 }
0x1007   :  { %v1256_v26 = vmul.f32 %v2160_v40, %v1254_v2  ;;  %v976_v1 = vadd.f32 %v2158_v25, %v975_v15  ;;  %vm1261_vm11 = vweird.f32 %v2160_v40 }
0x1008   :  { %vm1262_vm9 = vmor %vm1260_vm4, %vm1261_vm11 }
0x1009   :  { %v1257_v47 = vsub.f32 1.0, %v1256_v26  ;;  %v980_v31 = vsel %vm979_vm15, %v2158_v25, %v976_v1 }
0x100a   :  { %v985_v35 = vsel %vm982_vm2, %v984_v32, %v980_v31 }
0x100b   :  { %v1258_v30 = vmul.f32 %v2160_v40, %v1257_v47 }
0x100d   :  { %v1259_v33 = vadd.f32 %v2160_v40, %v1258_v30 }
0x100f   :  { %v1263_v41 = vsel %vm1262_vm9, %v2160_v40, %v1259_v33 }
0x1010   :  { %v1268_v43 = vsel %vm1265_vm12, %v1267_v42, %v1263_v41 }
0x1061   :  { %v991_v34 = vpop.permute.xlu0 %990 }
0x1062   :  { %v993_v38 = vmul.f32 %v991_v34, %v985_v35 }
0x1064   :  { %995 = vrot.lane.b32.xlu2 %v993_v38, %s2518_s17 }
0x1067   :  { %v1278_v44 = vpop.permute.xlu1 %1277 }
0x1068   :  { %v1280_v46 = vmul.f32 %v1278_v44, %v1268_v43 }
0x106a   :  { %1282 = vrot.lane.b32.xlu1 %v1280_v46, %s2518_s17 }
0x10be   :  { %v996_v48 = vpop.permute.xlu2 %995 }
0x10bf   :  { %v998_v28 = vadd.f32 %v996_v48, %v2884_v29 }
0x10c1   :  { %2161 = vtanh.f32 %v998_v28 }
0x10c7   :  { %v2162_v49 = vpop.eup %2161 }
0x10c8   :  { %v1001_v50 = vrot.slane %v2162_v49, 2 }
0x10ca   :  { %v1003_v51 = vsub.f32 %v2891_v6, %v1001_v50 }
0x10cc   :  { %v1005_v3 = vrot.slane %v1003_v51, 6 }
0x10ce   :  { %1006 = vrot.lane.b32.xlu1 %v1005_v3, %s2520_s12 }
0x10dc   :  { %v1283_v52 = vpop.permute.xlu1 %1282 }
0x10dd   :  { %v1285_v53 = vadd.f32 %v1283_v52, %v2952_v17 }
0x10df   :  { %2163 = vtanh.f32 %v1285_v53 }
0x10e5   :  { %v2164_v54 = vpop.eup %2163 }
0x10e6   :  { %1288 = vrot.lane.b32.xlu0 %v2164_v54, %s2518_s17 }
0x1140   :  { %v1007_v55 = vpop.permute.xlu1 %1006 }
0x1141   :  { %v1009_v56 = vmul.f32 %v1007_v55, %v985_v35 }
0x1143   :  { %1011 = vrot.lane.b32.xlu0 %v1009_v56, %s2519_s20 }
0x1158   :  { %v1289_v61 = vpop.permute.xlu0 %1288 }
0x1159   :  { %v1291_v62 = vsub.f32 %v2929_v63, %v1289_v61 }
0x115b   :  { %1293 = vrot.lane.b32.xlu2 %v1291_v62, %s2519_s20 }
0x11b5   :  { %v1012_v45 = vpop.permute.xlu0 %1011  ;;  %v1294_v0 = vpop.permute.xlu2 %1293 }
0x11b6   :  { %v2965_v4 = vadd.f32 %v2162_v49, %v1012_v45  ;;  %v1296_v10 = vmul.f32 %v1294_v0, %v1268_v43 }
0x11b8   :  { %1298 = vrot.lane.b32.xlu1 %v1296_v10, %s2519_s20  ;;  %v1016_v11 = vrot.slane %v2965_v4, 2 }
0x11ba   :  { %1017 = vrot.lane.b32.xlu2 %v1016_v11, %s2518_s17 }
0x1214   :  { %v1018_v12 = vpop.permute.xlu2 %1017 }
0x1215   :  { %2061 = vmatmul.msk.f32.vlgmr.msrb.gmra.mxu2 %vm456_vm5, %v1018_v12 }
0x1216   :  { %1550 = vmatpush.msrb.mxu2 %v2895_v58 }
0x1218   :  { %1551 = vmatpush.msrb.mxu2 %v2897_v57 }
0x121a   :  { %1552 = vmatpush.msrb.mxu2 %v2901_v59 }
0x121c   :  { %1553 = vmatpush.msrb.mxu2 %v2907_v60 }
0x122a   :  { %v1299_v63 = vpop.permute.xlu1 %1298 }
0x122b   :  { %v2975_v16 = vadd.f32 %v2164_v54, %v1299_v63 }
0x122d   :  { %1303 = vrot.lane.b32.xlu0 %v2975_v16, %s2518_s17 }
0x1298   :  { %v1038_v9 = vpop.f32.mrf.mxu2 }
0x1299   :  { %v1064_v18 = vadd.f32 %v1038_v9, %v2750_v24  ;;  %v1042_v21 = vrot.slane %v1038_v9, 4 }
0x129b   :  { %v1066_v19 = vrot.slane %v1064_v18, 4  ;;  %v1044_v22 = vadd.f32 %v1042_v21, %v2884_v29 }
0x129d   :  { %1067 = vrot.lane.b32.xlu1 %v1066_v19, %s2518_s17  ;;  %v2062_v23 = vmul.f32 -1.442695, %v1044_v22 }
0x129f   :  { %v1304_v20 = vpop.permute.xlu0 %1303  ;;  %2165 = vpow2.f32 %v2062_v23 }
0x12a0   :  { %2072 = vmatmul.msk.f32.vlgmr.msra.gmra.mxu2 %vm456_vm5, %v1304_v20 }
0x12a5   :  { %v2166_v2 = vpop.eup %2165 }
0x12a6   :  { %v1048_v25 = vadd.f32 1.0, %v2166_v2 }
0x12a8   :  { %2167 = vrcp.f32 %v1048_v25  ;;  %v1060_v47 = vand.u32 2147483648, %v1048_v25  ;;  %vm1054_vm14 = vweird.f32 %v1048_v25  ;;  %v1058_v1 = vand.u32 2147483647, %v1048_v25 }
0x12aa   :  { %v1061_v27 = vor.u32 1.1754944e-38, %v1060_v47  ;;  %vm1059_vm8 = vcmp.eq.f32.partialorder %v1058_v1, 8.507059e+37 }
0x12ae   :  { %v2168_v37 = vpop.eup %2167 }
0x12af   :  { %v1050_v40 = vmul.f32 %v2168_v37, %v1048_v25  ;;  %vm1055_vm13 = vweird.f32 %v2168_v37 }
0x12b0   :  { %vm1056_vm6 = vmor %vm1054_vm14, %vm1055_vm13 }
0x12b1   :  { %v1051_v5 = vsub.f32 1.0, %v1050_v40 }
0x12b3   :  { %v1052_v26 = vmul.f32 %v2168_v37, %v1051_v5 }
0x12b5   :  { %v1053_v15 = vadd.f32 %v2168_v37, %v1052_v26 }
0x12b7   :  { %v1057_v8 = vsel %vm1056_vm6, %v2168_v37, %v1053_v15 }
0x12b8   :  { %v1062_v31 = vsel %vm1059_vm8, %v1061_v27, %v1057_v8 }
0x130f   :  { %v1068_v30 = vpop.permute.xlu1 %1067 }
0x1310   :  { %v1070_v32 = vmul.f32 %v1068_v30, %v1062_v31 }
0x1312   :  { %1072 = vrot.lane.b32.xlu0 %v1070_v32, %s2518_s17 }
0x1323   :  { %v1324_v33 = vpop.f32.mrf.mxu2 }
0x1324   :  { %v1350_v34 = vadd.f32 %v1324_v33, %v2941_v7  ;;  %v1328_v36 = vrot.slane %v1324_v33, 6 }
0x1326   :  { %v1352_v35 = vrot.slane %v1350_v34, 6  ;;  %v1330_v38 = vadd.f32 %v1328_v36, %v2952_v17 }
0x1328   :  { %1353 = vrot.lane.b32.xlu2 %v1352_v35, %s2518_s17  ;;  %v2073_v39 = vmul.f32 -1.442695, %v1330_v38 }
0x132a   :  { %2169 = vpow2.f32 %v2073_v39 }
0x1330   :  { %v2170_v41 = vpop.eup %2169 }
0x1331   :  { %v1334_v42 = vadd.f32 1.0, %v2170_v41 }
0x1333   :  { %2171 = vrcp.f32 %v1334_v42  ;;  %v1346_v49 = vand.u32 2147483648, %v1334_v42  ;;  %vm1340_vm0 = vweird.f32 %v1334_v42  ;;  %v1344_v50 = vand.u32 2147483647, %v1334_v42 }
0x1335   :  { %v1347_v3 = vor.u32 1.1754944e-38, %v1346_v49  ;;  %vm1345_vm2 = vcmp.eq.f32.partialorder %v1344_v50, 8.507059e+37 }
0x1339   :  { %v2172_v44 = vpop.eup %2171 }
0x133a   :  { %v1336_v43 = vmul.f32 %v2172_v44, %v1334_v42  ;;  %vm1341_vm10 = vweird.f32 %v2172_v44 }
0x133b   :  { %vm1342_vm15 = vmor %vm1340_vm0, %vm1341_vm10 }
0x133c   :  { %v1337_v46 = vsub.f32 1.0, %v1336_v43 }
0x133e   :  { %v1338_v48 = vmul.f32 %v2172_v44, %v1337_v46 }
0x1340   :  { %v1339_v28 = vadd.f32 %v2172_v44, %v1338_v48 }
0x1342   :  { %v1343_v51 = vsel %vm1342_vm15, %v2172_v44, %v1339_v28 }
0x1343   :  { %v1348_v53 = vsel %vm1345_vm2, %v1347_v3, %v1343_v51 }
0x1382   :  { %v1354_v52 = vpop.permute.xlu2 %1353 }
0x1383   :  { %v1356_v54 = vmul.f32 %v1354_v52, %v1348_v53 }
0x1384   :  { %v1073_v55 = vpop.permute.xlu0 %1072 }
0x1385   :  { %v1075_v56 = vadd.f32 %v1073_v55, %v2884_v29  ;;  %1358 = vrot.lane.b32.xlu1 %v1356_v54, %s2518_s17 }
0x1387   :  { %2173 = vtanh.f32 %v1075_v56 }
0x138d   :  { %v2174_v61 = vpop.eup %2173 }
0x138e   :  { %v1078_v62 = vrot.slane %v2174_v61, 2 }
0x1390   :  { %v1080_v45 = vsub.f32 %v2965_v4, %v1078_v62 }
0x1392   :  { %v1082_v0 = vrot.slane %v1080_v45, 6 }
0x1394   :  { %1083 = vrot.lane.b32.xlu2 %v1082_v0, %s2520_s12 }
0x13ee   :  { %v1084_v10 = vpop.permute.xlu2 %1083 }
0x13ef   :  { %v1086_v11 = vmul.f32 %v1084_v10, %v1062_v31 }
0x13f1   :  { %1088 = vrot.lane.b32.xlu1 %v1086_v11, %s2519_s20 }
0x13f7   :  { %v1359_v12 = vpop.permute.xlu1 %1358 }
0x13f8   :  { %v1361_v63 = vadd.f32 %v1359_v12, %v2952_v17 }
0x13fa   :  { %2175 = vtanh.f32 %v1361_v63 }
0x1400   :  { %v2176_v9 = vpop.eup %2175 }
0x1401   :  { %v1364_v18 = vrot.slane %v2176_v9, 2 }
0x1403   :  { %v1366_v19 = vsub.f32 %v2975_v16, %v1364_v18 }
0x1405   :  { %v1368_v20 = vrot.slane %v1366_v19, 6 }
0x1407   :  { %1369 = vrot.lane.b32.xlu0 %v1368_v20, %s2520_s12 }
0x1463   :  { %v1089_v21 = vpop.permute.xlu1 %1088 }
0x1464   :  { %v2995_v22 = vadd.f32 %v2174_v61, %v1089_v21 }
0x1466   :  { %v1093_v23 = vrot.slane %v2995_v22, 4 }
0x1468   :  { %1094 = vrot.lane.b32.xlu0 %v1093_v23, %s2518_s17 }
0x1479   :  { %v1370_v2 = vpop.permute.xlu0 %1369 }
0x147a   :  { %v1372_v25 = vmul.f32 %v1370_v2, %v1348_v53 }
0x147c   :  { %1374 = vrot.lane.b32.xlu2 %v1372_v25, %s2519_s20 }
0x14d6   :  { %v1375_v37 = vpop.permute.xlu2 %1374 }
0x14d7   :  { %v3000_v40 = vadd.f32 %v2176_v9, %v1375_v37 }
0x14d9   :  { %v1379_v5 = vrot.slane %v3000_v40, 2 }
0x14da   :  { %v1095_v26 = vpop.permute.xlu0 %1094 }
0x14db   :  { %1380 = vrot.lane.b32.xlu1 %v1379_v5, %s2518_s17  ;;  %2063 = vmatmul.msk.f32.vlgmr.msrb.gmra.mxu3 %vm456_vm5, %v1095_v26 }
0x14dc   :  { %1622 = vmatpush.msrb.mxu3 %v2895_v58 }
0x14de   :  { %1623 = vmatpush.msrb.mxu3 %v2897_v57 }
0x14e0   :  { %1624 = vmatpush.msrb.mxu3 %v2901_v59 }
0x14e2   :  { %1625 = vmatpush.msrb.mxu3 %v2907_v60 }
0x154d   :  { %v1381_v15 = vpop.permute.xlu1 %1380 }
0x154e   :  { %2074 = vmatmul.msk.f32.vlgmr.msra.gmra.mxu3 %vm456_vm5, %v1381_v15 }
0x155e   :  { %v1115_v47 = vpop.f32.mrf.mxu3 }
0x155f   :  { %v1141_v53 = vadd.f32 %v1115_v47, %v2750_v24  ;;  %v1119_v45 = vrot.slane %v1115_v47, 2 }
0x1561   :  { %v1143_v54 = vrot.slane %v1141_v53, 2  ;;  %v1121_v0 = vadd.f32 %v1119_v45, %v2884_v29 }
0x1563   :  { %v2064_v10 = vmul.f32 -1.442695, %v1121_v0 }
0x15d1   :  { %v1401_v1 = vpop.f32.mrf.mxu3 }
0x15d2   :  { %v1427_v8 = vadd.f32 %v1401_v1, %v2941_v7  ;;  %v1405_v30 = vrot.slane %v1401_v1, 4 }
0x15d4   :  { %v1429_v27 = vrot.slane %v1427_v8, 4  ;;  %v1407_v31 = vadd.f32 %v1405_v30, %v2952_v17 }
0x15d6   :  { %1430 = vrot.lane.b32.xlu2 %v1429_v27, %s2518_s17  ;;  %v2075_v58 = vmul.f32 -1.442695, %v1407_v31 }
0x15d8   :  { %2177 = vpow2.f32 %v2075_v58 }
0x15de   :  { %v2178_v57 = vpop.eup %2177 }
0x15df   :  { %v1411_v32 = vadd.f32 1.0, %v2178_v57 }
0x15e1   :  { %2179 = vrcp.f32 %v1411_v32  ;;  %v1423_v36 = vand.u32 2147483648, %v1411_v32  ;;  %vm1417_vm4 = vweird.f32 %v1411_v32  ;;  %v1421_v38 = vand.u32 2147483647, %v1411_v32 }
0x15e3   :  { %v1424_v41 = vor.u32 1.1754944e-38, %v1423_v36  ;;  %vm1422_vm12 = vcmp.eq.f32.partialorder %v1421_v38, 8.507059e+37 }
0x15e7   :  { %v2180_v59 = vpop.eup %2179 }
0x15e8   :  { %v1413_v60 = vmul.f32 %v2180_v59, %v1411_v32  ;;  %vm1418_vm11 = vweird.f32 %v2180_v59 }
0x15e9   :  { %vm1419_vm9 = vmor %vm1417_vm4, %vm1418_vm11 }
0x15ea   :  { %v1414_v33 = vsub.f32 1.0, %v1413_v60 }
0x15ec   :  { %v1415_v34 = vmul.f32 %v2180_v59, %v1414_v33 }
0x15ee   :  { %v1416_v35 = vadd.f32 %v2180_v59, %v1415_v34 }
0x15f0   :  { %v1420_v39 = vsel %vm1419_vm9, %v2180_v59, %v1416_v35 }
0x15f1   :  { %v1425_v44 = vsel %vm1422_vm12, %v1424_v41, %v1420_v39 }
0x1630   :  { %v1431_v42 = vpop.permute.xlu2 %1430 }
0x1631   :  { %v1433_v43 = vmul.f32 %v1431_v42, %v1425_v44 }
0x1633   :  { %1435 = vrot.lane.b32.xlu0 %v1433_v43, %s2518_s17 }
0x16a5   :  { %v1436_v46 = vpop.permute.xlu0 %1435 }
0x16a6   :  { %v1438_v48 = vadd.f32 %v1436_v46, %v2952_v17 }
0x16a8   :  { %2181 = vtanh.f32 %v1438_v48 }
0x16a9   :  { %2183 = vpow2.f32 %v2064_v10 }
0x16ae   :  { %v2182_v28 = vpop.eup %2181 }
0x16af   :  { %v1441_v49 = vrot.slane %v2182_v28, 2  ;;  %v2184_v11 = vpop.eup %2183 }
0x16b0   :  { %v1125_v24 = vadd.f32 1.0, %v2184_v11 }
0x16b1   :  { %v1443_v50 = vsub.f32 %v3000_v40, %v1441_v49 }
0x16b2   :  { %2185 = vrcp.f32 %v1125_v24  ;;  %v1137_v2 = vand.u32 2147483648, %v1125_v24  ;;  %vm1131_vm14 = vweird.f32 %v1125_v24  ;;  %v1135_v25 = vand.u32 2147483647, %v1125_v24 }
0x16b3   :  { %v1445_v51 = vrot.slane %v1443_v50, 6 }
0x16b4   :  { %v1138_v26 = vor.u32 1.1754944e-38, %v1137_v2  ;;  %vm1136_vm8 = vcmp.eq.f32.partialorder %v1135_v25, 8.507059e+37 }
0x16b5   :  { %1446 = vrot.lane.b32.xlu1 %v1445_v51, %s2520_s12 }
0x16b8   :  { %v2186_v12 = vpop.eup %2185 }
0x16b9   :  { %v1127_v63 = vmul.f32 %v2186_v12, %v1125_v24  ;;  %vm1132_vm13 = vweird.f32 %v2186_v12 }
0x16ba   :  { %vm1133_vm6 = vmor %vm1131_vm14, %vm1132_vm13 }
0x16bb   :  { %v1128_v9 = vsub.f32 1.0, %v1127_v63 }
0x16bd   :  { %v1129_v18 = vmul.f32 %v2186_v12, %v1128_v9 }
0x16bf   :  { %v1130_v21 = vadd.f32 %v2186_v12, %v1129_v18 }
0x16c1   :  { %v1134_v37 = vsel %vm1133_vm6, %v2186_v12, %v1130_v21 }
0x16c2   :  { %v1139_v15 = vsel %vm1136_vm8, %v1138_v26, %v1134_v37 }
0x1727   :  { %v1447_v3 = vpop.permute.xlu1 %1446 }
0x1728   :  { %v1449_v52 = vmul.f32 %v1447_v3, %v1425_v44 }
0x172a   :  { %1451 = vrot.lane.b32.xlu2 %v1449_v52, %s2519_s20 }
0x1732   :  { %1144 = vrot.lane.b32.xlu2 %v1143_v54, %s2518_s17 }
0x1784   :  { %v1452_v55 = vpop.permute.xlu2 %1451 }
0x1785   :  { %v3020_v56 = vadd.f32 %v2182_v28, %v1452_v55 }
0x1787   :  { %v1456_v61 = vrot.slane %v3020_v56, 4 }
0x1789   :  { %1457 = vrot.lane.b32.xlu0 %v1456_v61, %s2518_s17 }
0x178c   :  { %v1145_v5 = vpop.permute.xlu2 %1144 }
0x178d   :  { %v1147_v47 = vmul.f32 %v1145_v5, %v1139_v15 }
0x17fb   :  { %v1458_v62 = vpop.permute.xlu0 %1457 }
0x17fc   :  { %2076 = vmatmul.msk.f32.vlgmr.msrb.gmra.mxu1 %vm456_vm5, %v1458_v62 }
0x1879   :  { %v1478_v19 = vpop.f32.mrf.mxu1 }
0x187a   :  { %v1504_v20 = vadd.f32 %v1478_v19, %v2941_v7  ;;  %v1482_v1 = vrot.slane %v1478_v19, 2 }
0x187c   :  { %v1506_v23 = vrot.slane %v1504_v20, 2  ;;  %v1484_v8 = vadd.f32 %v1482_v1, %v2952_v17 }
0x187e   :  { %1507 = vrot.lane.b32.xlu1 %v1506_v23, %s2518_s17  ;;  %v2077_v27 = vmul.f32 -1.442695, %v1484_v8 }
0x1880   :  { %2187 = vpow2.f32 %v2077_v27 }
0x1886   :  { %1149 = vrot.lane.b32.xlu1 %v1147_v47, %s2518_s17  ;;  %v2188_v30 = vpop.eup %2187 }
0x1887   :  { %v1488_v31 = vadd.f32 1.0, %v2188_v30 }
0x1889   :  { %2189 = vrcp.f32 %v1488_v31  ;;  %v1500_v33 = vand.u32 2147483648, %v1488_v31  ;;  %vm1494_vm0 = vweird.f32 %v1488_v31  ;;  %v1498_v34 = vand.u32 2147483647, %v1488_v31 }
0x188b   :  { %v1501_v36 = vor.u32 1.1754944e-38, %v1500_v33  ;;  %vm1499_vm2 = vcmp.eq.f32.partialorder %v1498_v34, 8.507059e+37 }
0x188f   :  { %v2190_v58 = vpop.eup %2189 }
0x1890   :  { %v1490_v57 = vmul.f32 %v2190_v58, %v1488_v31  ;;  %vm1495_vm10 = vweird.f32 %v2190_v58 }
0x1891   :  { %vm1496_vm15 = vmor %vm1494_vm0, %vm1495_vm10 }
0x1892   :  { %v1491_v32 = vsub.f32 1.0, %v1490_v57 }
0x1894   :  { %v1492_v59 = vmul.f32 %v2190_v58, %v1491_v32 }
0x1896   :  { %v1493_v60 = vadd.f32 %v2190_v58, %v1492_v59 }
0x1898   :  { %v1497_v35 = vsel %vm1496_vm15, %v2190_v58, %v1493_v60 }
0x1899   :  { %v1502_v39 = vsel %vm1499_vm2, %v1501_v36, %v1497_v35 }
0x18f0   :  { %v1508_v38 = vpop.permute.xlu1 %1507 }
0x18f1   :  { %v1510_v41 = vmul.f32 %v1508_v38, %v1502_v39 }
0x18f3   :  { %1512 = vrot.lane.b32.xlu0 %v1510_v41, %s2518_s17 }
0x18f8   :  { %v1150_v42 = vpop.permute.xlu1 %1149 }
0x18f9   :  { %v1152_v44 = vadd.f32 %v1150_v42, %v2884_v29 }
0x18fb   :  { %2191 = vtanh.f32 %v1152_v44 }
0x1901   :  { %v2192_v43 = vpop.eup %2191 }
0x1902   :  { %v1155_v46 = vrot.slane %v2192_v43, 2 }
0x1904   :  { %v1157_v48 = vsub.f32 %v2995_v22, %v1155_v46 }
0x1906   :  { %v1159_v28 = vrot.slane %v1157_v48, 6 }
0x1908   :  { %1160 = vrot.lane.b32.xlu0 %v1159_v28, %s2520_s12 }
0x1965   :  { %v1513_v49 = vpop.permute.xlu0 %1512 }
0x1966   :  { %v1515_v50 = vadd.f32 %v1513_v49, %v2952_v17  ;;  %v1172_v17 = vsel %vm292_vm1, %v2891_v6, %v2965_v4 }
0x1967   :  { %v1173_v0 = vsel %vm296_vm3, %v1172_v17, %v2995_v22 }
0x1968   :  { %2193 = vtanh.f32 %v1515_v50 }
0x196e   :  { %v2194_v51 = vpop.eup %2193 }
0x196f   :  { %v1518_v3 = vrot.slane %v2194_v51, 2 }
0x1971   :  { %v1520_v52 = vsub.f32 %v3020_v56, %v1518_v3 }
0x1973   :  { %v1522_v53 = vrot.slane %v1520_v52, 6 }
0x1975   :  { %1523 = vrot.lane.b32.xlu2 %v1522_v53, %s2520_s12 }
0x197a   :  { %v1161_v29 = vpop.permute.xlu0 %1160 }
0x197b   :  { %v1163_v54 = vmul.f32 %v1161_v29, %v1139_v15 }
0x197d   :  { %1165 = vrot.lane.b32.xlu2 %v1163_v54, %s2519_s20 }
0x19cf   :  { %v1524_v55 = vpop.permute.xlu2 %1523 }
0x19d0   :  { %v1526_v61 = vmul.f32 %v1524_v55, %v1502_v39 }
0x19d2   :  { %1528 = vrot.lane.b32.xlu1 %v1526_v61, %s2519_s20 }
0x19d7   :  { %v1166_v62 = vpop.permute.xlu2 %1165 }
0x19d8   :  { %v3042_v45 = vadd.f32 %v2192_v43, %v1166_v62 }
0x19da   :  { %v1174_v10 = vsel %vm300_vm7, %v1173_v0, %v3042_v45 }
0x19db   :  { %1189 = vrot.lane.b32.xlu1 %v1174_v10, %s2518_s17 }
0x1a44   :  { %v1529_v11 = vpop.permute.xlu1 %1528 }
0x1a45   :  { %v3049_v24 = vadd.f32 %v2194_v51, %v1529_v11 }
0x1a47   :  { %v1533_v12 = vrot.slane %v3049_v24, 6 }
0x1a49   :  { %1534 = vrot.lane.b32.xlu0 %v1533_v12, %s2518_s17 }
0x1a4d   :  { %v1190_v63 = vpop.permute.xlu1 %1189 }
0x1a4e   :  { %2067 = vmatmul.msk.f32.gmra.mxu0 %vm456_vm5, %v1190_v63 }
0x1abb   :  { %v1535_v6 = vpop.permute.xlu0 %1534 }
0x1abc   :  { %2078 = vmatmul.msk.f32.vlgmr.msrb.gmra.mxu2 %vm456_vm5, %v1535_v6 }
0x1acb   :  { %v1215_v9 = vpop.f32.mrf.mxu0 }
0x1acc   :  { %v3058_v18 = vadd.f32 %v2948_v13, %v1215_v9 }
0x1b3f   :  { %v1555_v4 = vpop.f32.mrf.mxu2 }
0x1b40   :  { %v1578_v22 = vadd.f32 %v1555_v4, %v2941_v7  ;;  %v1558_v19 = vadd.f32 %v1555_v4, %v3058_v18 }
0x1b42   :  { %1580 = vrot.lane.b32.xlu2 %v1578_v22, %s2518_s17  ;;  %v2079_v20 = vmul.f32 -1.442695, %v1558_v19 }
0x1b44   :  { %2195 = vpow2.f32 %v2079_v20 }
0x1b4a   :  { %v2196_v21 = vpop.eup %2195 }
0x1b4b   :  { %v1562_v23 = vadd.f32 1.0, %v2196_v21 }
0x1b4d   :  { %2197 = vrcp.f32 %v1562_v23  ;;  %v1574_v15 = vand.u32 2147483648, %v1562_v23  ;;  %vm1568_vm4 = vweird.f32 %v1562_v23  ;;  %v1572_v47 = vand.u32 2147483647, %v1562_v23 }
0x1b4f   :  { %v1575_v13 = vor.u32 1.1754944e-38, %v1574_v15  ;;  %vm1573_vm12 = vcmp.eq.f32.partialorder %v1572_v47, 8.507059e+37 }
0x1b53   :  { %v2198_v2 = vpop.eup %2197 }
0x1b54   :  { %v1564_v25 = vmul.f32 %v2198_v2, %v1562_v23  ;;  %vm1569_vm11 = vweird.f32 %v2198_v2 }
0x1b55   :  { %vm1570_vm9 = vmor %vm1568_vm4, %vm1569_vm11 }
0x1b56   :  { %v1565_v37 = vsub.f32 1.0, %v1564_v25 }
0x1b58   :  { %v1566_v5 = vmul.f32 %v2198_v2, %v1565_v37 }
0x1b5a   :  { %v1567_v26 = vadd.f32 %v2198_v2, %v1566_v5 }
0x1b5c   :  { %v1571_v1 = vsel %vm1570_vm9, %v2198_v2, %v1567_v26 }
0x1b5d   :  { %v1576_v27 = vsel %vm1573_vm12, %v1575_v13, %v1571_v1 }
0x1b9c   :  { %v1581_v8 = vpop.permute.xlu2 %1580 }
0x1b9d   :  { %v1583_v30 = vmul.f32 %v1581_v8, %v1576_v27 }
0x1b9f   :  { %1585 = vrot.lane.b32.xlu0 %v1583_v30, %s2518_s17 }
0x1c11   :  { %v1586_v31 = vpop.permute.xlu0 %1585 }
0x1c12   :  { %v1588_v58 = vadd.f32 %v1586_v31, %v3058_v18 }
0x1c14   :  { %2199 = vtanh.f32 %v1588_v58 }
0x1c1a   :  { %v2200_v57 = vpop.eup %2199 }
0x1c1b   :  { %v1591_v32 = vrot.slane %v2200_v57, 2 }
0x1c1d   :  { %v1593_v59 = vsub.f32 %v3049_v24, %v1591_v32 }
0x1c1f   :  { %v1595_v60 = vrot.slane %v1593_v59, 6 }
0x1c21   :  { %1596 = vrot.lane.b32.xlu1 %v1595_v60, %s2520_s12 }
0x1c93   :  { %v1597_v33 = vpop.permute.xlu1 %1596 }
0x1c94   :  { %v1599_v34 = vmul.f32 %v1597_v33, %v1576_v27 }
0x1c96   :  { %1601 = vrot.lane.b32.xlu2 %v1599_v34, %s2519_s20 }
0x1cf0   :  { %v1602_v35 = vpop.permute.xlu2 %1601 }
0x1cf1   :  { %v3066_v36 = vadd.f32 %v2200_v57, %v1602_v35 }
0x1cf3   :  { %1606 = vrot.lane.b32.xlu0 %v3066_v36, %s2518_s17 }
0x1d65   :  { %v1607_v38 = vpop.permute.xlu0 %1606 }
0x1d66   :  { %2080 = vmatmul.msk.f32.vlgmr.msrb.gmra.mxu3 %vm456_vm5, %v1607_v38 }
0x1de9   :  { %v1627_v39 = vpop.f32.mrf.mxu3 }
0x1dea   :  { %v1653_v41 = vadd.f32 %v1627_v39, %v2941_v7  ;;  %v1631_v44 = vrot.slane %v1627_v39, 6 }
0x1dec   :  { %v1655_v42 = vrot.slane %v1653_v41, 6  ;;  %v1633_v43 = vadd.f32 %v1631_v44, %v3058_v18 }
0x1dee   :  { %1656 = vrot.lane.b32.xlu1 %v1655_v42, %s2518_s17  ;;  %v2081_v46 = vmul.f32 -1.442695, %v1633_v43 }
0x1df0   :  { %2201 = vpow2.f32 %v2081_v46 }
0x1df6   :  { %v2202_v48 = vpop.eup %2201 }
0x1df7   :  { %v1637_v28 = vadd.f32 1.0, %v2202_v48 }
0x1df9   :  { %2203 = vrcp.f32 %v1637_v28  ;;  %v1649_v53 = vand.u32 2147483648, %v1637_v28  ;;  %vm1643_vm14 = vweird.f32 %v1637_v28  ;;  %v1647_v29 = vand.u32 2147483647, %v1637_v28 }
0x1dfb   :  { %v1650_v55 = vor.u32 1.1754944e-38, %v1649_v53  ;;  %vm1648_vm8 = vcmp.eq.f32.partialorder %v1647_v29, 8.507059e+37 }
0x1dff   :  { %v2204_v49 = vpop.eup %2203 }
0x1e00   :  { %v1639_v50 = vmul.f32 %v2204_v49, %v1637_v28  ;;  %vm1644_vm13 = vweird.f32 %v2204_v49 }
0x1e01   :  { %vm1645_vm6 = vmor %vm1643_vm14, %vm1644_vm13  ;;  %vm1962_vm13 = vcmask 261126  }
0x1e02   :  { %v1640_v51 = vsub.f32 1.0, %v1639_v50 }
0x1e04   :  { %v1641_v3 = vmul.f32 %v2204_v49, %v1640_v51 }
0x1e06   :  { %v1642_v52 = vadd.f32 %v2204_v49, %v1641_v3 }
0x1e08   :  { %v1646_v54 = vsel %vm1645_vm6, %v2204_v49, %v1642_v52 }
0x1e09   :  { %v1651_v62 = vsel %vm1648_vm8, %v1650_v55, %v1646_v54 }
0x1e60   :  { %v1657_v61 = vpop.permute.xlu1 %1656 }
0x1e61   :  { %v1659_v17 = vmul.f32 %v1657_v61, %v1651_v62 }
0x1e63   :  { %1661 = vrot.lane.b32.xlu2 %v1659_v17, %s2518_s17 }
0x1ebd   :  { %v1662_v0 = vpop.permute.xlu2 %1661 }
0x1ebe   :  { %v1664_v10 = vadd.f32 %v1662_v0, %v3058_v18 }
0x1ec0   :  { %2205 = vtanh.f32 %v1664_v10 }
0x1ec6   :  { %v2206_v11 = vpop.eup %2205 }
0x1ec7   :  { %v1667_v12 = vrot.slane %v2206_v11, 2 }
0x1ec9   :  { %v1669_v63 = vsub.f32 %v3066_v36, %v1667_v12 }
0x1ecb   :  { %v1671_v6 = vrot.slane %v1669_v63, 6 }
0x1ecd   :  { %1672 = vrot.lane.b32.xlu0 %v1671_v6, %s2520_s12 }
0x1f3f   :  { %v1673_v4 = vpop.permute.xlu0 %1672 }
0x1f40   :  { %v1675_v22 = vmul.f32 %v1673_v4, %v1651_v62 }
0x1f42   :  { %1677 = vrot.lane.b32.xlu1 %v1675_v22, %s2519_s20 }
0x1fb4   :  { %v1678_v9 = vpop.permute.xlu1 %1677 }
0x1fb5   :  { %v3079_v19 = vadd.f32 %v2206_v11, %v1678_v9  ;;  %v1835_v9 = vsel %vm292_vm1, %v2975_v16, %v3000_v40 }
0x1fb7   :  { %v1682_v20 = vrot.slane %v3079_v19, 2 }
0x1fb9   :  { %1683 = vrot.lane.b32.xlu2 %v1682_v20, %s2518_s17  ;;  %v1836_v20 = vsel %vm296_vm3, %v1835_v9, %v3020_v56 }
0x2013   :  { %v1684_v21 = vpop.permute.xlu2 %1683 }
0x2014   :  { %2082 = vmatmul.msk.f32.vlgmr.msrb.gmra.mxu0 %vm456_vm5, %v1684_v21  ;;  %v1837_v21 = vsel %vm300_vm7, %v1836_v20, %v3049_v24 }
0x2091   :  { %v1704_v23 = vpop.f32.mrf.mxu0 }
0x2092   :  { %v1730_v2 = vadd.f32 %v1704_v23, %v2941_v7  ;;  %v1708_v37 = vrot.slane %v1704_v23, 4  ;;  %v1841_v23 = vmax.f32 %v1837_v21, 0.0 }
0x2094   :  { %v1732_v25 = vrot.slane %v1730_v2, 4  ;;  %v1710_v5 = vadd.f32 %v1708_v37, %v3058_v18 }
0x2096   :  { %1733 = vrot.lane.b32.xlu0 %v1732_v25, %s2518_s17  ;;  %v2083_v26 = vmul.f32 -1.442695, %v1710_v5 }
0x2098   :  { %2207 = vpow2.f32 %v2083_v26 }
0x209e   :  { %v2208_v15 = vpop.eup %2207 }
0x209f   :  { %v1714_v47 = vadd.f32 1.0, %v2208_v15 }
0x20a1   :  { %2209 = vrcp.f32 %v1714_v47  ;;  %v1726_v31 = vand.u32 2147483648, %v1714_v47  ;;  %vm1720_vm0 = vweird.f32 %v1714_v47  ;;  %v1724_v58 = vand.u32 2147483647, %v1714_v47 }
0x20a3   :  { %v1727_v32 = vor.u32 1.1754944e-38, %v1726_v31  ;;  %vm1725_vm2 = vcmp.eq.f32.partialorder %v1724_v58, 8.507059e+37 }
0x20a7   :  { %v2210_v1 = vpop.eup %2209 }
0x20a8   :  { %v1716_v13 = vmul.f32 %v2210_v1, %v1714_v47  ;;  %vm1721_vm10 = vweird.f32 %v2210_v1 }
0x20a9   :  { %vm1722_vm15 = vmor %vm1720_vm0, %vm1721_vm10 }
0x20aa   :  { %v1717_v8 = vsub.f32 1.0, %v1716_v13 }
0x20ac   :  { %v1718_v27 = vmul.f32 %v2210_v1, %v1717_v8 }
0x20ae   :  { %v1719_v30 = vadd.f32 %v2210_v1, %v1718_v27 }
0x20b0   :  { %v1723_v57 = vsel %vm1722_vm15, %v2210_v1, %v1719_v30 }
0x20b1   :  { %v1728_v60 = vsel %vm1725_vm2, %v1727_v32, %v1723_v57 }
0x2108   :  { %v1734_v59 = vpop.permute.xlu0 %1733 }
0x2109   :  { %v1736_v33 = vmul.f32 %v1734_v59, %v1728_v60 }
0x210b   :  { %1738 = vrot.lane.b32.xlu1 %v1736_v33, %s2518_s17 }
0x217d   :  { %v1739_v34 = vpop.permute.xlu1 %1738 }
0x217e   :  { %v1741_v35 = vadd.f32 %v1739_v34, %v3058_v18  ;;  %v2115_v34 = vld [vmem:[#allocation17] ss:$0 sm:$0xff] }
0x2180   :  { %2211 = vtanh.f32 %v1741_v35 }
0x2186   :  { %v2212_v38 = vpop.eup %2211 }
0x2187   :  { %v1744_v39 = vrot.slane %v2212_v38, 2 }
0x2189   :  { %v1746_v41 = vsub.f32 %v3079_v19, %v1744_v39 }
0x218b   :  { %v1748_v42 = vrot.slane %v1746_v41, 6 }
0x218d   :  { %1749 = vrot.lane.b32.xlu2 %v1748_v42, %s2520_s12  ;;  %v2116_v42 = vld [vmem:[#allocation18] ss:$0 sm:$0xff] }
0x21e7   :  { %v1750_v44 = vpop.permute.xlu2 %1749 }
0x21e8   :  { %v1752_v43 = vmul.f32 %v1750_v44, %v1728_v60 }
0x21ea   :  { %1754 = vrot.lane.b32.xlu0 %v1752_v43, %s2519_s20 }
0x225c   :  { %v1755_v46 = vpop.permute.xlu0 %1754 }
0x225d   :  { %v1757_v48 = vadd.f32 %v2212_v38, %v1755_v46 }
0x225f   :  { %v1759_v28 = vrot.slane %v1757_v48, 4 }
0x2261   :  { %1760 = vrot.lane.b32.xlu1 %v1759_v28, %s2518_s17 }
0x22d3   :  { %v1761_v49 = vpop.permute.xlu1 %1760 }
0x22d4   :  { %2084 = vmatmul.msk.f32.vlgmr.msra.gmra.mxu1 %vm456_vm5, %v1761_v49 }
0x2351   :  { %v1781_v50 = vpop.f32.mrf.mxu1 }
0x2352   :  { %v1807_v51 = vadd.f32 %v1781_v50, %v2941_v7  ;;  %v1785_v52 = vrot.slane %v1781_v50, 2 }
0x2354   :  { %v1809_v3 = vrot.slane %v1807_v51, 2  ;;  %v1787_v53 = vadd.f32 %v1785_v52, %v3058_v18  ;;  %v1922_v52 = vld [vmem:[#allocation20 + $0x18] sm:$0xff] }
0x2355   :  { %1945 = vmatpush.msra.mxu2 %v1922_v52 }
0x2356   :  { %1810 = vrot.lane.b32.xlu2 %v1809_v3, %s2518_s17  ;;  %v2085_v29 = vmul.f32 -1.442695, %v1787_v53  ;;  %v1921_v53 = vld [vmem:[#allocation20 + $0x10] sm:$0xff] }
0x2357   :  { %1946 = vmatpush.msra.mxu2 %v1921_v53 }
0x2358   :  { %2213 = vpow2.f32 %v2085_v29  ;;  %v1920_v29 = vld [vmem:[#allocation20 + $0x8] sm:$0xff] }
0x2359   :  { %1947 = vmatpush.msra.mxu2 %v1920_v29 }
0x235e   :  { %v2214_v54 = vpop.eup %2213 }
0x235f   :  { %v1791_v55 = vadd.f32 1.0, %v2214_v54 }
0x2361   :  { %2215 = vrcp.f32 %v1791_v55  ;;  %v1803_v11 = vand.u32 2147483648, %v1791_v55  ;;  %vm1797_vm4 = vweird.f32 %v1791_v55  ;;  %v1801_v7 = vand.u32 2147483647, %v1791_v55 }
0x2363   :  { %v1804_v63 = vor.u32 1.1754944e-38, %v1803_v11  ;;  %vm1802_vm12 = vcmp.eq.f32.partialorder %v1801_v7, 8.507059e+37 }
0x2367   :  { %v2216_v61 = vpop.eup %2215 }
0x2368   :  { %v1793_v62 = vmul.f32 %v2216_v61, %v1791_v55  ;;  %vm1798_vm11 = vweird.f32 %v2216_v61 }
0x2369   :  { %vm1799_vm9 = vmor %vm1797_vm4, %vm1798_vm11 }
0x236a   :  { %v1794_v17 = vsub.f32 1.0, %v1793_v62  ;;  %v1919_v62 = vld [vmem:[#allocation20] sm:$0xff] }
0x236b   :  { %1948 = vmatpush.msra.mxu2 %v1919_v62 }
0x236c   :  { %v1795_v0 = vmul.f32 %v2216_v61, %v1794_v17 }
0x236e   :  { %v1796_v10 = vadd.f32 %v2216_v61, %v1795_v0 }
0x2370   :  { %v1800_v12 = vsel %vm1799_vm9, %v2216_v61, %v1796_v10 }
0x2371   :  { %v1805_v4 = vsel %vm1802_vm12, %v1804_v63, %v1800_v12 }
0x23b0   :  { %v1811_v6 = vpop.permute.xlu2 %1810 }
0x23b1   :  { %v1813_v22 = vmul.f32 %v1811_v6, %v1805_v4 }
0x23b3   :  { %1815 = vrot.lane.b32.xlu0 %v1813_v22, %s2518_s17 }
0x23bb   :  { %1847 = vrot.lane.b32.xlu0 %v1841_v23, %s2518_s17 }
0x2425   :  { %v1816_v2 = vpop.permute.xlu0 %1815 }
0x2426   :  { %v1818_v25 = vadd.f32 %v1816_v2, %v3058_v18  ;;  %v1838_v18 = vsel %vm292_vm1, %v3066_v36, %v3079_v19 }
0x2427   :  { %v1839_v13 = vsel %vm296_vm3, %v1838_v18, %v1757_v48 }
0x2428   :  { %2217 = vtanh.f32 %v1818_v25 }
0x242d   :  { %v1848_v56 = vpop.permute.xlu0 %1847 }
0x242e   :  { %v2218_v37 = vpop.eup %2217  ;;  %v1853_v24 = vsel %vm456_vm5, %v1848_v56, 0.0 }
0x242f   :  { %v1821_v5 = vrot.slane %v2218_v37, 2 }
0x2431   :  { %v1823_v26 = vsub.f32 %v1757_v48, %v1821_v5 }
0x2433   :  { %v1825_v15 = vrot.slane %v1823_v26, 6 }
0x2435   :  { %1826 = vrot.lane.b32.xlu1 %v1825_v15, %s2520_s12  ;;  %s1978_s12 = sshll.u32 %s3163_s16, 4  ;;  %s1979_s12 = int_to_ptr.hbm [resolvable:$true] %s1978_s12 }
0x24a7   :  { %v1827_v16 = vpop.permute.xlu1 %1826 }
0x24a8   :  { %v1829_v40 = vmul.f32 %v1827_v16, %v1805_v4 }
0x24aa   :  { %1831 = vrot.lane.b32.xlu2 %v1829_v40, %s2519_s20 }
0x24d3   :  { %1854 = vadd.xlane.f32.xlu2 %v1853_v24 }
0x2504   :  { %v1832_v47 = vpop.permute.xlu2 %1831 }
0x2505   :  { %v1834_v1 = vadd.f32 %v2218_v37, %v1832_v47 }
0x2507   :  { %v1840_v8 = vsel %vm300_vm7, %v1839_v13, %v1834_v1 }
0x2508   :  { %v1842_v27 = vmax.f32 %v1840_v8, 0.0 }
0x250a   :  { %1849 = vrot.lane.b32.xlu1 %v1842_v27, %s2518_s17 }
0x2546   :  { %v1855_v30 = vpop.xlane.xlu2 %1854 }
0x2547   :  { %v1859_v31 = vmul.f32 %v1855_v30, %v2745_v14 }
0x2549   :  { %v1861_v58 = vsub.f32 %v1841_v23, %v1859_v31 }
0x254b   :  { %v1863_v57 = vmul.f32 %v1861_v58, %v1861_v58 }
0x254d   :  { %1867 = vrot.lane.b32.xlu1 %v1863_v57, %s2518_s17 }
0x257c   :  { %v1850_v32 = vpop.permute.xlu1 %1849 }
0x257d   :  { %v1856_v59 = vsel %vm456_vm5, %v1850_v32, 0.0 }
0x257e   :  { %1857 = vadd.xlane.f32.xlu0 %v1856_v59 }
0x2592   :  { %1907 = vrot.lane.b32.xlu0 %v2115_v34, %s2518_s17 }
0x25bf   :  { %v1868_v35 = vpop.permute.xlu1 %1867 }
0x25c0   :  { %v1873_v38 = vsel %vm456_vm5, %v1868_v35, 0.0 }
0x25f1   :  { %v1858_v36 = vpop.xlane.xlu0 %1857 }
0x25f2   :  { %v1860_v19 = vmul.f32 %v1858_v36, %v2745_v14 }
0x25f4   :  { %v1862_v60 = vsub.f32 %v1842_v27, %v1860_v19 }
0x25f6   :  { %v1864_v33 = vmul.f32 %v1862_v60, %v1862_v60 }
0x25f8   :  { %1869 = vrot.lane.b32.xlu1 %v1864_v33, %s2518_s17 }
0x2604   :  { %v1908_v10 = vpop.permute.xlu0 %1907 }
0x2622   :  { %1874 = vadd.xlane.f32.xlu1 %v1873_v38 }
0x266a   :  { %v1870_v39 = vpop.permute.xlu1 %1869 }
0x266b   :  { %v1876_v41 = vsel %vm456_vm5, %v1870_v39, 0.0 }
0x266c   :  { %1877 = vadd.xlane.f32.xlu2 %v1876_v41 }
0x2684   :  { %1914 = vrot.lane.b32.xlu2 %v2116_v42, %s2518_s17 }
0x268c   :  { %1965 = vrot.lane.b32.xlu2 %v1834_v1, %s2518_s17 }
0x2695   :  { %v1875_v44 = vpop.xlane.xlu1 %1874 }
0x2696   :  { %v1879_v43 = vmul.f32 %v1875_v44, %v2745_v14 }
0x2698   :  { %v1881_v46 = vadd.f32 1e-05, %v1879_v43 }
0x269a   :  { %2219 = vrsqrt.f32 %v1881_v46  ;;  %vm1889_vm3 = vweird.f32 %v1881_v46 }
0x26a0   :  { %v2220_v48 = vpop.eup %2219 }
0x26a1   :  { %v1884_v28 = vmul.f32 %v2220_v48, %v1881_v46  ;;  %vm1890_vm1 = vweird.f32 %v2220_v48 }
0x26a2   :  { %vm1891_vm7 = vmor %vm1889_vm3, %vm1890_vm1 }
0x26a3   :  { %v1885_v49 = vmul.f32 %v2220_v48, %v1884_v28 }
0x26a5   :  { %v1886_v50 = vmul.f32 0.5, %v1885_v49 }
0x26a7   :  { %v1887_v51 = vsub.f32 1.5, %v1886_v50 }
0x26a9   :  { %v1888_v3 = vmul.f32 %v2220_v48, %v1887_v51 }
0x26ab   :  { %v1892_v54 = vsel %vm1891_vm7, %v2220_v48, %v1888_v3 }
0x26ac   :  { %v1903_v17 = vmul.f32 %v1892_v54, %v1861_v58 }
0x26ae   :  { %v1910_v11 = vmul.f32 %v1908_v10, %v1903_v17 }
0x26df   :  { %v1878_v55 = vpop.xlane.xlu2 %1877 }
0x26e0   :  { %v1880_v61 = vmul.f32 %v1878_v55, %v2745_v14 }
0x26e2   :  { %v1882_v0 = vadd.f32 1e-05, %v1880_v61 }
0x26e4   :  { %2221 = vrsqrt.f32 %v1882_v0  ;;  %vm1899_vm6 = vweird.f32 %v1882_v0 }
0x26e7   :  { %v1915_v7 = vpop.permute.xlu2 %1914 }
0x26e8   :  { %v1917_v12 = vadd.f32 %v1915_v7, %v1910_v11 }
0x26ea   :  { %v2222_v63 = vpop.eup %2221  ;;  %1925 = vrot.lane.b32.xlu0 %v1917_v12, %s2518_s17 }
0x26eb   :  { %v1894_v6 = vmul.f32 %v2222_v63, %v1882_v0  ;;  %vm1900_vm14 = vweird.f32 %v2222_v63 }
0x26ec   :  { %vm1901_vm8 = vmor %vm1899_vm6, %vm1900_vm14 }
0x26ed   :  { %v1895_v4 = vmul.f32 %v2222_v63, %v1894_v6 }
0x26ef   :  { %v1896_v22 = vmul.f32 0.5, %v1895_v4  ;;  %v1966_v9 = vpop.permute.xlu2 %1965 }
0x26f0   :  { %1969 = vst.msk [vmem:[#allocation21 - $0x4] sm:$0xc0] %vm1962_vm13, %v1966_v9 }
0x26f1   :  { %v1897_v14 = vsub.f32 1.5, %v1896_v22 }
0x26f2   :  { %1959 = vrot.lane.b32.xlu0 %v3042_v45, %s2518_s17 }
0x26f3   :  { %v1898_v20 = vmul.f32 %v2222_v63, %v1897_v14 }
0x26f5   :  { %v1902_v21 = vsel %vm1901_vm8, %v2222_v63, %v1898_v20 }
0x26f6   :  { %v1904_v23 = vmul.f32 %v1902_v21, %v1862_v60 }
0x26f8   :  { %v1911_v2 = vmul.f32 %v1908_v10, %v1904_v23 }
0x26fa   :  { %v1918_v25 = vadd.f32 %v1915_v7, %v1911_v2 }
0x26fc   :  { %1927 = vrot.lane.b32.xlu1 %v1918_v25, %s2518_s17 }
0x275c   :  { %v1926_v37 = vpop.permute.xlu0 %1925 }
0x275d   :  { %2086 = vmatmul.msk.f32.vlgmr.msra.gmra.mxu2 %vm456_vm5, %v1926_v37 }
0x2764   :  { %v1960_v5 = vpop.permute.xlu0 %1959 }
0x2765   :  { %1963 = vst.msk [vmem:[#allocation21 - $0x6] sm:$0xc0] %vm1962_vm13, %v1960_v5 }
0x2766   :  { %1984 = dma.vmem_to_hbm [thread:$0]  %s1977_s4, 64, %s1979_s12, [#allocation4], %s2519_s20, %s2519_s20, %s2522_s14  }
0x276e   :  { %v1928_v26 = vpop.permute.xlu1 %1927 }
0x276f   :  { %2087 = vmatmul.msk.f32.gmra.mxu2 %vm456_vm5, %v1928_v26 }
0x27e0   :  { %v1950_v45 = vpop.f32.mrf.mxu2 }
0x27e1   :  { %1956 = vst [vmem:[%s3162_s15] sm:$0xff] %v1950_v45 }
0x27f2   :  { %v1953_v15 = vpop.f32.mrf.mxu2 }
0x27f3   :  { %1957 = vst [vmem:[%s3162_s15 + $0x8] sm:$0xff] %v1953_v15 }
0x27f4   :  { %2501 = dma.done.wait [#allocation4], 64  }
0x27f5   :  { %2502 = vsyncadd [#allocation4], 4294967232 }
0x27f6   :  { %1991 = vsyncpa [#allocation3], 1 }
0x27f7   :  { %1992 = vsyncpa [#allocation10], 1 }
0x27f8   :  { %1993 = vsyncpa [#allocation13], 1 }
0x27f9   :  { %1994 = vsyncpa [#allocation16], 1 }
0x27fa   :  { %1995 = vsyncpa [#allocation19], 1 }
0x27fb   :  { %1996 = vsyncpa [#allocation4], 1 }
0x27fc   :  { %1997 = vsyncpa [#allocation5], 1 }
0x27fd   :  { %1998 = vsyncpa [#allocation7], 1 }

</bundles_post_ra>
